<compile_context>
chip_gen: v5e
topology: v5e:2x2
jax: 0.10.0
libtpu: 0.0.40
codegen_flags: <defaults>
</compile_context>

<pallas_src>
import functools
import math

import jax
import jax.numpy as jnp
from jax.experimental import pallas as pl
from jax.experimental.pallas import tpu as pltpu


_VMEM_LIMIT = 48 * 1024 * 1024  # stay under v7x's 64 MiB physical VMEM


def _cparams(n_axes=1):
    return pltpu.CompilerParams(
        dimension_semantics=("parallel",) * n_axes,
        vmem_limit_bytes=_VMEM_LIMIT,
    )


def _row_tile(m, target=256):
    # TODO(synk): for very large M that is not a multiple of `target`, rely on
    # Pallas edge-block masking; toy sizes always take the m<=target branch.
    return m if m <= target else target


# ----------------------------- Pallas kernels ------------------------------

def _proj_split_kernel(x_ref, w_ref, b_ref, *o_refs, d_out, q_scale):
    """y = x @ W + b (bf16 MXU, f32 acc), split into len(o_refs) column chunks
    of width d_out. Chunk 0 is optionally pre-scaled (folds 1/sqrt(dk) into Q)."""
    x = x_ref[...].astype(jnp.bfloat16)
    y = jnp.dot(x, w_ref[...], preferred_element_type=jnp.float32) + b_ref[...]
    for idx, o_ref in enumerate(o_refs):
        part = y[:, idx * d_out:(idx + 1) * d_out]
        if idx == 0 and q_scale != 1.0:
            part = part * q_scale
        o_ref[...] = part.astype(o_ref.dtype)


def _out_proj_ln_kernel(a_ref, res_ref, w_ref, b_ref, g_ref, beta_ref, o_ref, *,
                        eps):
    """LayerNorm(residual + attn @ Wo + bo)   (biased variance, like torch)."""
    a = a_ref[...].astype(jnp.bfloat16)
    y = jnp.dot(a, w_ref[...], preferred_element_type=jnp.float32) + b_ref[...]
    z = y + res_ref[...]
    mu = jnp.mean(z, axis=-1, keepdims=True)
    var = jnp.mean((z - mu) * (z - mu), axis=-1, keepdims=True)
    zn = (z - mu) * jax.lax.rsqrt(var + eps)
    o_ref[...] = (zn * g_ref[...] + beta_ref[...]).astype(o_ref.dtype)


def _ffn_ln_kernel(x_ref, w1_ref, b1_ref, w2_ref, b2_ref, g_ref, beta_ref,
                   o_ref, *, eps):
    """LayerNorm(x + relu(x @ W1 + b1) @ W2 + b2)."""
    x = x_ref[...]
    h = jnp.dot(x.astype(jnp.bfloat16), w1_ref[...],
                preferred_element_type=jnp.float32) + b1_ref[...]
    h = jnp.maximum(h, 0.0)
    y = jnp.dot(h.astype(jnp.bfloat16), w2_ref[...],
                preferred_element_type=jnp.float32) + b2_ref[...]
    z = x + y
    mu = jnp.mean(z, axis=-1, keepdims=True)
    var = jnp.mean((z - mu) * (z - mu), axis=-1, keepdims=True)
    zn = (z - mu) * jax.lax.rsqrt(var + eps)
    o_ref[...] = (zn * g_ref[...] + beta_ref[...]).astype(o_ref.dtype)


def _attn_kernel(q_ref, k_ref, v_ref, mq_ref, mk_ref, o_ref, *, num_heads,
                 causal):
    """All heads of one batch element; mask built in-kernel from validity
    vectors (+ causal iota).  Q already carries the 1/sqrt(dk) scale."""
    Sq, D = q_ref.shape[1], q_ref.shape[2]
    Sk = k_ref.shape[1]
    dk = D // num_heads

    q = q_ref[0].astype(jnp.bfloat16)          # (Sq, D)
    k = k_ref[0].astype(jnp.bfloat16)          # (Sk, D)
    v = v_ref[0].astype(jnp.bfloat16)          # (Sk, D)

    valid = (mq_ref[0] > 0.5) & (mk_ref[0] > 0.5)        # (Sq,1)&(1,Sk)->(Sq,Sk)
    if causal:
        rows = jax.lax.broadcasted_iota(jnp.int32, (Sq, Sk), 0)
        cols = jax.lax.broadcasted_iota(jnp.int32, (Sq, Sk), 1)
        valid = valid & (cols <= rows)
    neg = jnp.float32(-1e9)

    outs = []
    for h in range(num_heads):
        qh = q[:, h * dk:(h + 1) * dk]
        kh = k[:, h * dk:(h + 1) * dk]
        vh = v[:, h * dk:(h + 1) * dk]
        s = jax.lax.dot_general(qh, kh, (((1,), (1,)), ((), ())),
                                preferred_element_type=jnp.float32)
        s = jnp.where(valid, s, neg)
        s = s - jnp.max(s, axis=-1, keepdims=True)
        p = jnp.exp(s)
        p = p * pl.reciprocal(jnp.sum(p, axis=-1, keepdims=True), approx=True)
        outs.append(jnp.dot(p.astype(jnp.bfloat16), vh,
                            preferred_element_type=jnp.float32))
    o_ref[0] = jnp.concatenate(outs, axis=-1).astype(o_ref.dtype)


# ----------------------------- kernel wrappers ------------------------------

def proj_split(x2d, w, b, n_out, q_scale=1.0, tile_m=256):
    M, K = x2d.shape
    N = w.shape[1]
    d_out = N // n_out
    tm = _row_tile(M, tile_m)
    kernel = functools.partial(_proj_split_kernel, d_out=d_out,
                               q_scale=float(q_scale))
    res = pl.pallas_call(
        kernel,
        out_shape=tuple(jax.ShapeDtypeStruct((M, d_out), jnp.float32)
                        for _ in range(n_out)),
        grid=(pl.cdiv(M, tm),),
        in_specs=[
            pl.BlockSpec((tm, K), lambda i: (i, 0)),
            pl.BlockSpec((K, N), lambda i: (0, 0)),   # resident weights
            pl.BlockSpec((1, N), lambda i: (0, 0)),
        ],
        out_specs=tuple(pl.BlockSpec((tm, d_out), lambda i: (i, 0))
                        for _ in range(n_out)),
        compiler_params=_cparams(1),
    )(x2d, w, b.reshape(1, N))
    return res if isinstance(res, (tuple, list)) else (res,)


def attn_out_layernorm(attn2d, res2d, wo, bo, gamma, beta, eps=1e-5, tile_m=256):
    M, D = attn2d.shape
    tm = _row_tile(M, tile_m)
    kernel = functools.partial(_out_proj_ln_kernel, eps=eps)
    return pl.pallas_call(
        kernel,
        out_shape=jax.ShapeDtypeStruct((M, D), jnp.float32),
        grid=(pl.cdiv(M, tm),),
        in_specs=[
            pl.BlockSpec((tm, D), lambda i: (i, 0)),
            pl.BlockSpec((tm, D), lambda i: (i, 0)),
            pl.BlockSpec((D, D), lambda i: (0, 0)),
            pl.BlockSpec((1, D), lambda i: (0, 0)),
            pl.BlockSpec((1, D), lambda i: (0, 0)),
            pl.BlockSpec((1, D), lambda i: (0, 0)),
        ],
        out_specs=pl.BlockSpec((tm, D), lambda i: (i, 0)),
        compiler_params=_cparams(1),
    )(attn2d, res2d, wo, bo.reshape(1, D), gamma.reshape(1, D),
      beta.reshape(1, D))


def ffn_layernorm(x2d, w1, b1, w2, b2, gamma, beta, eps=1e-5, tile_m=256):
    M, D = x2d.shape
    F = w1.shape[1]
    tm = _row_tile(M, tile_m)
    kernel = functools.partial(_ffn_ln_kernel, eps=eps)
    return pl.pallas_call(
        kernel,
        out_shape=jax.ShapeDtypeStruct((M, D), jnp.float32),
        grid=(pl.cdiv(M, tm),),
        in_specs=[
            pl.BlockSpec((tm, D), lambda i: (i, 0)),
            pl.BlockSpec((D, F), lambda i: (0, 0)),
            pl.BlockSpec((1, F), lambda i: (0, 0)),
            pl.BlockSpec((F, D), lambda i: (0, 0)),
            pl.BlockSpec((1, D), lambda i: (0, 0)),
            pl.BlockSpec((1, D), lambda i: (0, 0)),
            pl.BlockSpec((1, D), lambda i: (0, 0)),
        ],
        out_specs=pl.BlockSpec((tm, D), lambda i: (i, 0)),
        compiler_params=_cparams(1),
    )(x2d, w1, b1.reshape(1, F), w2, b2.reshape(1, D),
      gamma.reshape(1, D), beta.reshape(1, D))


def sdpa(q, k, v, mq, mk, num_heads, causal):
    B, Sq, D = q.shape
    Sk = k.shape[1]
    kernel = functools.partial(_attn_kernel, num_heads=num_heads, causal=causal)
    return pl.pallas_call(
        kernel,
        out_shape=jax.ShapeDtypeStruct((B, Sq, D), jnp.float32),
        grid=(B,),
        in_specs=[
            pl.BlockSpec((1, Sq, D), lambda b: (b, 0, 0)),
            pl.BlockSpec((1, Sk, D), lambda b: (b, 0, 0)),
            pl.BlockSpec((1, Sk, D), lambda b: (b, 0, 0)),
            pl.BlockSpec((1, Sq, 1), lambda b: (b, 0, 0)),
            pl.BlockSpec((1, 1, Sk), lambda b: (b, 0, 0)),
        ],
        out_specs=pl.BlockSpec((1, Sq, D), lambda b: (b, 0, 0)),
        compiler_params=_cparams(1),
    )(q, k, v, mq, mk)


# ----------------------------- model pieces ------------------------------

def _self_attention(p, x, mq, mk, num_heads, causal):
    B, S, D = x.shape
    scale = 1.0 / math.sqrt(D // num_heads)
    q, k, v = proj_split(x.reshape(B * S, D), p["Wqkv"], p["bqkv"], 3,
                         q_scale=scale)
    return sdpa(q.reshape(B, S, D), k.reshape(B, S, D), v.reshape(B, S, D),
                mq, mk, num_heads, causal)


def _cross_attention(p, x, enc, mq, mk, num_heads):
    B, Sq, D = x.shape
    Sk = enc.shape[1]
    scale = 1.0 / math.sqrt(D // num_heads)
    (q,) = proj_split(x.reshape(B * Sq, D), p["Wq"], p["bq"], 1, q_scale=scale)
    k, v = proj_split(enc.reshape(B * Sk, D), p["Wkv"], p["bkv"], 2)
    return sdpa(q.reshape(B, Sq, D), k.reshape(B, Sk, D), v.reshape(B, Sk, D),
                mq, mk, num_heads, False)


def encoder_layer(p, x, mq_ones, mk_src, num_heads):
    B, S, D = x.shape
    attn = _self_attention(p["self_attn"], x, mq_ones, mk_src, num_heads, False)
    x2d = attn_out_layernorm(attn.reshape(B * S, D), x.reshape(B * S, D),
                             p["self_attn"]["Wo"], p["self_attn"]["bo"],
                             p["norm1_g"], p["norm1_b"])
    x2d = ffn_layernorm(x2d, p["ff_w1"], p["ff_b1"], p["ff_w2"], p["ff_b2"],
                        p["norm2_g"], p["norm2_b"])
    return x2d.reshape(B, S, D)


def decoder_layer(p, x, enc, mq_tgt, mk_tgt_ones, mq_tgt_ones, mk_src,
                  num_heads):
    B, St, D = x.shape
    attn = _self_attention(p["self_attn"], x, mq_tgt, mk_tgt_ones, num_heads,
                           True)
    x2d = attn_out_layernorm(attn.reshape(B * St, D), x.reshape(B * St, D),
                             p["self_attn"]["Wo"], p["self_attn"]["bo"],
                             p["norm1_g"], p["norm1_b"])
    x = x2d.reshape(B, St, D)
    attn = _cross_attention(p["cross_attn"], x, enc, mq_tgt_ones, mk_src,
                            num_heads)
    x2d = attn_out_layernorm(attn.reshape(B * St, D), x2d,
                             p["cross_attn"]["Wo"], p["cross_attn"]["bo"],
                             p["norm2_g"], p["norm2_b"])
    x2d = ffn_layernorm(x2d, p["ff_w1"], p["ff_b1"], p["ff_w2"], p["ff_b2"],
                        p["norm3_g"], p["norm3_b"])
    return x2d.reshape(B, St, D)


def make_positional_encoding(max_len, d_model):
    pos = jnp.arange(max_len, dtype=jnp.float32)[:, None]
    div = jnp.exp(jnp.arange(0, d_model, 2, dtype=jnp.float32)
                  * (-math.log(10000.0) / d_model))
    pe = jnp.zeros((max_len, d_model), jnp.float32)
    pe = pe.at[:, 0::2].set(jnp.sin(pos * div))
    pe = pe.at[:, 1::2].set(jnp.cos(pos * div))
    return pe


def transformer_forward(params, src, tgt, *, num_heads, tgt_vocab):
    B, Ss = src.shape
    St = tgt.shape[1]
    D = params["enc_emb"].shape[1]

    # --- tiny validity vectors instead of B*S^2 f32 masks (bias built in-kernel) ---
    src_valid = (src != 0).astype(jnp.float32)
    tgt_valid = (tgt != 0).astype(jnp.float32)
    mk_src = src_valid[:, None, :]                       # (B, 1, Ss)  key mask
    mq_src_ones = jnp.ones((B, Ss, 1), jnp.float32)
    mq_tgt = tgt_valid[:, :, None]                       # (B, St, 1)  query mask
    mk_tgt_ones = jnp.ones((B, 1, St), jnp.float32)
    mq_tgt_ones = jnp.ones((B, St, 1), jnp.float32)

    # --- embeddings + positional encoding (glue); dropout == identity ---
    pe = params["pe"]
    enc_x = jnp.take(params["enc_emb"], src, axis=0) + pe[None, :Ss, :]
    dec_x = jnp.take(params["dec_emb"], tgt, axis=0) + pe[None, :St, :]

    for lp in params["enc_layers"]:
        enc_x = encoder_layer(lp, enc_x, mq_src_ones, mk_src, num_heads)
    for lp in params["dec_layers"]:
        dec_x = decoder_layer(lp, dec_x, enc_x, mq_tgt, mk_tgt_ones,
                              mq_tgt_ones, mk_src, num_heads)

    # final projection (vocab padded to a multiple of 128 lanes, sliced after)
    (logits_p,) = proj_split(dec_x.reshape(B * St, D),
                             params["fc_w"], params["fc_b"], 1)
    return logits_p[:, :tgt_vocab].reshape(B, St, tgt_vocab)


# ----------------------------- parameter init ------------------------------

def init_params(key, src_vocab, tgt_vocab, d_model, num_heads, num_layers,
                d_ff, max_seq_len):
    keys = iter(jax.random.split(key, 4096))

    def dense(shape, scale=0.02, dtype=jnp.bfloat16):
        return (scale * jax.random.normal(next(keys), shape)).astype(dtype)

    def self_attn_params():
        return {"Wqkv": dense((d_model, 3 * d_model)),
                "bqkv": jnp.zeros((3 * d_model,), jnp.float32),
                "Wo": dense((d_model, d_model)),
                "bo": jnp.zeros((d_model,), jnp.float32)}

    def cross_attn_params():
        return {"Wq": dense((d_model, d_model)),
                "bq": jnp.zeros((d_model,), jnp.float32),
                "Wkv": dense((d_model, 2 * d_model)),
                "bkv": jnp.zeros((2 * d_model,), jnp.float32),
                "Wo": dense((d_model, d_model)),
                "bo": jnp.zeros((d_model,), jnp.float32)}

    def ff_params():
        return {"ff_w1": dense((d_model, d_ff)),
                "ff_b1": jnp.zeros((d_ff,), jnp.float32),
                "ff_w2": dense((d_ff, d_model)),
                "ff_b2": jnp.zeros((d_model,), jnp.float32)}

    def norm(n):
        return {f"norm{n}_g": jnp.ones((d_model,), jnp.float32),
                f"norm{n}_b": jnp.zeros((d_model,), jnp.float32)}

    def enc_layer_params():
        p = {"self_attn": self_attn_params()}
        p.update(ff_params()); p.update(norm(1)); p.update(norm(2))
        return p

    def dec_layer_params():
        p = {"self_attn": self_attn_params(), "cross_attn": cross_attn_params()}
        p.update(ff_params()); p.update(norm(1)); p.update(norm(2))
        p.update(norm(3))
        return p

    vocab_pad = ((tgt_vocab + 127) // 128) * 128
    fc_w = jnp.pad(dense((d_model, tgt_vocab)),
                   ((0, 0), (0, vocab_pad - tgt_vocab)))

    return {
        "enc_emb": dense((src_vocab, d_model), scale=1.0, dtype=jnp.float32),
        "dec_emb": dense((tgt_vocab, d_model), scale=1.0, dtype=jnp.float32),
        "pe": make_positional_encoding(max_seq_len, d_model),
        "enc_layers": [enc_layer_params() for _ in range(num_layers)],
        "dec_layers": [dec_layer_params() for _ in range(num_layers)],
        "fc_w": fc_w,
        "fc_b": jnp.zeros((vocab_pad,), jnp.float32),
    }


# ----------------------------- main ------------------------------

if __name__ == "__main__":
    src_vocab, tgt_vocab = 53, 47
    d_model, num_heads, num_layers, d_ff = 32, 4, 2, 64
    max_seq_len = 16
    B, S_src, S_tgt = 2, 8, 8

    key = jax.random.PRNGKey(0)
    pkey, skey, tkey = jax.random.split(key, 3)

    params = init_params(pkey, src_vocab, tgt_vocab, d_model, num_heads,
                         num_layers, d_ff, max_seq_len)
    src = jax.random.randint(skey, (B, S_src), 0, src_vocab, dtype=jnp.int32)
    tgt = jax.random.randint(tkey, (B, S_tgt), 0, tgt_vocab, dtype=jnp.int32)

    fwd = jax.jit(functools.partial(transformer_forward,
                                    num_heads=num_heads, tgt_vocab=tgt_vocab))
    out = jax.block_until_ready(fwd(params, src, tgt))
    assert out.shape == (B, S_tgt, tgt_vocab), out.shape
    assert bool(jnp.all(jnp.isfinite(out)))
    print("KERNEL_OK")
</pallas_src>

<mosaic_0001>
module attributes {stable_mosaic.version = 11 : i64} {
  func.func @_proj_split_kernel(%arg0: i32, %arg1: memref<16x32xf32, #tpu.memory_space<vmem>>, %arg2: memref<32x96xbf16, #tpu.memory_space<vmem>>, %arg3: memref<1x96xf32, #tpu.memory_space<vmem>>, %arg4: memref<16x32xf32, #tpu.memory_space<vmem>>, %arg5: memref<16x32xf32, #tpu.memory_space<vmem>>, %arg6: memref<16x32xf32, #tpu.memory_space<vmem>>) attributes {dimension_semantics = [#tpu.dimension_semantics<parallel>], iteration_bounds = array<i64: 1>, scalar_prefetch = 0 : i64, scratch_operands = 0 : i64, tpu.core_type = #tpu.core_type<tc>, window_params = [{transform_indices = @transform_0, window_bounds = array<i64: 16, 32>}, {pipeline_mode = #tpu.pipeline_mode<synchronous>, transform_indices = @transform_1, window_bounds = array<i64: 32, 96>}, {pipeline_mode = #tpu.pipeline_mode<synchronous>, transform_indices = @transform_2, window_bounds = array<i64: 1, 96>}, {transform_indices = @transform_3, window_bounds = array<i64: 16, 32>}, {transform_indices = @transform_4, window_bounds = array<i64: 16, 32>}, {transform_indices = @transform_5, window_bounds = array<i64: 16, 32>}]} {
    %c0 = arith.constant 0 : index
    %c0_0 = arith.constant 0 : index
    %0 = vector.load %arg1[%c0, %c0_0] : memref<16x32xf32, #tpu.memory_space<vmem>>, vector<16x32xf32>
    %1 = arith.truncf %0 : vector<16x32xf32> to vector<16x32xbf16>
    %c0_1 = arith.constant 0 : index
    %c0_2 = arith.constant 0 : index
    %2 = vector.load %arg2[%c0_1, %c0_2] : memref<32x96xbf16, #tpu.memory_space<vmem>>, vector<32x96xbf16>
    %cst = arith.constant dense<0.000000e+00> : vector<16x96xf32>
    %3 = tpu.matmul %1, %2, %cst {dimension_numbers = #tpu.dot_dimension_numbers<[1], [0], [0], [1], [0, 0, 1, 1], [], []>} : vector<16x32xbf16>, vector<32x96xbf16>, vector<16x96xf32> -> vector<16x96xf32>
    %c0_3 = arith.constant 0 : index
    %c0_4 = arith.constant 0 : index
    %4 = vector.load %arg3[%c0_3, %c0_4] : memref<1x96xf32, #tpu.memory_space<vmem>>, vector<1x96xf32>
    %5 = vector.broadcast %4 : vector<1x96xf32> to vector<16x96xf32>
    %6 = arith.addf %3, %5 : vector<16x96xf32>
    %7 = vector.extract_strided_slice %6 {offsets = [0, 0], sizes = [16, 32], strides = [1, 1]} : vector<16x96xf32> to vector<16x32xf32>
    %cst_5 = arith.constant 0.353553385 : f32
    %8 = vector.broadcast %cst_5 : f32 to vector<16x32xf32>
    %9 = arith.mulf %7, %8 : vector<16x32xf32>
    %c0_6 = arith.constant 0 : index
    %c0_7 = arith.constant 0 : index
    %10 = vector.load %arg4[%c0_6, %c0_7] : memref<16x32xf32, #tpu.memory_space<vmem>>, vector<16x32xf32>
    tpu.vector_store %arg4[%c0_6, %c0_7], %9 {strides = array<i32>} : memref<16x32xf32, #tpu.memory_space<vmem>>, vector<16x32xf32>,
    %11 = vector.extract_strided_slice %6 {offsets = [0, 32], sizes = [16, 32], strides = [1, 1]} : vector<16x96xf32> to vector<16x32xf32>
    %c0_8 = arith.constant 0 : index
    %c0_9 = arith.constant 0 : index
    %12 = vector.load %arg5[%c0_8, %c0_9] : memref<16x32xf32, #tpu.memory_space<vmem>>, vector<16x32xf32>
    tpu.vector_store %arg5[%c0_8, %c0_9], %11 {strides = array<i32>} : memref<16x32xf32, #tpu.memory_space<vmem>>, vector<16x32xf32>,
    %13 = vector.extract_strided_slice %6 {offsets = [0, 64], sizes = [16, 32], strides = [1, 1]} : vector<16x96xf32> to vector<16x32xf32>
    %c0_10 = arith.constant 0 : index
    %c0_11 = arith.constant 0 : index
    %14 = vector.load %arg6[%c0_10, %c0_11] : memref<16x32xf32, #tpu.memory_space<vmem>>, vector<16x32xf32>
    tpu.vector_store %arg6[%c0_10, %c0_11], %13 {strides = array<i32>} : memref<16x32xf32, #tpu.memory_space<vmem>>, vector<16x32xf32>,
    return
  }
  func.func @transform_0(%arg0: i32) -> (i32, i32) {
    %c0_i32 = arith.constant 0 : i32
    %c0_i32_0 = arith.constant 0 : i32
    return %arg0, %c0_i32 : i32, i32
  }
  func.func @transform_1(%arg0: i32) -> (i32, i32) {
    %c0_i32 = arith.constant 0 : i32
    %c0_i32_0 = arith.constant 0 : i32
    %c0_i32_1 = arith.constant 0 : i32
    return %c0_i32, %c0_i32_0 : i32, i32
  }
  func.func @transform_2(%arg0: i32) -> (i32, i32) {
    %c0_i32 = arith.constant 0 : i32
    %c0_i32_0 = arith.constant 0 : i32
    %c0_i32_1 = arith.constant 0 : i32
    return %c0_i32, %c0_i32_0 : i32, i32
  }
  func.func @transform_3(%arg0: i32) -> (i32, i32) {
    %c0_i32 = arith.constant 0 : i32
    %c0_i32_0 = arith.constant 0 : i32
    return %arg0, %c0_i32 : i32, i32
  }
  func.func @transform_4(%arg0: i32) -> (i32, i32) {
    %c0_i32 = arith.constant 0 : i32
    %c0_i32_0 = arith.constant 0 : i32
    return %arg0, %c0_i32 : i32, i32
  }
  func.func @transform_5(%arg0: i32) -> (i32, i32) {
    %c0_i32 = arith.constant 0 : i32
    %c0_i32_0 = arith.constant 0 : i32
    return %arg0, %c0_i32 : i32, i32
  }
}

module attributes {stable_mosaic.version = 11 : i64} {
  func.func @_out_proj_ln_kernel(%arg0: i32, %arg1: memref<16x32xf32, #tpu.memory_space<vmem>>, %arg2: memref<16x32xf32, #tpu.memory_space<vmem>>, %arg3: memref<32x32xbf16, #tpu.memory_space<vmem>>, %arg4: memref<1x32xf32, #tpu.memory_space<vmem>>, %arg5: memref<1x32xf32, #tpu.memory_space<vmem>>, %arg6: memref<1x32xf32, #tpu.memory_space<vmem>>, %arg7: memref<16x32xf32, #tpu.memory_space<vmem>>) attributes {dimension_semantics = [#tpu.dimension_semantics<parallel>], iteration_bounds = array<i64: 1>, scalar_prefetch = 0 : i64, scratch_operands = 0 : i64, tpu.core_type = #tpu.core_type<tc>, window_params = [{transform_indices = @transform_0, window_bounds = array<i64: 16, 32>}, {transform_indices = @transform_1, window_bounds = array<i64: 16, 32>}, {pipeline_mode = #tpu.pipeline_mode<synchronous>, transform_indices = @transform_2, window_bounds = array<i64: 32, 32>}, {pipeline_mode = #tpu.pipeline_mode<synchronous>, transform_indices = @transform_3, window_bounds = array<i64: 1, 32>}, {pipeline_mode = #tpu.pipeline_mode<synchronous>, transform_indices = @transform_4, window_bounds = array<i64: 1, 32>}, {pipeline_mode = #tpu.pipeline_mode<synchronous>, transform_indices = @transform_5, window_bounds = array<i64: 1, 32>}, {transform_indices = @transform_6, window_bounds = array<i64: 16, 32>}]} {
    %c0 = arith.constant 0 : index
    %c0_0 = arith.constant 0 : index
    %0 = vector.load %arg1[%c0, %c0_0] : memref<16x32xf32, #tpu.memory_space<vmem>>, vector<16x32xf32>
    %1 = arith.truncf %0 : vector<16x32xf32> to vector<16x32xbf16>
    %c0_1 = arith.constant 0 : index
    %c0_2 = arith.constant 0 : index
    %2 = vector.load %arg3[%c0_1, %c0_2] : memref<32x32xbf16, #tpu.memory_space<vmem>>, vector<32x32xbf16>
    %cst = arith.constant dense<0.000000e+00> : vector<16x32xf32>
    %3 = tpu.matmul %1, %2, %cst {dimension_numbers = #tpu.dot_dimension_numbers<[1], [0], [0], [1], [0, 0, 1, 1], [], []>} : vector<16x32xbf16>, vector<32x32xbf16>, vector<16x32xf32> -> vector<16x32xf32>
    %c0_3 = arith.constant 0 : index
    %c0_4 = arith.constant 0 : index
    %4 = vector.load %arg4[%c0_3, %c0_4] : memref<1x32xf32, #tpu.memory_space<vmem>>, vector<1x32xf32>
    %5 = vector.broadcast %4 : vector<1x32xf32> to vector<16x32xf32>
    %6 = arith.addf %3, %5 : vector<16x32xf32>
    %c0_5 = arith.constant 0 : index
    %c0_6 = arith.constant 0 : index
    %7 = vector.load %arg2[%c0_5, %c0_6] : memref<16x32xf32, #tpu.memory_space<vmem>>, vector<16x32xf32>
    %8 = arith.addf %6, %7 : vector<16x32xf32>
    %cst_7 = arith.constant dense<0.000000e+00> : vector<16xf32>
    %9 = vector.multi_reduction <add>, %8, %cst_7 [1] : vector<16x32xf32> to vector<16xf32>
    %10 = vector.shape_cast %9 : vector<16xf32> to vector<16x1xf32>
    %cst_8 = arith.constant 3.200000e+01 : f32
    %11 = vector.broadcast %cst_8 : f32 to vector<16x1xf32>
    %12 = arith.divf %10, %11 : vector<16x1xf32>
    %13 = vector.broadcast %12 : vector<16x1xf32> to vector<16x32xf32>
    %14 = arith.subf %8, %13 : vector<16x32xf32>
    %15 = vector.broadcast %12 : vector<16x1xf32> to vector<16x32xf32>
    %16 = arith.subf %8, %15 : vector<16x32xf32>
    %17 = arith.mulf %14, %16 : vector<16x32xf32>
    %cst_9 = arith.constant dense<0.000000e+00> : vector<16xf32>
    %18 = vector.multi_reduction <add>, %17, %cst_9 [1] : vector<16x32xf32> to vector<16xf32>
    %19 = vector.shape_cast %18 : vector<16xf32> to vector<16x1xf32>
    %cst_10 = arith.constant 3.200000e+01 : f32
    %20 = vector.broadcast %cst_10 : f32 to vector<16x1xf32>
    %21 = arith.divf %19, %20 : vector<16x1xf32>
    %22 = vector.broadcast %12 : vector<16x1xf32> to vector<16x32xf32>
    %23 = arith.subf %8, %22 : vector<16x32xf32>
    %cst_11 = arith.constant 9.99999974E-6 : f32
    %24 = vector.broadcast %cst_11 : f32 to vector<16x1xf32>
    %25 = arith.addf %21, %24 : vector<16x1xf32>
    %26 = math.rsqrt %25 : vector<16x1xf32>
    %27 = vector.broadcast %26 : vector<16x1xf32> to vector<16x32xf32>
    %28 = arith.mulf %23, %27 : vector<16x32xf32>
    %c0_12 = arith.constant 0 : index
    %c0_13 = arith.constant 0 : index
    %29 = vector.load %arg5[%c0_12, %c0_13] : memref<1x32xf32, #tpu.memory_space<vmem>>, vector<1x32xf32>
    %30 = vector.broadcast %29 : vector<1x32xf32> to vector<16x32xf32>
    %31 = arith.mulf %28, %30 : vector<16x32xf32>
    %c0_14 = arith.constant 0 : index
    %c0_15 = arith.constant 0 : index
    %32 = vector.load %arg6[%c0_14, %c0_15] : memref<1x32xf32, #tpu.memory_space<vmem>>, vector<1x32xf32>
    %33 = vector.broadcast %32 : vector<1x32xf32> to vector<16x32xf32>
    %34 = arith.addf %31, %33 : vector<16x32xf32>
    %c0_16 = arith.constant 0 : index
    %c0_17 = arith.constant 0 : index
    %35 = vector.load %arg7[%c0_16, %c0_17] : memref<16x32xf32, #tpu.memory_space<vmem>>, vector<16x32xf32>
    tpu.vector_store %arg7[%c0_16, %c0_17], %34 {strides = array<i32>} : memref<16x32xf32, #tpu.memory_space<vmem>>, vector<16x32xf32>,
    return
  }
  func.func @transform_0(%arg0: i32) -> (i32, i32) {
    %c0_i32 = arith.constant 0 : i32
    %c0_i32_0 = arith.constant 0 : i32
    return %arg0, %c0_i32 : i32, i32
  }
  func.func @transform_1(%arg0: i32) -> (i32, i32) {
    %c0_i32 = arith.constant 0 : i32
    %c0_i32_0 = arith.constant 0 : i32
    return %arg0, %c0_i32 : i32, i32
  }
  func.func @transform_2(%arg0: i32) -> (i32, i32) {
    %c0_i32 = arith.constant 0 : i32
    %c0_i32_0 = arith.constant 0 : i32
    %c0_i32_1 = arith.constant 0 : i32
    return %c0_i32, %c0_i32_0 : i32, i32
  }
  func.func @transform_3(%arg0: i32) -> (i32, i32) {
    %c0_i32 = arith.constant 0 : i32
    %c0_i32_0 = arith.constant 0 : i32
    %c0_i32_1 = arith.constant 0 : i32
    return %c0_i32, %c0_i32_0 : i32, i32
  }
  func.func @transform_4(%arg0: i32) -> (i32, i32) {
    %c0_i32 = arith.constant 0 : i32
    %c0_i32_0 = arith.constant 0 : i32
    %c0_i32_1 = arith.constant 0 : i32
    return %c0_i32, %c0_i32_0 : i32, i32
  }
  func.func @transform_5(%arg0: i32) -> (i32, i32) {
    %c0_i32 = arith.constant 0 : i32
    %c0_i32_0 = arith.constant 0 : i32
    %c0_i32_1 = arith.constant 0 : i32
    return %c0_i32, %c0_i32_0 : i32, i32
  }
  func.func @transform_6(%arg0: i32) -> (i32, i32) {
    %c0_i32 = arith.constant 0 : i32
    %c0_i32_0 = arith.constant 0 : i32
    return %arg0, %c0_i32 : i32, i32
  }
}

module attributes {stable_mosaic.version = 11 : i64} {
  func.func @_proj_split_kernel(%arg0: i32, %arg1: memref<16x32xf32, #tpu.memory_space<vmem>>, %arg2: memref<32x32xbf16, #tpu.memory_space<vmem>>, %arg3: memref<1x32xf32, #tpu.memory_space<vmem>>, %arg4: memref<16x32xf32, #tpu.memory_space<vmem>>) attributes {dimension_semantics = [#tpu.dimension_semantics<parallel>], iteration_bounds = array<i64: 1>, scalar_prefetch = 0 : i64, scratch_operands = 0 : i64, tpu.core_type = #tpu.core_type<tc>, window_params = [{transform_indices = @transform_0, window_bounds = array<i64: 16, 32>}, {pipeline_mode = #tpu.pipeline_mode<synchronous>, transform_indices = @transform_1, window_bounds = array<i64: 32, 32>}, {pipeline_mode = #tpu.pipeline_mode<synchronous>, transform_indices = @transform_2, window_bounds = array<i64: 1, 32>}, {transform_indices = @transform_3, window_bounds = array<i64: 16, 32>}]} {
    %c0 = arith.constant 0 : index
    %c0_0 = arith.constant 0 : index
    %0 = vector.load %arg1[%c0, %c0_0] : memref<16x32xf32, #tpu.memory_space<vmem>>, vector<16x32xf32>
    %1 = arith.truncf %0 : vector<16x32xf32> to vector<16x32xbf16>
    %c0_1 = arith.constant 0 : index
    %c0_2 = arith.constant 0 : index
    %2 = vector.load %arg2[%c0_1, %c0_2] : memref<32x32xbf16, #tpu.memory_space<vmem>>, vector<32x32xbf16>
    %cst = arith.constant dense<0.000000e+00> : vector<16x32xf32>
    %3 = tpu.matmul %1, %2, %cst {dimension_numbers = #tpu.dot_dimension_numbers<[1], [0], [0], [1], [0, 0, 1, 1], [], []>} : vector<16x32xbf16>, vector<32x32xbf16>, vector<16x32xf32> -> vector<16x32xf32>
    %c0_3 = arith.constant 0 : index
    %c0_4 = arith.constant 0 : index
    %4 = vector.load %arg3[%c0_3, %c0_4] : memref<1x32xf32, #tpu.memory_space<vmem>>, vector<1x32xf32>
    %5 = vector.broadcast %4 : vector<1x32xf32> to vector<16x32xf32>
    %6 = arith.addf %3, %5 : vector<16x32xf32>
    %cst_5 = arith.constant 0.353553385 : f32
    %7 = vector.broadcast %cst_5 : f32 to vector<16x32xf32>
    %8 = arith.mulf %6, %7 : vector<16x32xf32>
    %c0_6 = arith.constant 0 : index
    %c0_7 = arith.constant 0 : index
    %9 = vector.load %arg4[%c0_6, %c0_7] : memref<16x32xf32, #tpu.memory_space<vmem>>, vector<16x32xf32>
    tpu.vector_store %arg4[%c0_6, %c0_7], %8 {strides = array<i32>} : memref<16x32xf32, #tpu.memory_space<vmem>>, vector<16x32xf32>,
    return
  }
  func.func @transform_0(%arg0: i32) -> (i32, i32) {
    %c0_i32 = arith.constant 0 : i32
    %c0_i32_0 = arith.constant 0 : i32
    return %arg0, %c0_i32 : i32, i32
  }
  func.func @transform_1(%arg0: i32) -> (i32, i32) {
    %c0_i32 = arith.constant 0 : i32
    %c0_i32_0 = arith.constant 0 : i32
    %c0_i32_1 = arith.constant 0 : i32
    return %c0_i32, %c0_i32_0 : i32, i32
  }
  func.func @transform_2(%arg0: i32) -> (i32, i32) {
    %c0_i32 = arith.constant 0 : i32
    %c0_i32_0 = arith.constant 0 : i32
    %c0_i32_1 = arith.constant 0 : i32
    return %c0_i32, %c0_i32_0 : i32, i32
  }
  func.func @transform_3(%arg0: i32) -> (i32, i32) {
    %c0_i32 = arith.constant 0 : i32
    %c0_i32_0 = arith.constant 0 : i32
    return %arg0, %c0_i32 : i32, i32
  }
}

module attributes {stable_mosaic.version = 11 : i64} {
  func.func @_attn_kernel(%arg0: i32, %arg1: memref<1x8x32xf32, #tpu.memory_space<vmem>>, %arg2: memref<1x8x32xf32, #tpu.memory_space<vmem>>, %arg3: memref<1x8x32xf32, #tpu.memory_space<vmem>>, %arg4: memref<1x8x1xf32, #tpu.memory_space<vmem>>, %arg5: memref<1x1x8xf32, #tpu.memory_space<vmem>>, %arg6: memref<1x8x32xf32, #tpu.memory_space<vmem>>) attributes {dimension_semantics = [#tpu.dimension_semantics<parallel>], iteration_bounds = array<i64: 2>, scalar_prefetch = 0 : i64, scratch_operands = 0 : i64, tpu.core_type = #tpu.core_type<tc>, window_params = [{transform_indices = @transform_0, window_bounds = array<i64: 1, 8, 32>}, {transform_indices = @transform_1, window_bounds = array<i64: 1, 8, 32>}, {transform_indices = @transform_2, window_bounds = array<i64: 1, 8, 32>}, {transform_indices = @transform_3, window_bounds = array<i64: 1, 8, 1>}, {transform_indices = @transform_4, window_bounds = array<i64: 1, 1, 8>}, {transform_indices = @transform_5, window_bounds = array<i64: 1, 8, 32>}]} {
    %c0 = arith.constant 0 : index
    %c0_0 = arith.constant 0 : index
    %c0_1 = arith.constant 0 : index
    %0 = vector.load %arg1[%c0, %c0_0, %c0_1] : memref<1x8x32xf32, #tpu.memory_space<vmem>>, vector<1x8x32xf32>
    %1 = vector.shape_cast %0 : vector<1x8x32xf32> to vector<8x32xf32>
    %2 = arith.truncf %1 : vector<8x32xf32> to vector<8x32xbf16>
    %c0_2 = arith.constant 0 : index
    %c0_3 = arith.constant 0 : index
    %c0_4 = arith.constant 0 : index
    %3 = vector.load %arg2[%c0_2, %c0_3, %c0_4] : memref<1x8x32xf32, #tpu.memory_space<vmem>>, vector<1x8x32xf32>
    %4 = vector.shape_cast %3 : vector<1x8x32xf32> to vector<8x32xf32>
    %5 = arith.truncf %4 : vector<8x32xf32> to vector<8x32xbf16>
    %c0_5 = arith.constant 0 : index
    %c0_6 = arith.constant 0 : index
    %c0_7 = arith.constant 0 : index
    %6 = vector.load %arg3[%c0_5, %c0_6, %c0_7] : memref<1x8x32xf32, #tpu.memory_space<vmem>>, vector<1x8x32xf32>
    %7 = vector.shape_cast %6 : vector<1x8x32xf32> to vector<8x32xf32>
    %8 = arith.truncf %7 : vector<8x32xf32> to vector<8x32xbf16>
    %c0_8 = arith.constant 0 : index
    %c0_9 = arith.constant 0 : index
    %c0_10 = arith.constant 0 : index
    %9 = vector.load %arg4[%c0_8, %c0_9, %c0_10] : memref<1x8x1xf32, #tpu.memory_space<vmem>>, vector<1x8x1xf32>
    %10 = vector.shape_cast %9 : vector<1x8x1xf32> to vector<8x1xf32>
    %cst = arith.constant 5.000000e-01 : f32
    %11 = vector.broadcast %cst : f32 to vector<8x1xf32>
    %12 = arith.cmpf ogt, %10, %11 : vector<8x1xf32>
    %c0_11 = arith.constant 0 : index
    %c0_12 = arith.constant 0 : index
    %c0_13 = arith.constant 0 : index
    %13 = vector.load %arg5[%c0_11, %c0_12, %c0_13] : memref<1x1x8xf32, #tpu.memory_space<vmem>>, vector<1x1x8xf32>
    %14 = vector.shape_cast %13 : vector<1x1x8xf32> to vector<1x8xf32>
    %cst_14 = arith.constant 5.000000e-01 : f32
    %15 = vector.broadcast %cst_14 : f32 to vector<1x8xf32>
    %16 = arith.cmpf ogt, %14, %15 : vector<1x8xf32>
    %17 = vector.broadcast %12 : vector<8x1xi1> to vector<8x8xi1>
    %18 = vector.broadcast %16 : vector<1x8xi1> to vector<8x8xi1>
    %19 = arith.andi %17, %18 : vector<8x8xi1>
    %20 = tpu.iota {dimensions = array<i32: 0>} : vector<8x8xi32>
    %21 = tpu.iota {dimensions = array<i32: 1>} : vector<8x8xi32>
    %22 = arith.cmpi sle, %21, %20 : vector<8x8xi32>
    %23 = arith.andi %19, %22 : vector<8x8xi1>
    %24 = vector.extract_strided_slice %2 {offsets = [0, 0], sizes = [8, 8], strides = [1, 1]} : vector<8x32xbf16> to vector<8x8xbf16>
    %25 = vector.extract_strided_slice %5 {offsets = [0, 0], sizes = [8, 8], strides = [1, 1]} : vector<8x32xbf16> to vector<8x8xbf16>
    %26 = vector.extract_strided_slice %8 {offsets = [0, 0], sizes = [8, 8], strides = [1, 1]} : vector<8x32xbf16> to vector<8x8xbf16>
    %cst_15 = arith.constant dense<0.000000e+00> : vector<8x8xf32>
    %27 = tpu.matmul %24, %25, %cst_15 {dimension_numbers = #tpu.dot_dimension_numbers<[1], [1], [0], [0], [0, 0, 1, 0], [], []>} : vector<8x8xbf16>, vector<8x8xbf16>, vector<8x8xf32> -> vector<8x8xf32>
    %cst_16 = arith.constant -1.000000e+09 : f32
    %28 = vector.broadcast %cst_16 : f32 to vector<8x8xf32>
    %29 = arith.select %23, %27, %28 : vector<8x8xi1>, vector<8x8xf32>
    %cst_17 = arith.constant dense<0xFF800000> : vector<8xf32>
    %30 = vector.multi_reduction <maximumf>, %29, %cst_17 [1] : vector<8x8xf32> to vector<8xf32>
    %31 = vector.shape_cast %30 : vector<8xf32> to vector<8x1xf32>
    %32 = vector.broadcast %31 : vector<8x1xf32> to vector<8x8xf32>
    %33 = arith.subf %29, %32 : vector<8x8xf32>
    %34 = math.exp %33 : vector<8x8xf32>
    %cst_18 = arith.constant dense<0.000000e+00> : vector<8xf32>
    %35 = vector.multi_reduction <add>, %34, %cst_18 [1] : vector<8x8xf32> to vector<8xf32>
    %36 = vector.shape_cast %35 : vector<8xf32> to vector<8x1xf32>
    %37 = tpu.reciprocal %36 {approx = true} : vector<8x1xf32> -> vector<8x1xf32>
    %38 = vector.broadcast %37 : vector<8x1xf32> to vector<8x8xf32>
    %39 = arith.mulf %34, %38 : vector<8x8xf32>
    %40 = arith.truncf %39 : vector<8x8xf32> to vector<8x8xbf16>
    %cst_19 = arith.constant dense<0.000000e+00> : vector<8x8xf32>
    %41 = tpu.matmul %40, %26, %cst_19 {dimension_numbers = #tpu.dot_dimension_numbers<[1], [0], [0], [1], [0, 0, 1, 1], [], []>} : vector<8x8xbf16>, vector<8x8xbf16>, vector<8x8xf32> -> vector<8x8xf32>
    %42 = vector.extract_strided_slice %2 {offsets = [0, 8], sizes = [8, 8], strides = [1, 1]} : vector<8x32xbf16> to vector<8x8xbf16>
    %43 = vector.extract_strided_slice %5 {offsets = [0, 8], sizes = [8, 8], strides = [1, 1]} : vector<8x32xbf16> to vector<8x8xbf16>
    %44 = vector.extract_strided_slice %8 {offsets = [0, 8], sizes = [8, 8], strides = [1, 1]} : vector<8x32xbf16> to vector<8x8xbf16>
    %cst_20 = arith.constant dense<0.000000e+00> : vector<8x8xf32>
    %45 = tpu.matmul %42, %43, %cst_20 {dimension_numbers = #tpu.dot_dimension_numbers<[1], [1], [0], [0], [0, 0, 1, 0], [], []>} : vector<8x8xbf16>, vector<8x8xbf16>, vector<8x8xf32> -> vector<8x8xf32>
    %cst_21 = arith.constant -1.000000e+09 : f32
    %46 = vector.broadcast %cst_21 : f32 to vector<8x8xf32>
    %47 = arith.select %23, %45, %46 : vector<8x8xi1>, vector<8x8xf32>
    %cst_22 = arith.constant dense<0xFF800000> : vector<8xf32>
    %48 = vector.multi_reduction <maximumf>, %47, %cst_22 [1] : vector<8x8xf32> to vector<8xf32>
    %49 = vector.shape_cast %48 : vector<8xf32> to vector<8x1xf32>
    %50 = vector.broadcast %49 : vector<8x1xf32> to vector<8x8xf32>
    %51 = arith.subf %47, %50 : vector<8x8xf32>
    %52 = math.exp %51 : vector<8x8xf32>
    %cst_23 = arith.constant dense<0.000000e+00> : vector<8xf32>
    %53 = vector.multi_reduction <add>, %52, %cst_23 [1] : vector<8x8xf32> to vector<8xf32>
    %54 = vector.shape_cast %53 : vector<8xf32> to vector<8x1xf32>
    %55 = tpu.reciprocal %54 {approx = true} : vector<8x1xf32> -> vector<8x1xf32>
    %56 = vector.broadcast %55 : vector<8x1xf32> to vector<8x8xf32>
    %57 = arith.mulf %52, %56 : vector<8x8xf32>
    %58 = arith.truncf %57 : vector<8x8xf32> to vector<8x8xbf16>
    %cst_24 = arith.constant dense<0.000000e+00> : vector<8x8xf32>
    %59 = tpu.matmul %58, %44, %cst_24 {dimension_numbers = #tpu.dot_dimension_numbers<[1], [0], [0], [1], [0, 0, 1, 1], [], []>} : vector<8x8xbf16>, vector<8x8xbf16>, vector<8x8xf32> -> vector<8x8xf32>
    %60 = vector.extract_strided_slice %2 {offsets = [0, 16], sizes = [8, 8], strides = [1, 1]} : vector<8x32xbf16> to vector<8x8xbf16>
    %61 = vector.extract_strided_slice %5 {offsets = [0, 16], sizes = [8, 8], strides = [1, 1]} : vector<8x32xbf16> to vector<8x8xbf16>
    %62 = vector.extract_strided_slice %8 {offsets = [0, 16], sizes = [8, 8], strides = [1, 1]} : vector<8x32xbf16> to vector<8x8xbf16>
    %cst_25 = arith.constant dense<0.000000e+00> : vector<8x8xf32>
    %63 = tpu.matmul %60, %61, %cst_25 {dimension_numbers = #tpu.dot_dimension_numbers<[1], [1], [0], [0], [0, 0, 1, 0], [], []>} : vector<8x8xbf16>, vector<8x8xbf16>, vector<8x8xf32> -> vector<8x8xf32>
    %cst_26 = arith.constant -1.000000e+09 : f32
    %64 = vector.broadcast %cst_26 : f32 to vector<8x8xf32>
    %65 = arith.select %23, %63, %64 : vector<8x8xi1>, vector<8x8xf32>
    %cst_27 = arith.constant dense<0xFF800000> : vector<8xf32>
    %66 = vector.multi_reduction <maximumf>, %65, %cst_27 [1] : vector<8x8xf32> to vector<8xf32>
    %67 = vector.shape_cast %66 : vector<8xf32> to vector<8x1xf32>
    %68 = vector.broadcast %67 : vector<8x1xf32> to vector<8x8xf32>
    %69 = arith.subf %65, %68 : vector<8x8xf32>
    %70 = math.exp %69 : vector<8x8xf32>
    %cst_28 = arith.constant dense<0.000000e+00> : vector<8xf32>
    %71 = vector.multi_reduction <add>, %70, %cst_28 [1] : vector<8x8xf32> to vector<8xf32>
    %72 = vector.shape_cast %71 : vector<8xf32> to vector<8x1xf32>
    %73 = tpu.reciprocal %72 {approx = true} : vector<8x1xf32> -> vector<8x1xf32>
    %74 = vector.broadcast %73 : vector<8x1xf32> to vector<8x8xf32>
    %75 = arith.mulf %70, %74 : vector<8x8xf32>
    %76 = arith.truncf %75 : vector<8x8xf32> to vector<8x8xbf16>
    %cst_29 = arith.constant dense<0.000000e+00> : vector<8x8xf32>
    %77 = tpu.matmul %76, %62, %cst_29 {dimension_numbers = #tpu.dot_dimension_numbers<[1], [0], [0], [1], [0, 0, 1, 1], [], []>} : vector<8x8xbf16>, vector<8x8xbf16>, vector<8x8xf32> -> vector<8x8xf32>
    %78 = vector.extract_strided_slice %2 {offsets = [0, 24], sizes = [8, 8], strides = [1, 1]} : vector<8x32xbf16> to vector<8x8xbf16>
    %79 = vector.extract_strided_slice %5 {offsets = [0, 24], sizes = [8, 8], strides = [1, 1]} : vector<8x32xbf16> to vector<8x8xbf16>
    %80 = vector.extract_strided_slice %8 {offsets = [0, 24], sizes = [8, 8], strides = [1, 1]} : vector<8x32xbf16> to vector<8x8xbf16>
    %cst_30 = arith.constant dense<0.000000e+00> : vector<8x8xf32>
    %81 = tpu.matmul %78, %79, %cst_30 {dimension_numbers = #tpu.dot_dimension_numbers<[1], [1], [0], [0], [0, 0, 1, 0], [], []>} : vector<8x8xbf16>, vector<8x8xbf16>, vector<8x8xf32> -> vector<8x8xf32>
    %cst_31 = arith.constant -1.000000e+09 : f32
    %82 = vector.broadcast %cst_31 : f32 to vector<8x8xf32>
    %83 = arith.select %23, %81, %82 : vector<8x8xi1>, vector<8x8xf32>
    %cst_32 = arith.constant dense<0xFF800000> : vector<8xf32>
    %84 = vector.multi_reduction <maximumf>, %83, %cst_32 [1] : vector<8x8xf32> to vector<8xf32>
    %85 = vector.shape_cast %84 : vector<8xf32> to vector<8x1xf32>
    %86 = vector.broadcast %85 : vector<8x1xf32> to vector<8x8xf32>
    %87 = arith.subf %83, %86 : vector<8x8xf32>
    %88 = math.exp %87 : vector<8x8xf32>
    %cst_33 = arith.constant dense<0.000000e+00> : vector<8xf32>
    %89 = vector.multi_reduction <add>, %88, %cst_33 [1] : vector<8x8xf32> to vector<8xf32>
    %90 = vector.shape_cast %89 : vector<8xf32> to vector<8x1xf32>
    %91 = tpu.reciprocal %90 {approx = true} : vector<8x1xf32> -> vector<8x1xf32>
    %92 = vector.broadcast %91 : vector<8x1xf32> to vector<8x8xf32>
    %93 = arith.mulf %88, %92 : vector<8x8xf32>
    %94 = arith.truncf %93 : vector<8x8xf32> to vector<8x8xbf16>
    %cst_34 = arith.constant dense<0.000000e+00> : vector<8x8xf32>
    %95 = tpu.matmul %94, %80, %cst_34 {dimension_numbers = #tpu.dot_dimension_numbers<[1], [0], [0], [1], [0, 0, 1, 1], [], []>} : vector<8x8xbf16>, vector<8x8xbf16>, vector<8x8xf32> -> vector<8x8xf32>
    %96 = tpu.concatenate %41, %59, %77, %95 in 1 : vector<8x8xf32>, vector<8x8xf32>, vector<8x8xf32>, vector<8x8xf32> -> vector<8x32xf32>
    %c0_35 = arith.constant 0 : index
    %c0_36 = arith.constant 0 : index
    %c0_37 = arith.constant 0 : index
    %97 = vector.load %arg6[%c0_35, %c0_36, %c0_37] : memref<1x8x32xf32, #tpu.memory_space<vmem>>, vector<1x8x32xf32>
    %98 = vector.shape_cast %97 : vector<1x8x32xf32> to vector<8x32xf32>
    %99 = vector.shape_cast %96 : vector<8x32xf32> to vector<1x8x32xf32>
    tpu.vector_store %arg6[%c0_35, %c0_36, %c0_37], %99 {strides = array<i32>} : memref<1x8x32xf32, #tpu.memory_space<vmem>>, vector<1x8x32xf32>,
    return
  }
  func.func @transform_0(%arg0: i32) -> (i32, i32, i32) {
    %c0_i32 = arith.constant 0 : i32
    %c0_i32_0 = arith.constant 0 : i32
    %c0_i32_1 = arith.constant 0 : i32
    return %arg0, %c0_i32, %c0_i32_0 : i32, i32, i32
  }
  func.func @transform_1(%arg0: i32) -> (i32, i32, i32) {
    %c0_i32 = arith.constant 0 : i32
    %c0_i32_0 = arith.constant 0 : i32
    %c0_i32_1 = arith.constant 0 : i32
    return %arg0, %c0_i32, %c0_i32_0 : i32, i32, i32
  }
  func.func @transform_2(%arg0: i32) -> (i32, i32, i32) {
    %c0_i32 = arith.constant 0 : i32
    %c0_i32_0 = arith.constant 0 : i32
    %c0_i32_1 = arith.constant 0 : i32
    return %arg0, %c0_i32, %c0_i32_0 : i32, i32, i32
  }
  func.func @transform_3(%arg0: i32) -> (i32, i32, i32) {
    %c0_i32 = arith.constant 0 : i32
    %c0_i32_0 = arith.constant 0 : i32
    %c0_i32_1 = arith.constant 0 : i32
    return %arg0, %c0_i32, %c0_i32_0 : i32, i32, i32
  }
  func.func @transform_4(%arg0: i32) -> (i32, i32, i32) {
    %c0_i32 = arith.constant 0 : i32
    %c0_i32_0 = arith.constant 0 : i32
    %c0_i32_1 = arith.constant 0 : i32
    return %arg0, %c0_i32, %c0_i32_0 : i32, i32, i32
  }
  func.func @transform_5(%arg0: i32) -> (i32, i32, i32) {
    %c0_i32 = arith.constant 0 : i32
    %c0_i32_0 = arith.constant 0 : i32
    %c0_i32_1 = arith.constant 0 : i32
    return %arg0, %c0_i32, %c0_i32_0 : i32, i32, i32
  }
}

module attributes {stable_mosaic.version = 11 : i64} {
  func.func @_ffn_ln_kernel(%arg0: i32, %arg1: memref<16x32xf32, #tpu.memory_space<vmem>>, %arg2: memref<32x64xbf16, #tpu.memory_space<vmem>>, %arg3: memref<1x64xf32, #tpu.memory_space<vmem>>, %arg4: memref<64x32xbf16, #tpu.memory_space<vmem>>, %arg5: memref<1x32xf32, #tpu.memory_space<vmem>>, %arg6: memref<1x32xf32, #tpu.memory_space<vmem>>, %arg7: memref<1x32xf32, #tpu.memory_space<vmem>>, %arg8: memref<16x32xf32, #tpu.memory_space<vmem>>) attributes {dimension_semantics = [#tpu.dimension_semantics<parallel>], iteration_bounds = array<i64: 1>, scalar_prefetch = 0 : i64, scratch_operands = 0 : i64, tpu.core_type = #tpu.core_type<tc>, window_params = [{transform_indices = @transform_0, window_bounds = array<i64: 16, 32>}, {pipeline_mode = #tpu.pipeline_mode<synchronous>, transform_indices = @transform_1, window_bounds = array<i64: 32, 64>}, {pipeline_mode = #tpu.pipeline_mode<synchronous>, transform_indices = @transform_2, window_bounds = array<i64: 1, 64>}, {pipeline_mode = #tpu.pipeline_mode<synchronous>, transform_indices = @transform_3, window_bounds = array<i64: 64, 32>}, {pipeline_mode = #tpu.pipeline_mode<synchronous>, transform_indices = @transform_4, window_bounds = array<i64: 1, 32>}, {pipeline_mode = #tpu.pipeline_mode<synchronous>, transform_indices = @transform_5, window_bounds = array<i64: 1, 32>}, {pipeline_mode = #tpu.pipeline_mode<synchronous>, transform_indices = @transform_6, window_bounds = array<i64: 1, 32>}, {transform_indices = @transform_7, window_bounds = array<i64: 16, 32>}]} {
    %c0 = arith.constant 0 : index
    %c0_0 = arith.constant 0 : index
    %0 = vector.load %arg1[%c0, %c0_0] : memref<16x32xf32, #tpu.memory_space<vmem>>, vector<16x32xf32>
    %1 = arith.truncf %0 : vector<16x32xf32> to vector<16x32xbf16>
    %c0_1 = arith.constant 0 : index
    %c0_2 = arith.constant 0 : index
    %2 = vector.load %arg2[%c0_1, %c0_2] : memref<32x64xbf16, #tpu.memory_space<vmem>>, vector<32x64xbf16>
    %cst = arith.constant dense<0.000000e+00> : vector<16x64xf32>
    %3 = tpu.matmul %1, %2, %cst {dimension_numbers = #tpu.dot_dimension_numbers<[1], [0], [0], [1], [0, 0, 1, 1], [], []>} : vector<16x32xbf16>, vector<32x64xbf16>, vector<16x64xf32> -> vector<16x64xf32>
    %c0_3 = arith.constant 0 : index
    %c0_4 = arith.constant 0 : index
    %4 = vector.load %arg3[%c0_3, %c0_4] : memref<1x64xf32, #tpu.memory_space<vmem>>, vector<1x64xf32>
    %5 = vector.broadcast %4 : vector<1x64xf32> to vector<16x64xf32>
    %6 = arith.addf %3, %5 : vector<16x64xf32>
    %cst_5 = arith.constant 0.000000e+00 : f32
    %7 = vector.broadcast %cst_5 : f32 to vector<16x64xf32>
    %8 = arith.maximumf %6, %7 : vector<16x64xf32>
    %9 = arith.truncf %8 : vector<16x64xf32> to vector<16x64xbf16>
    %c0_6 = arith.constant 0 : index
    %c0_7 = arith.constant 0 : index
    %10 = vector.load %arg4[%c0_6, %c0_7] : memref<64x32xbf16, #tpu.memory_space<vmem>>, vector<64x32xbf16>
    %cst_8 = arith.constant dense<0.000000e+00> : vector<16x32xf32>
    %11 = tpu.matmul %9, %10, %cst_8 {dimension_numbers = #tpu.dot_dimension_numbers<[1], [0], [0], [1], [0, 0, 1, 1], [], []>} : vector<16x64xbf16>, vector<64x32xbf16>, vector<16x32xf32> -> vector<16x32xf32>
    %c0_9 = arith.constant 0 : index
    %c0_10 = arith.constant 0 : index
    %12 = vector.load %arg5[%c0_9, %c0_10] : memref<1x32xf32, #tpu.memory_space<vmem>>, vector<1x32xf32>
    %13 = vector.broadcast %12 : vector<1x32xf32> to vector<16x32xf32>
    %14 = arith.addf %11, %13 : vector<16x32xf32>
    %15 = arith.addf %0, %14 : vector<16x32xf32>
    %cst_11 = arith.constant dense<0.000000e+00> : vector<16xf32>
    %16 = vector.multi_reduction <add>, %15, %cst_11 [1] : vector<16x32xf32> to vector<16xf32>
    %17 = vector.shape_cast %16 : vector<16xf32> to vector<16x1xf32>
    %cst_12 = arith.constant 3.200000e+01 : f32
    %18 = vector.broadcast %cst_12 : f32 to vector<16x1xf32>
    %19 = arith.divf %17, %18 : vector<16x1xf32>
    %20 = vector.broadcast %19 : vector<16x1xf32> to vector<16x32xf32>
    %21 = arith.subf %15, %20 : vector<16x32xf32>
    %22 = vector.broadcast %19 : vector<16x1xf32> to vector<16x32xf32>
    %23 = arith.subf %15, %22 : vector<16x32xf32>
    %24 = arith.mulf %21, %23 : vector<16x32xf32>
    %cst_13 = arith.constant dense<0.000000e+00> : vector<16xf32>
    %25 = vector.multi_reduction <add>, %24, %cst_13 [1] : vector<16x32xf32> to vector<16xf32>
    %26 = vector.shape_cast %25 : vector<16xf32> to vector<16x1xf32>
    %cst_14 = arith.constant 3.200000e+01 : f32
    %27 = vector.broadcast %cst_14 : f32 to vector<16x1xf32>
    %28 = arith.divf %26, %27 : vector<16x1xf32>
    %29 = vector.broadcast %19 : vector<16x1xf32> to vector<16x32xf32>
    %30 = arith.subf %15, %29 : vector<16x32xf32>
    %cst_15 = arith.constant 9.99999974E-6 : f32
    %31 = vector.broadcast %cst_15 : f32 to vector<16x1xf32>
    %32 = arith.addf %28, %31 : vector<16x1xf32>
    %33 = math.rsqrt %32 : vector<16x1xf32>
    %34 = vector.broadcast %33 : vector<16x1xf32> to vector<16x32xf32>
    %35 = arith.mulf %30, %34 : vector<16x32xf32>
    %c0_16 = arith.constant 0 : index
    %c0_17 = arith.constant 0 : index
    %36 = vector.load %arg6[%c0_16, %c0_17] : memref<1x32xf32, #tpu.memory_space<vmem>>, vector<1x32xf32>
    %37 = vector.broadcast %36 : vector<1x32xf32> to vector<16x32xf32>
    %38 = arith.mulf %35, %37 : vector<16x32xf32>
    %c0_18 = arith.constant 0 : index
    %c0_19 = arith.constant 0 : index
    %39 = vector.load %arg7[%c0_18, %c0_19] : memref<1x32xf32, #tpu.memory_space<vmem>>, vector<1x32xf32>
    %40 = vector.broadcast %39 : vector<1x32xf32> to vector<16x32xf32>
    %41 = arith.addf %38, %40 : vector<16x32xf32>
    %c0_20 = arith.constant 0 : index
    %c0_21 = arith.constant 0 : index
    %42 = vector.load %arg8[%c0_20, %c0_21] : memref<16x32xf32, #tpu.memory_space<vmem>>, vector<16x32xf32>
    tpu.vector_store %arg8[%c0_20, %c0_21], %41 {strides = array<i32>} : memref<16x32xf32, #tpu.memory_space<vmem>>, vector<16x32xf32>,
    return
  }
  func.func @transform_0(%arg0: i32) -> (i32, i32) {
    %c0_i32 = arith.constant 0 : i32
    %c0_i32_0 = arith.constant 0 : i32
    return %arg0, %c0_i32 : i32, i32
  }
  func.func @transform_1(%arg0: i32) -> (i32, i32) {
    %c0_i32 = arith.constant 0 : i32
    %c0_i32_0 = arith.constant 0 : i32
    %c0_i32_1 = arith.constant 0 : i32
    return %c0_i32, %c0_i32_0 : i32, i32
  }
  func.func @transform_2(%arg0: i32) -> (i32, i32) {
    %c0_i32 = arith.constant 0 : i32
    %c0_i32_0 = arith.constant 0 : i32
    %c0_i32_1 = arith.constant 0 : i32
    return %c0_i32, %c0_i32_0 : i32, i32
  }
  func.func @transform_3(%arg0: i32) -> (i32, i32) {
    %c0_i32 = arith.constant 0 : i32
    %c0_i32_0 = arith.constant 0 : i32
    %c0_i32_1 = arith.constant 0 : i32
    return %c0_i32, %c0_i32_0 : i32, i32
  }
  func.func @transform_4(%arg0: i32) -> (i32, i32) {
    %c0_i32 = arith.constant 0 : i32
    %c0_i32_0 = arith.constant 0 : i32
    %c0_i32_1 = arith.constant 0 : i32
    return %c0_i32, %c0_i32_0 : i32, i32
  }
  func.func @transform_5(%arg0: i32) -> (i32, i32) {
    %c0_i32 = arith.constant 0 : i32
    %c0_i32_0 = arith.constant 0 : i32
    %c0_i32_1 = arith.constant 0 : i32
    return %c0_i32, %c0_i32_0 : i32, i32
  }
  func.func @transform_6(%arg0: i32) -> (i32, i32) {
    %c0_i32 = arith.constant 0 : i32
    %c0_i32_0 = arith.constant 0 : i32
    %c0_i32_1 = arith.constant 0 : i32
    return %c0_i32, %c0_i32_0 : i32, i32
  }
  func.func @transform_7(%arg0: i32) -> (i32, i32) {
    %c0_i32 = arith.constant 0 : i32
    %c0_i32_0 = arith.constant 0 : i32
    return %arg0, %c0_i32 : i32, i32
  }
}

module attributes {stable_mosaic.version = 11 : i64} {
  func.func @_attn_kernel(%arg0: i32, %arg1: memref<1x8x32xf32, #tpu.memory_space<vmem>>, %arg2: memref<1x8x32xf32, #tpu.memory_space<vmem>>, %arg3: memref<1x8x32xf32, #tpu.memory_space<vmem>>, %arg4: memref<1x8x1xf32, #tpu.memory_space<vmem>>, %arg5: memref<1x1x8xf32, #tpu.memory_space<vmem>>, %arg6: memref<1x8x32xf32, #tpu.memory_space<vmem>>) attributes {dimension_semantics = [#tpu.dimension_semantics<parallel>], iteration_bounds = array<i64: 2>, scalar_prefetch = 0 : i64, scratch_operands = 0 : i64, tpu.core_type = #tpu.core_type<tc>, window_params = [{transform_indices = @transform_0, window_bounds = array<i64: 1, 8, 32>}, {transform_indices = @transform_1, window_bounds = array<i64: 1, 8, 32>}, {transform_indices = @transform_2, window_bounds = array<i64: 1, 8, 32>}, {transform_indices = @transform_3, window_bounds = array<i64: 1, 8, 1>}, {transform_indices = @transform_4, window_bounds = array<i64: 1, 1, 8>}, {transform_indices = @transform_5, window_bounds = array<i64: 1, 8, 32>}]} {
    %c0 = arith.constant 0 : index
    %c0_0 = arith.constant 0 : index
    %c0_1 = arith.constant 0 : index
    %0 = vector.load %arg1[%c0, %c0_0, %c0_1] : memref<1x8x32xf32, #tpu.memory_space<vmem>>, vector<1x8x32xf32>
    %1 = vector.shape_cast %0 : vector<1x8x32xf32> to vector<8x32xf32>
    %2 = arith.truncf %1 : vector<8x32xf32> to vector<8x32xbf16>
    %c0_2 = arith.constant 0 : index
    %c0_3 = arith.constant 0 : index
    %c0_4 = arith.constant 0 : index
    %3 = vector.load %arg2[%c0_2, %c0_3, %c0_4] : memref<1x8x32xf32, #tpu.memory_space<vmem>>, vector<1x8x32xf32>
    %4 = vector.shape_cast %3 : vector<1x8x32xf32> to vector<8x32xf32>
    %5 = arith.truncf %4 : vector<8x32xf32> to vector<8x32xbf16>
    %c0_5 = arith.constant 0 : index
    %c0_6 = arith.constant 0 : index
    %c0_7 = arith.constant 0 : index
    %6 = vector.load %arg3[%c0_5, %c0_6, %c0_7] : memref<1x8x32xf32, #tpu.memory_space<vmem>>, vector<1x8x32xf32>
    %7 = vector.shape_cast %6 : vector<1x8x32xf32> to vector<8x32xf32>
    %8 = arith.truncf %7 : vector<8x32xf32> to vector<8x32xbf16>
    %c0_8 = arith.constant 0 : index
    %c0_9 = arith.constant 0 : index
    %c0_10 = arith.constant 0 : index
    %9 = vector.load %arg4[%c0_8, %c0_9, %c0_10] : memref<1x8x1xf32, #tpu.memory_space<vmem>>, vector<1x8x1xf32>
    %10 = vector.shape_cast %9 : vector<1x8x1xf32> to vector<8x1xf32>
    %cst = arith.constant 5.000000e-01 : f32
    %11 = vector.broadcast %cst : f32 to vector<8x1xf32>
    %12 = arith.cmpf ogt, %10, %11 : vector<8x1xf32>
    %c0_11 = arith.constant 0 : index
    %c0_12 = arith.constant 0 : index
    %c0_13 = arith.constant 0 : index
    %13 = vector.load %arg5[%c0_11, %c0_12, %c0_13] : memref<1x1x8xf32, #tpu.memory_space<vmem>>, vector<1x1x8xf32>
    %14 = vector.shape_cast %13 : vector<1x1x8xf32> to vector<1x8xf32>
    %cst_14 = arith.constant 5.000000e-01 : f32
    %15 = vector.broadcast %cst_14 : f32 to vector<1x8xf32>
    %16 = arith.cmpf ogt, %14, %15 : vector<1x8xf32>
    %17 = vector.broadcast %12 : vector<8x1xi1> to vector<8x8xi1>
    %18 = vector.broadcast %16 : vector<1x8xi1> to vector<8x8xi1>
    %19 = arith.andi %17, %18 : vector<8x8xi1>
    %20 = vector.extract_strided_slice %2 {offsets = [0, 0], sizes = [8, 8], strides = [1, 1]} : vector<8x32xbf16> to vector<8x8xbf16>
    %21 = vector.extract_strided_slice %5 {offsets = [0, 0], sizes = [8, 8], strides = [1, 1]} : vector<8x32xbf16> to vector<8x8xbf16>
    %22 = vector.extract_strided_slice %8 {offsets = [0, 0], sizes = [8, 8], strides = [1, 1]} : vector<8x32xbf16> to vector<8x8xbf16>
    %cst_15 = arith.constant dense<0.000000e+00> : vector<8x8xf32>
    %23 = tpu.matmul %20, %21, %cst_15 {dimension_numbers = #tpu.dot_dimension_numbers<[1], [1], [0], [0], [0, 0, 1, 0], [], []>} : vector<8x8xbf16>, vector<8x8xbf16>, vector<8x8xf32> -> vector<8x8xf32>
    %cst_16 = arith.constant -1.000000e+09 : f32
    %24 = vector.broadcast %cst_16 : f32 to vector<8x8xf32>
    %25 = arith.select %19, %23, %24 : vector<8x8xi1>, vector<8x8xf32>
    %cst_17 = arith.constant dense<0xFF800000> : vector<8xf32>
    %26 = vector.multi_reduction <maximumf>, %25, %cst_17 [1] : vector<8x8xf32> to vector<8xf32>
    %27 = vector.shape_cast %26 : vector<8xf32> to vector<8x1xf32>
    %28 = vector.broadcast %27 : vector<8x1xf32> to vector<8x8xf32>
    %29 = arith.subf %25, %28 : vector<8x8xf32>
    %30 = math.exp %29 : vector<8x8xf32>
    %cst_18 = arith.constant dense<0.000000e+00> : vector<8xf32>
    %31 = vector.multi_reduction <add>, %30, %cst_18 [1] : vector<8x8xf32> to vector<8xf32>
    %32 = vector.shape_cast %31 : vector<8xf32> to vector<8x1xf32>
    %33 = tpu.reciprocal %32 {approx = true} : vector<8x1xf32> -> vector<8x1xf32>
    %34 = vector.broadcast %33 : vector<8x1xf32> to vector<8x8xf32>
    %35 = arith.mulf %30, %34 : vector<8x8xf32>
    %36 = arith.truncf %35 : vector<8x8xf32> to vector<8x8xbf16>
    %cst_19 = arith.constant dense<0.000000e+00> : vector<8x8xf32>
    %37 = tpu.matmul %36, %22, %cst_19 {dimension_numbers = #tpu.dot_dimension_numbers<[1], [0], [0], [1], [0, 0, 1, 1], [], []>} : vector<8x8xbf16>, vector<8x8xbf16>, vector<8x8xf32> -> vector<8x8xf32>
    %38 = vector.extract_strided_slice %2 {offsets = [0, 8], sizes = [8, 8], strides = [1, 1]} : vector<8x32xbf16> to vector<8x8xbf16>
    %39 = vector.extract_strided_slice %5 {offsets = [0, 8], sizes = [8, 8], strides = [1, 1]} : vector<8x32xbf16> to vector<8x8xbf16>
    %40 = vector.extract_strided_slice %8 {offsets = [0, 8], sizes = [8, 8], strides = [1, 1]} : vector<8x32xbf16> to vector<8x8xbf16>
    %cst_20 = arith.constant dense<0.000000e+00> : vector<8x8xf32>
    %41 = tpu.matmul %38, %39, %cst_20 {dimension_numbers = #tpu.dot_dimension_numbers<[1], [1], [0], [0], [0, 0, 1, 0], [], []>} : vector<8x8xbf16>, vector<8x8xbf16>, vector<8x8xf32> -> vector<8x8xf32>
    %cst_21 = arith.constant -1.000000e+09 : f32
    %42 = vector.broadcast %cst_21 : f32 to vector<8x8xf32>
    %43 = arith.select %19, %41, %42 : vector<8x8xi1>, vector<8x8xf32>
    %cst_22 = arith.constant dense<0xFF800000> : vector<8xf32>
    %44 = vector.multi_reduction <maximumf>, %43, %cst_22 [1] : vector<8x8xf32> to vector<8xf32>
    %45 = vector.shape_cast %44 : vector<8xf32> to vector<8x1xf32>
    %46 = vector.broadcast %45 : vector<8x1xf32> to vector<8x8xf32>
    %47 = arith.subf %43, %46 : vector<8x8xf32>
    %48 = math.exp %47 : vector<8x8xf32>
    %cst_23 = arith.constant dense<0.000000e+00> : vector<8xf32>
    %49 = vector.multi_reduction <add>, %48, %cst_23 [1] : vector<8x8xf32> to vector<8xf32>
    %50 = vector.shape_cast %49 : vector<8xf32> to vector<8x1xf32>
    %51 = tpu.reciprocal %50 {approx = true} : vector<8x1xf32> -> vector<8x1xf32>
    %52 = vector.broadcast %51 : vector<8x1xf32> to vector<8x8xf32>
    %53 = arith.mulf %48, %52 : vector<8x8xf32>
    %54 = arith.truncf %53 : vector<8x8xf32> to vector<8x8xbf16>
    %cst_24 = arith.constant dense<0.000000e+00> : vector<8x8xf32>
    %55 = tpu.matmul %54, %40, %cst_24 {dimension_numbers = #tpu.dot_dimension_numbers<[1], [0], [0], [1], [0, 0, 1, 1], [], []>} : vector<8x8xbf16>, vector<8x8xbf16>, vector<8x8xf32> -> vector<8x8xf32>
    %56 = vector.extract_strided_slice %2 {offsets = [0, 16], sizes = [8, 8], strides = [1, 1]} : vector<8x32xbf16> to vector<8x8xbf16>
    %57 = vector.extract_strided_slice %5 {offsets = [0, 16], sizes = [8, 8], strides = [1, 1]} : vector<8x32xbf16> to vector<8x8xbf16>
    %58 = vector.extract_strided_slice %8 {offsets = [0, 16], sizes = [8, 8], strides = [1, 1]} : vector<8x32xbf16> to vector<8x8xbf16>
    %cst_25 = arith.constant dense<0.000000e+00> : vector<8x8xf32>
    %59 = tpu.matmul %56, %57, %cst_25 {dimension_numbers = #tpu.dot_dimension_numbers<[1], [1], [0], [0], [0, 0, 1, 0], [], []>} : vector<8x8xbf16>, vector<8x8xbf16>, vector<8x8xf32> -> vector<8x8xf32>
    %cst_26 = arith.constant -1.000000e+09 : f32
    %60 = vector.broadcast %cst_26 : f32 to vector<8x8xf32>
    %61 = arith.select %19, %59, %60 : vector<8x8xi1>, vector<8x8xf32>
    %cst_27 = arith.constant dense<0xFF800000> : vector<8xf32>
    %62 = vector.multi_reduction <maximumf>, %61, %cst_27 [1] : vector<8x8xf32> to vector<8xf32>
    %63 = vector.shape_cast %62 : vector<8xf32> to vector<8x1xf32>
    %64 = vector.broadcast %63 : vector<8x1xf32> to vector<8x8xf32>
    %65 = arith.subf %61, %64 : vector<8x8xf32>
    %66 = math.exp %65 : vector<8x8xf32>
    %cst_28 = arith.constant dense<0.000000e+00> : vector<8xf32>
    %67 = vector.multi_reduction <add>, %66, %cst_28 [1] : vector<8x8xf32> to vector<8xf32>
    %68 = vector.shape_cast %67 : vector<8xf32> to vector<8x1xf32>
    %69 = tpu.reciprocal %68 {approx = true} : vector<8x1xf32> -> vector<8x1xf32>
    %70 = vector.broadcast %69 : vector<8x1xf32> to vector<8x8xf32>
    %71 = arith.mulf %66, %70 : vector<8x8xf32>
    %72 = arith.truncf %71 : vector<8x8xf32> to vector<8x8xbf16>
    %cst_29 = arith.constant dense<0.000000e+00> : vector<8x8xf32>
    %73 = tpu.matmul %72, %58, %cst_29 {dimension_numbers = #tpu.dot_dimension_numbers<[1], [0], [0], [1], [0, 0, 1, 1], [], []>} : vector<8x8xbf16>, vector<8x8xbf16>, vector<8x8xf32> -> vector<8x8xf32>
    %74 = vector.extract_strided_slice %2 {offsets = [0, 24], sizes = [8, 8], strides = [1, 1]} : vector<8x32xbf16> to vector<8x8xbf16>
    %75 = vector.extract_strided_slice %5 {offsets = [0, 24], sizes = [8, 8], strides = [1, 1]} : vector<8x32xbf16> to vector<8x8xbf16>
    %76 = vector.extract_strided_slice %8 {offsets = [0, 24], sizes = [8, 8], strides = [1, 1]} : vector<8x32xbf16> to vector<8x8xbf16>
    %cst_30 = arith.constant dense<0.000000e+00> : vector<8x8xf32>
    %77 = tpu.matmul %74, %75, %cst_30 {dimension_numbers = #tpu.dot_dimension_numbers<[1], [1], [0], [0], [0, 0, 1, 0], [], []>} : vector<8x8xbf16>, vector<8x8xbf16>, vector<8x8xf32> -> vector<8x8xf32>
    %cst_31 = arith.constant -1.000000e+09 : f32
    %78 = vector.broadcast %cst_31 : f32 to vector<8x8xf32>
    %79 = arith.select %19, %77, %78 : vector<8x8xi1>, vector<8x8xf32>
    %cst_32 = arith.constant dense<0xFF800000> : vector<8xf32>
    %80 = vector.multi_reduction <maximumf>, %79, %cst_32 [1] : vector<8x8xf32> to vector<8xf32>
    %81 = vector.shape_cast %80 : vector<8xf32> to vector<8x1xf32>
    %82 = vector.broadcast %81 : vector<8x1xf32> to vector<8x8xf32>
    %83 = arith.subf %79, %82 : vector<8x8xf32>
    %84 = math.exp %83 : vector<8x8xf32>
    %cst_33 = arith.constant dense<0.000000e+00> : vector<8xf32>
    %85 = vector.multi_reduction <add>, %84, %cst_33 [1] : vector<8x8xf32> to vector<8xf32>
    %86 = vector.shape_cast %85 : vector<8xf32> to vector<8x1xf32>
    %87 = tpu.reciprocal %86 {approx = true} : vector<8x1xf32> -> vector<8x1xf32>
    %88 = vector.broadcast %87 : vector<8x1xf32> to vector<8x8xf32>
    %89 = arith.mulf %84, %88 : vector<8x8xf32>
    %90 = arith.truncf %89 : vector<8x8xf32> to vector<8x8xbf16>
    %cst_34 = arith.constant dense<0.000000e+00> : vector<8x8xf32>
    %91 = tpu.matmul %90, %76, %cst_34 {dimension_numbers = #tpu.dot_dimension_numbers<[1], [0], [0], [1], [0, 0, 1, 1], [], []>} : vector<8x8xbf16>, vector<8x8xbf16>, vector<8x8xf32> -> vector<8x8xf32>
    %92 = tpu.concatenate %37, %55, %73, %91 in 1 : vector<8x8xf32>, vector<8x8xf32>, vector<8x8xf32>, vector<8x8xf32> -> vector<8x32xf32>
    %c0_35 = arith.constant 0 : index
    %c0_36 = arith.constant 0 : index
    %c0_37 = arith.constant 0 : index
    %93 = vector.load %arg6[%c0_35, %c0_36, %c0_37] : memref<1x8x32xf32, #tpu.memory_space<vmem>>, vector<1x8x32xf32>
    %94 = vector.shape_cast %93 : vector<1x8x32xf32> to vector<8x32xf32>
    %95 = vector.shape_cast %92 : vector<8x32xf32> to vector<1x8x32xf32>
    tpu.vector_store %arg6[%c0_35, %c0_36, %c0_37], %95 {strides = array<i32>} : memref<1x8x32xf32, #tpu.memory_space<vmem>>, vector<1x8x32xf32>,
    return
  }
  func.func @transform_0(%arg0: i32) -> (i32, i32, i32) {
    %c0_i32 = arith.constant 0 : i32
    %c0_i32_0 = arith.constant 0 : i32
    %c0_i32_1 = arith.constant 0 : i32
    return %arg0, %c0_i32, %c0_i32_0 : i32, i32, i32
  }
  func.func @transform_1(%arg0: i32) -> (i32, i32, i32) {
    %c0_i32 = arith.constant 0 : i32
    %c0_i32_0 = arith.constant 0 : i32
    %c0_i32_1 = arith.constant 0 : i32
    return %arg0, %c0_i32, %c0_i32_0 : i32, i32, i32
  }
  func.func @transform_2(%arg0: i32) -> (i32, i32, i32) {
    %c0_i32 = arith.constant 0 : i32
    %c0_i32_0 = arith.constant 0 : i32
    %c0_i32_1 = arith.constant 0 : i32
    return %arg0, %c0_i32, %c0_i32_0 : i32, i32, i32
  }
  func.func @transform_3(%arg0: i32) -> (i32, i32, i32) {
    %c0_i32 = arith.constant 0 : i32
    %c0_i32_0 = arith.constant 0 : i32
    %c0_i32_1 = arith.constant 0 : i32
    return %arg0, %c0_i32, %c0_i32_0 : i32, i32, i32
  }
  func.func @transform_4(%arg0: i32) -> (i32, i32, i32) {
    %c0_i32 = arith.constant 0 : i32
    %c0_i32_0 = arith.constant 0 : i32
    %c0_i32_1 = arith.constant 0 : i32
    return %arg0, %c0_i32, %c0_i32_0 : i32, i32, i32
  }
  func.func @transform_5(%arg0: i32) -> (i32, i32, i32) {
    %c0_i32 = arith.constant 0 : i32
    %c0_i32_0 = arith.constant 0 : i32
    %c0_i32_1 = arith.constant 0 : i32
    return %arg0, %c0_i32, %c0_i32_0 : i32, i32, i32
  }
}

module attributes {stable_mosaic.version = 11 : i64} {
  func.func @_proj_split_kernel(%arg0: i32, %arg1: memref<16x32xf32, #tpu.memory_space<vmem>>, %arg2: memref<32x64xbf16, #tpu.memory_space<vmem>>, %arg3: memref<1x64xf32, #tpu.memory_space<vmem>>, %arg4: memref<16x32xf32, #tpu.memory_space<vmem>>, %arg5: memref<16x32xf32, #tpu.memory_space<vmem>>) attributes {dimension_semantics = [#tpu.dimension_semantics<parallel>], iteration_bounds = array<i64: 1>, scalar_prefetch = 0 : i64, scratch_operands = 0 : i64, tpu.core_type = #tpu.core_type<tc>, window_params = [{transform_indices = @transform_0, window_bounds = array<i64: 16, 32>}, {pipeline_mode = #tpu.pipeline_mode<synchronous>, transform_indices = @transform_1, window_bounds = array<i64: 32, 64>}, {pipeline_mode = #tpu.pipeline_mode<synchronous>, transform_indices = @transform_2, window_bounds = array<i64: 1, 64>}, {transform_indices = @transform_3, window_bounds = array<i64: 16, 32>}, {transform_indices = @transform_4, window_bounds = array<i64: 16, 32>}]} {
    %c0 = arith.constant 0 : index
    %c0_0 = arith.constant 0 : index
    %0 = vector.load %arg1[%c0, %c0_0] : memref<16x32xf32, #tpu.memory_space<vmem>>, vector<16x32xf32>
    %1 = arith.truncf %0 : vector<16x32xf32> to vector<16x32xbf16>
    %c0_1 = arith.constant 0 : index
    %c0_2 = arith.constant 0 : index
    %2 = vector.load %arg2[%c0_1, %c0_2] : memref<32x64xbf16, #tpu.memory_space<vmem>>, vector<32x64xbf16>
    %cst = arith.constant dense<0.000000e+00> : vector<16x64xf32>
    %3 = tpu.matmul %1, %2, %cst {dimension_numbers = #tpu.dot_dimension_numbers<[1], [0], [0], [1], [0, 0, 1, 1], [], []>} : vector<16x32xbf16>, vector<32x64xbf16>, vector<16x64xf32> -> vector<16x64xf32>
    %c0_3 = arith.constant 0 : index
    %c0_4 = arith.constant 0 : index
    %4 = vector.load %arg3[%c0_3, %c0_4] : memref<1x64xf32, #tpu.memory_space<vmem>>, vector<1x64xf32>
    %5 = vector.broadcast %4 : vector<1x64xf32> to vector<16x64xf32>
    %6 = arith.addf %3, %5 : vector<16x64xf32>
    %7 = vector.extract_strided_slice %6 {offsets = [0, 0], sizes = [16, 32], strides = [1, 1]} : vector<16x64xf32> to vector<16x32xf32>
    %c0_5 = arith.constant 0 : index
    %c0_6 = arith.constant 0 : index
    %8 = vector.load %arg4[%c0_5, %c0_6] : memref<16x32xf32, #tpu.memory_space<vmem>>, vector<16x32xf32>
    tpu.vector_store %arg4[%c0_5, %c0_6], %7 {strides = array<i32>} : memref<16x32xf32, #tpu.memory_space<vmem>>, vector<16x32xf32>,
    %9 = vector.extract_strided_slice %6 {offsets = [0, 32], sizes = [16, 32], strides = [1, 1]} : vector<16x64xf32> to vector<16x32xf32>
    %c0_7 = arith.constant 0 : index
    %c0_8 = arith.constant 0 : index
    %10 = vector.load %arg5[%c0_7, %c0_8] : memref<16x32xf32, #tpu.memory_space<vmem>>, vector<16x32xf32>
    tpu.vector_store %arg5[%c0_7, %c0_8], %9 {strides = array<i32>} : memref<16x32xf32, #tpu.memory_space<vmem>>, vector<16x32xf32>,
    return
  }
  func.func @transform_0(%arg0: i32) -> (i32, i32) {
    %c0_i32 = arith.constant 0 : i32
    %c0_i32_0 = arith.constant 0 : i32
    return %arg0, %c0_i32 : i32, i32
  }
  func.func @transform_1(%arg0: i32) -> (i32, i32) {
    %c0_i32 = arith.constant 0 : i32
    %c0_i32_0 = arith.constant 0 : i32
    %c0_i32_1 = arith.constant 0 : i32
    return %c0_i32, %c0_i32_0 : i32, i32
  }
  func.func @transform_2(%arg0: i32) -> (i32, i32) {
    %c0_i32 = arith.constant 0 : i32
    %c0_i32_0 = arith.constant 0 : i32
    %c0_i32_1 = arith.constant 0 : i32
    return %c0_i32, %c0_i32_0 : i32, i32
  }
  func.func @transform_3(%arg0: i32) -> (i32, i32) {
    %c0_i32 = arith.constant 0 : i32
    %c0_i32_0 = arith.constant 0 : i32
    return %arg0, %c0_i32 : i32, i32
  }
  func.func @transform_4(%arg0: i32) -> (i32, i32) {
    %c0_i32 = arith.constant 0 : i32
    %c0_i32_0 = arith.constant 0 : i32
    return %arg0, %c0_i32 : i32, i32
  }
}

module attributes {stable_mosaic.version = 11 : i64} {
  func.func @_out_proj_ln_kernel(%arg0: i32, %arg1: memref<16x32xf32, #tpu.memory_space<vmem>>, %arg2: memref<16x32xf32, #tpu.memory_space<vmem>>, %arg3: memref<32x32xbf16, #tpu.memory_space<vmem>>, %arg4: memref<1x32xf32, #tpu.memory_space<vmem>>, %arg5: memref<1x32xf32, #tpu.memory_space<vmem>>, %arg6: memref<1x32xf32, #tpu.memory_space<vmem>>, %arg7: memref<16x32xf32, #tpu.memory_space<vmem>>) attributes {dimension_semantics = [#tpu.dimension_semantics<parallel>], iteration_bounds = array<i64: 1>, scalar_prefetch = 0 : i64, scratch_operands = 0 : i64, tpu.core_type = #tpu.core_type<tc>, window_params = [{transform_indices = @transform_0, window_bounds = array<i64: 16, 32>}, {transform_indices = @transform_1, window_bounds = array<i64: 16, 32>}, {pipeline_mode = #tpu.pipeline_mode<synchronous>, transform_indices = @transform_2, window_bounds = array<i64: 32, 32>}, {pipeline_mode = #tpu.pipeline_mode<synchronous>, transform_indices = @transform_3, window_bounds = array<i64: 1, 32>}, {pipeline_mode = #tpu.pipeline_mode<synchronous>, transform_indices = @transform_4, window_bounds = array<i64: 1, 32>}, {pipeline_mode = #tpu.pipeline_mode<synchronous>, transform_indices = @transform_5, window_bounds = array<i64: 1, 32>}, {transform_indices = @transform_6, window_bounds = array<i64: 16, 32>}]} {
    %c0 = arith.constant 0 : index
    %c0_0 = arith.constant 0 : index
    %0 = vector.load %arg1[%c0, %c0_0] : memref<16x32xf32, #tpu.memory_space<vmem>>, vector<16x32xf32>
    %1 = arith.truncf %0 : vector<16x32xf32> to vector<16x32xbf16>
    %c0_1 = arith.constant 0 : index
    %c0_2 = arith.constant 0 : index
    %2 = vector.load %arg3[%c0_1, %c0_2] : memref<32x32xbf16, #tpu.memory_space<vmem>>, vector<32x32xbf16>
    %cst = arith.constant dense<0.000000e+00> : vector<16x32xf32>
    %3 = tpu.matmul %1, %2, %cst {dimension_numbers = #tpu.dot_dimension_numbers<[1], [0], [0], [1], [0, 0, 1, 1], [], []>} : vector<16x32xbf16>, vector<32x32xbf16>, vector<16x32xf32> -> vector<16x32xf32>
    %c0_3 = arith.constant 0 : index
    %c0_4 = arith.constant 0 : index
    %4 = vector.load %arg4[%c0_3, %c0_4] : memref<1x32xf32, #tpu.memory_space<vmem>>, vector<1x32xf32>
    %5 = vector.broadcast %4 : vector<1x32xf32> to vector<16x32xf32>
    %6 = arith.addf %3, %5 : vector<16x32xf32>
    %c0_5 = arith.constant 0 : index
    %c0_6 = arith.constant 0 : index
    %7 = vector.load %arg2[%c0_5, %c0_6] : memref<16x32xf32, #tpu.memory_space<vmem>>, vector<16x32xf32>
    %8 = arith.addf %6, %7 : vector<16x32xf32>
    %cst_7 = arith.constant dense<0.000000e+00> : vector<16xf32>
    %9 = vector.multi_reduction <add>, %8, %cst_7 [1] : vector<16x32xf32> to vector<16xf32>
    %10 = vector.shape_cast %9 : vector<16xf32> to vector<16x1xf32>
    %cst_8 = arith.constant 3.200000e+01 : f32
    %11 = vector.broadcast %cst_8 : f32 to vector<16x1xf32>
    %12 = arith.divf %10, %11 : vector<16x1xf32>
    %13 = vector.broadcast %12 : vector<16x1xf32> to vector<16x32xf32>
    %14 = arith.subf %8, %13 : vector<16x32xf32>
    %15 = vector.broadcast %12 : vector<16x1xf32> to vector<16x32xf32>
    %16 = arith.subf %8, %15 : vector<16x32xf32>
    %17 = arith.mulf %14, %16 : vector<16x32xf32>
    %cst_9 = arith.constant dense<0.000000e+00> : vector<16xf32>
    %18 = vector.multi_reduction <add>, %17, %cst_9 [1] : vector<16x32xf32> to vector<16xf32>
    %19 = vector.shape_cast %18 : vector<16xf32> to vector<16x1xf32>
    %cst_10 = arith.constant 3.200000e+01 : f32
    %20 = vector.broadcast %cst_10 : f32 to vector<16x1xf32>
    %21 = arith.divf %19, %20 : vector<16x1xf32>
    %22 = vector.broadcast %12 : vector<16x1xf32> to vector<16x32xf32>
    %23 = arith.subf %8, %22 : vector<16x32xf32>
    %cst_11 = arith.constant 9.99999974E-6 : f32
    %24 = vector.broadcast %cst_11 : f32 to vector<16x1xf32>
    %25 = arith.addf %21, %24 : vector<16x1xf32>
    %26 = math.rsqrt %25 : vector<16x1xf32>
    %27 = vector.broadcast %26 : vector<16x1xf32> to vector<16x32xf32>
    %28 = arith.mulf %23, %27 : vector<16x32xf32>
    %c0_12 = arith.constant 0 : index
    %c0_13 = arith.constant 0 : index
    %29 = vector.load %arg5[%c0_12, %c0_13] : memref<1x32xf32, #tpu.memory_space<vmem>>, vector<1x32xf32>
    %30 = vector.broadcast %29 : vector<1x32xf32> to vector<16x32xf32>
    %31 = arith.mulf %28, %30 : vector<16x32xf32>
    %c0_14 = arith.constant 0 : index
    %c0_15 = arith.constant 0 : index
    %32 = vector.load %arg6[%c0_14, %c0_15] : memref<1x32xf32, #tpu.memory_space<vmem>>, vector<1x32xf32>
    %33 = vector.broadcast %32 : vector<1x32xf32> to vector<16x32xf32>
    %34 = arith.addf %31, %33 : vector<16x32xf32>
    %c0_16 = arith.constant 0 : index
    %c0_17 = arith.constant 0 : index
    %35 = vector.load %arg7[%c0_16, %c0_17] : memref<16x32xf32, #tpu.memory_space<vmem>>, vector<16x32xf32>
    tpu.vector_store %arg7[%c0_16, %c0_17], %34 {strides = array<i32>} : memref<16x32xf32, #tpu.memory_space<vmem>>, vector<16x32xf32>,
    return
  }
  func.func @transform_0(%arg0: i32) -> (i32, i32) {
    %c0_i32 = arith.constant 0 : i32
    %c0_i32_0 = arith.constant 0 : i32
    return %arg0, %c0_i32 : i32, i32
  }
  func.func @transform_1(%arg0: i32) -> (i32, i32) {
    %c0_i32 = arith.constant 0 : i32
    %c0_i32_0 = arith.constant 0 : i32
    return %arg0, %c0_i32 : i32, i32
  }
  func.func @transform_2(%arg0: i32) -> (i32, i32) {
    %c0_i32 = arith.constant 0 : i32
    %c0_i32_0 = arith.constant 0 : i32
    %c0_i32_1 = arith.constant 0 : i32
    return %c0_i32, %c0_i32_0 : i32, i32
  }
  func.func @transform_3(%arg0: i32) -> (i32, i32) {
    %c0_i32 = arith.constant 0 : i32
    %c0_i32_0 = arith.constant 0 : i32
    %c0_i32_1 = arith.constant 0 : i32
    return %c0_i32, %c0_i32_0 : i32, i32
  }
  func.func @transform_4(%arg0: i32) -> (i32, i32) {
    %c0_i32 = arith.constant 0 : i32
    %c0_i32_0 = arith.constant 0 : i32
    %c0_i32_1 = arith.constant 0 : i32
    return %c0_i32, %c0_i32_0 : i32, i32
  }
  func.func @transform_5(%arg0: i32) -> (i32, i32) {
    %c0_i32 = arith.constant 0 : i32
    %c0_i32_0 = arith.constant 0 : i32
    %c0_i32_1 = arith.constant 0 : i32
    return %c0_i32, %c0_i32_0 : i32, i32
  }
  func.func @transform_6(%arg0: i32) -> (i32, i32) {
    %c0_i32 = arith.constant 0 : i32
    %c0_i32_0 = arith.constant 0 : i32
    return %arg0, %c0_i32 : i32, i32
  }
}

module attributes {stable_mosaic.version = 11 : i64} {
  func.func @_ffn_ln_kernel(%arg0: i32, %arg1: memref<16x32xf32, #tpu.memory_space<vmem>>, %arg2: memref<32x64xbf16, #tpu.memory_space<vmem>>, %arg3: memref<1x64xf32, #tpu.memory_space<vmem>>, %arg4: memref<64x32xbf16, #tpu.memory_space<vmem>>, %arg5: memref<1x32xf32, #tpu.memory_space<vmem>>, %arg6: memref<1x32xf32, #tpu.memory_space<vmem>>, %arg7: memref<1x32xf32, #tpu.memory_space<vmem>>, %arg8: memref<16x32xf32, #tpu.memory_space<vmem>>) attributes {dimension_semantics = [#tpu.dimension_semantics<parallel>], iteration_bounds = array<i64: 1>, scalar_prefetch = 0 : i64, scratch_operands = 0 : i64, tpu.core_type = #tpu.core_type<tc>, window_params = [{transform_indices = @transform_0, window_bounds = array<i64: 16, 32>}, {pipeline_mode = #tpu.pipeline_mode<synchronous>, transform_indices = @transform_1, window_bounds = array<i64: 32, 64>}, {pipeline_mode = #tpu.pipeline_mode<synchronous>, transform_indices = @transform_2, window_bounds = array<i64: 1, 64>}, {pipeline_mode = #tpu.pipeline_mode<synchronous>, transform_indices = @transform_3, window_bounds = array<i64: 64, 32>}, {pipeline_mode = #tpu.pipeline_mode<synchronous>, transform_indices = @transform_4, window_bounds = array<i64: 1, 32>}, {pipeline_mode = #tpu.pipeline_mode<synchronous>, transform_indices = @transform_5, window_bounds = array<i64: 1, 32>}, {pipeline_mode = #tpu.pipeline_mode<synchronous>, transform_indices = @transform_6, window_bounds = array<i64: 1, 32>}, {transform_indices = @transform_7, window_bounds = array<i64: 16, 32>}]} {
    %c0 = arith.constant 0 : index
    %c0_0 = arith.constant 0 : index
    %0 = vector.load %arg1[%c0, %c0_0] : memref<16x32xf32, #tpu.memory_space<vmem>>, vector<16x32xf32>
    %1 = arith.truncf %0 : vector<16x32xf32> to vector<16x32xbf16>
    %c0_1 = arith.constant 0 : index
    %c0_2 = arith.constant 0 : index
    %2 = vector.load %arg2[%c0_1, %c0_2] : memref<32x64xbf16, #tpu.memory_space<vmem>>, vector<32x64xbf16>
    %cst = arith.constant dense<0.000000e+00> : vector<16x64xf32>
    %3 = tpu.matmul %1, %2, %cst {dimension_numbers = #tpu.dot_dimension_numbers<[1], [0], [0], [1], [0, 0, 1, 1], [], []>} : vector<16x32xbf16>, vector<32x64xbf16>, vector<16x64xf32> -> vector<16x64xf32>
    %c0_3 = arith.constant 0 : index
    %c0_4 = arith.constant 0 : index
    %4 = vector.load %arg3[%c0_3, %c0_4] : memref<1x64xf32, #tpu.memory_space<vmem>>, vector<1x64xf32>
    %5 = vector.broadcast %4 : vector<1x64xf32> to vector<16x64xf32>
    %6 = arith.addf %3, %5 : vector<16x64xf32>
    %cst_5 = arith.constant 0.000000e+00 : f32
    %7 = vector.broadcast %cst_5 : f32 to vector<16x64xf32>
    %8 = arith.maximumf %6, %7 : vector<16x64xf32>
    %9 = arith.truncf %8 : vector<16x64xf32> to vector<16x64xbf16>
    %c0_6 = arith.constant 0 : index
    %c0_7 = arith.constant 0 : index
    %10 = vector.load %arg4[%c0_6, %c0_7] : memref<64x32xbf16, #tpu.memory_space<vmem>>, vector<64x32xbf16>
    %cst_8 = arith.constant dense<0.000000e+00> : vector<16x32xf32>
    %11 = tpu.matmul %9, %10, %cst_8 {dimension_numbers = #tpu.dot_dimension_numbers<[1], [0], [0], [1], [0, 0, 1, 1], [], []>} : vector<16x64xbf16>, vector<64x32xbf16>, vector<16x32xf32> -> vector<16x32xf32>
    %c0_9 = arith.constant 0 : index
    %c0_10 = arith.constant 0 : index
    %12 = vector.load %arg5[%c0_9, %c0_10] : memref<1x32xf32, #tpu.memory_space<vmem>>, vector<1x32xf32>
    %13 = vector.broadcast %12 : vector<1x32xf32> to vector<16x32xf32>
    %14 = arith.addf %11, %13 : vector<16x32xf32>
    %15 = arith.addf %0, %14 : vector<16x32xf32>
    %cst_11 = arith.constant dense<0.000000e+00> : vector<16xf32>
    %16 = vector.multi_reduction <add>, %15, %cst_11 [1] : vector<16x32xf32> to vector<16xf32>
    %17 = vector.shape_cast %16 : vector<16xf32> to vector<16x1xf32>
    %cst_12 = arith.constant 3.200000e+01 : f32
    %18 = vector.broadcast %cst_12 : f32 to vector<16x1xf32>
    %19 = arith.divf %17, %18 : vector<16x1xf32>
    %20 = vector.broadcast %19 : vector<16x1xf32> to vector<16x32xf32>
    %21 = arith.subf %15, %20 : vector<16x32xf32>
    %22 = vector.broadcast %19 : vector<16x1xf32> to vector<16x32xf32>
    %23 = arith.subf %15, %22 : vector<16x32xf32>
    %24 = arith.mulf %21, %23 : vector<16x32xf32>
    %cst_13 = arith.constant dense<0.000000e+00> : vector<16xf32>
    %25 = vector.multi_reduction <add>, %24, %cst_13 [1] : vector<16x32xf32> to vector<16xf32>
    %26 = vector.shape_cast %25 : vector<16xf32> to vector<16x1xf32>
    %cst_14 = arith.constant 3.200000e+01 : f32
    %27 = vector.broadcast %cst_14 : f32 to vector<16x1xf32>
    %28 = arith.divf %26, %27 : vector<16x1xf32>
    %29 = vector.broadcast %19 : vector<16x1xf32> to vector<16x32xf32>
    %30 = arith.subf %15, %29 : vector<16x32xf32>
    %cst_15 = arith.constant 9.99999974E-6 : f32
    %31 = vector.broadcast %cst_15 : f32 to vector<16x1xf32>
    %32 = arith.addf %28, %31 : vector<16x1xf32>
    %33 = math.rsqrt %32 : vector<16x1xf32>
    %34 = vector.broadcast %33 : vector<16x1xf32> to vector<16x32xf32>
    %35 = arith.mulf %30, %34 : vector<16x32xf32>
    %c0_16 = arith.constant 0 : index
    %c0_17 = arith.constant 0 : index
    %36 = vector.load %arg6[%c0_16, %c0_17] : memref<1x32xf32, #tpu.memory_space<vmem>>, vector<1x32xf32>
    %37 = vector.broadcast %36 : vector<1x32xf32> to vector<16x32xf32>
    %38 = arith.mulf %35, %37 : vector<16x32xf32>
    %c0_18 = arith.constant 0 : index
    %c0_19 = arith.constant 0 : index
    %39 = vector.load %arg7[%c0_18, %c0_19] : memref<1x32xf32, #tpu.memory_space<vmem>>, vector<1x32xf32>
    %40 = vector.broadcast %39 : vector<1x32xf32> to vector<16x32xf32>
    %41 = arith.addf %38, %40 : vector<16x32xf32>
    %c0_20 = arith.constant 0 : index
    %c0_21 = arith.constant 0 : index
    %42 = vector.load %arg8[%c0_20, %c0_21] : memref<16x32xf32, #tpu.memory_space<vmem>>, vector<16x32xf32>
    tpu.vector_store %arg8[%c0_20, %c0_21], %41 {strides = array<i32>} : memref<16x32xf32, #tpu.memory_space<vmem>>, vector<16x32xf32>,
    return
  }
  func.func @transform_0(%arg0: i32) -> (i32, i32) {
    %c0_i32 = arith.constant 0 : i32
    %c0_i32_0 = arith.constant 0 : i32
    return %arg0, %c0_i32 : i32, i32
  }
  func.func @transform_1(%arg0: i32) -> (i32, i32) {
    %c0_i32 = arith.constant 0 : i32
    %c0_i32_0 = arith.constant 0 : i32
    %c0_i32_1 = arith.constant 0 : i32
    return %c0_i32, %c0_i32_0 : i32, i32
  }
  func.func @transform_2(%arg0: i32) -> (i32, i32) {
    %c0_i32 = arith.constant 0 : i32
    %c0_i32_0 = arith.constant 0 : i32
    %c0_i32_1 = arith.constant 0 : i32
    return %c0_i32, %c0_i32_0 : i32, i32
  }
  func.func @transform_3(%arg0: i32) -> (i32, i32) {
    %c0_i32 = arith.constant 0 : i32
    %c0_i32_0 = arith.constant 0 : i32
    %c0_i32_1 = arith.constant 0 : i32
    return %c0_i32, %c0_i32_0 : i32, i32
  }
  func.func @transform_4(%arg0: i32) -> (i32, i32) {
    %c0_i32 = arith.constant 0 : i32
    %c0_i32_0 = arith.constant 0 : i32
    %c0_i32_1 = arith.constant 0 : i32
    return %c0_i32, %c0_i32_0 : i32, i32
  }
  func.func @transform_5(%arg0: i32) -> (i32, i32) {
    %c0_i32 = arith.constant 0 : i32
    %c0_i32_0 = arith.constant 0 : i32
    %c0_i32_1 = arith.constant 0 : i32
    return %c0_i32, %c0_i32_0 : i32, i32
  }
  func.func @transform_6(%arg0: i32) -> (i32, i32) {
    %c0_i32 = arith.constant 0 : i32
    %c0_i32_0 = arith.constant 0 : i32
    %c0_i32_1 = arith.constant 0 : i32
    return %c0_i32, %c0_i32_0 : i32, i32
  }
  func.func @transform_7(%arg0: i32) -> (i32, i32) {
    %c0_i32 = arith.constant 0 : i32
    %c0_i32_0 = arith.constant 0 : i32
    return %arg0, %c0_i32 : i32, i32
  }
}

module attributes {stable_mosaic.version = 11 : i64} {
  func.func @_proj_split_kernel(%arg0: i32, %arg1: memref<16x32xf32, #tpu.memory_space<vmem>>, %arg2: memref<32x96xbf16, #tpu.memory_space<vmem>>, %arg3: memref<1x96xf32, #tpu.memory_space<vmem>>, %arg4: memref<16x32xf32, #tpu.memory_space<vmem>>, %arg5: memref<16x32xf32, #tpu.memory_space<vmem>>, %arg6: memref<16x32xf32, #tpu.memory_space<vmem>>) attributes {dimension_semantics = [#tpu.dimension_semantics<parallel>], iteration_bounds = array<i64: 1>, scalar_prefetch = 0 : i64, scratch_operands = 0 : i64, tpu.core_type = #tpu.core_type<tc>, window_params = [{transform_indices = @transform_0, window_bounds = array<i64: 16, 32>}, {pipeline_mode = #tpu.pipeline_mode<synchronous>, transform_indices = @transform_1, window_bounds = array<i64: 32, 96>}, {pipeline_mode = #tpu.pipeline_mode<synchronous>, transform_indices = @transform_2, window_bounds = array<i64: 1, 96>}, {transform_indices = @transform_3, window_bounds = array<i64: 16, 32>}, {transform_indices = @transform_4, window_bounds = array<i64: 16, 32>}, {transform_indices = @transform_5, window_bounds = array<i64: 16, 32>}]} {
    %c0 = arith.constant 0 : index
    %c0_0 = arith.constant 0 : index
    %0 = vector.load %arg1[%c0, %c0_0] : memref<16x32xf32, #tpu.memory_space<vmem>>, vector<16x32xf32>
    %1 = arith.truncf %0 : vector<16x32xf32> to vector<16x32xbf16>
    %c0_1 = arith.constant 0 : index
    %c0_2 = arith.constant 0 : index
    %2 = vector.load %arg2[%c0_1, %c0_2] : memref<32x96xbf16, #tpu.memory_space<vmem>>, vector<32x96xbf16>
    %cst = arith.constant dense<0.000000e+00> : vector<16x96xf32>
    %3 = tpu.matmul %1, %2, %cst {dimension_numbers = #tpu.dot_dimension_numbers<[1], [0], [0], [1], [0, 0, 1, 1], [], []>} : vector<16x32xbf16>, vector<32x96xbf16>, vector<16x96xf32> -> vector<16x96xf32>
    %c0_3 = arith.constant 0 : index
    %c0_4 = arith.constant 0 : index
    %4 = vector.load %arg3[%c0_3, %c0_4] : memref<1x96xf32, #tpu.memory_space<vmem>>, vector<1x96xf32>
    %5 = vector.broadcast %4 : vector<1x96xf32> to vector<16x96xf32>
    %6 = arith.addf %3, %5 : vector<16x96xf32>
    %7 = vector.extract_strided_slice %6 {offsets = [0, 0], sizes = [16, 32], strides = [1, 1]} : vector<16x96xf32> to vector<16x32xf32>
    %cst_5 = arith.constant 0.353553385 : f32
    %8 = vector.broadcast %cst_5 : f32 to vector<16x32xf32>
    %9 = arith.mulf %7, %8 : vector<16x32xf32>
    %c0_6 = arith.constant 0 : index
    %c0_7 = arith.constant 0 : index
    %10 = vector.load %arg4[%c0_6, %c0_7] : memref<16x32xf32, #tpu.memory_space<vmem>>, vector<16x32xf32>
    tpu.vector_store %arg4[%c0_6, %c0_7], %9 {strides = array<i32>} : memref<16x32xf32, #tpu.memory_space<vmem>>, vector<16x32xf32>,
    %11 = vector.extract_strided_slice %6 {offsets = [0, 32], sizes = [16, 32], strides = [1, 1]} : vector<16x96xf32> to vector<16x32xf32>
    %c0_8 = arith.constant 0 : index
    %c0_9 = arith.constant 0 : index
    %12 = vector.load %arg5[%c0_8, %c0_9] : memref<16x32xf32, #tpu.memory_space<vmem>>, vector<16x32xf32>
    tpu.vector_store %arg5[%c0_8, %c0_9], %11 {strides = array<i32>} : memref<16x32xf32, #tpu.memory_space<vmem>>, vector<16x32xf32>,
    %13 = vector.extract_strided_slice %6 {offsets = [0, 64], sizes = [16, 32], strides = [1, 1]} : vector<16x96xf32> to vector<16x32xf32>
    %c0_10 = arith.constant 0 : index
    %c0_11 = arith.constant 0 : index
    %14 = vector.load %arg6[%c0_10, %c0_11] : memref<16x32xf32, #tpu.memory_space<vmem>>, vector<16x32xf32>
    tpu.vector_store %arg6[%c0_10, %c0_11], %13 {strides = array<i32>} : memref<16x32xf32, #tpu.memory_space<vmem>>, vector<16x32xf32>,
    return
  }
  func.func @transform_0(%arg0: i32) -> (i32, i32) {
    %c0_i32 = arith.constant 0 : i32
    %c0_i32_0 = arith.constant 0 : i32
    return %arg0, %c0_i32 : i32, i32
  }
  func.func @transform_1(%arg0: i32) -> (i32, i32) {
    %c0_i32 = arith.constant 0 : i32
    %c0_i32_0 = arith.constant 0 : i32
    %c0_i32_1 = arith.constant 0 : i32
    return %c0_i32, %c0_i32_0 : i32, i32
  }
  func.func @transform_2(%arg0: i32) -> (i32, i32) {
    %c0_i32 = arith.constant 0 : i32
    %c0_i32_0 = arith.constant 0 : i32
    %c0_i32_1 = arith.constant 0 : i32
    return %c0_i32, %c0_i32_0 : i32, i32
  }
  func.func @transform_3(%arg0: i32) -> (i32, i32) {
    %c0_i32 = arith.constant 0 : i32
    %c0_i32_0 = arith.constant 0 : i32
    return %arg0, %c0_i32 : i32, i32
  }
  func.func @transform_4(%arg0: i32) -> (i32, i32) {
    %c0_i32 = arith.constant 0 : i32
    %c0_i32_0 = arith.constant 0 : i32
    return %arg0, %c0_i32 : i32, i32
  }
  func.func @transform_5(%arg0: i32) -> (i32, i32) {
    %c0_i32 = arith.constant 0 : i32
    %c0_i32_0 = arith.constant 0 : i32
    return %arg0, %c0_i32 : i32, i32
  }
}

module attributes {stable_mosaic.version = 11 : i64} {
  func.func @_out_proj_ln_kernel(%arg0: i32, %arg1: memref<16x32xf32, #tpu.memory_space<vmem>>, %arg2: memref<16x32xf32, #tpu.memory_space<vmem>>, %arg3: memref<32x32xbf16, #tpu.memory_space<vmem>>, %arg4: memref<1x32xf32, #tpu.memory_space<vmem>>, %arg5: memref<1x32xf32, #tpu.memory_space<vmem>>, %arg6: memref<1x32xf32, #tpu.memory_space<vmem>>, %arg7: memref<16x32xf32, #tpu.memory_space<vmem>>) attributes {dimension_semantics = [#tpu.dimension_semantics<parallel>], iteration_bounds = array<i64: 1>, scalar_prefetch = 0 : i64, scratch_operands = 0 : i64, tpu.core_type = #tpu.core_type<tc>, window_params = [{transform_indices = @transform_0, window_bounds = array<i64: 16, 32>}, {transform_indices = @transform_1, window_bounds = array<i64: 16, 32>}, {pipeline_mode = #tpu.pipeline_mode<synchronous>, transform_indices = @transform_2, window_bounds = array<i64: 32, 32>}, {pipeline_mode = #tpu.pipeline_mode<synchronous>, transform_indices = @transform_3, window_bounds = array<i64: 1, 32>}, {pipeline_mode = #tpu.pipeline_mode<synchronous>, transform_indices = @transform_4, window_bounds = array<i64: 1, 32>}, {pipeline_mode = #tpu.pipeline_mode<synchronous>, transform_indices = @transform_5, window_bounds = array<i64: 1, 32>}, {transform_indices = @transform_6, window_bounds = array<i64: 16, 32>}]} {
    %c0 = arith.constant 0 : index
    %c0_0 = arith.constant 0 : index
    %0 = vector.load %arg1[%c0, %c0_0] : memref<16x32xf32, #tpu.memory_space<vmem>>, vector<16x32xf32>
    %1 = arith.truncf %0 : vector<16x32xf32> to vector<16x32xbf16>
    %c0_1 = arith.constant 0 : index
    %c0_2 = arith.constant 0 : index
    %2 = vector.load %arg3[%c0_1, %c0_2] : memref<32x32xbf16, #tpu.memory_space<vmem>>, vector<32x32xbf16>
    %cst = arith.constant dense<0.000000e+00> : vector<16x32xf32>
    %3 = tpu.matmul %1, %2, %cst {dimension_numbers = #tpu.dot_dimension_numbers<[1], [0], [0], [1], [0, 0, 1, 1], [], []>} : vector<16x32xbf16>, vector<32x32xbf16>, vector<16x32xf32> -> vector<16x32xf32>
    %c0_3 = arith.constant 0 : index
    %c0_4 = arith.constant 0 : index
    %4 = vector.load %arg4[%c0_3, %c0_4] : memref<1x32xf32, #tpu.memory_space<vmem>>, vector<1x32xf32>
    %5 = vector.broadcast %4 : vector<1x32xf32> to vector<16x32xf32>
    %6 = arith.addf %3, %5 : vector<16x32xf32>
    %c0_5 = arith.constant 0 : index
    %c0_6 = arith.constant 0 : index
    %7 = vector.load %arg2[%c0_5, %c0_6] : memref<16x32xf32, #tpu.memory_space<vmem>>, vector<16x32xf32>
    %8 = arith.addf %6, %7 : vector<16x32xf32>
    %cst_7 = arith.constant dense<0.000000e+00> : vector<16xf32>
    %9 = vector.multi_reduction <add>, %8, %cst_7 [1] : vector<16x32xf32> to vector<16xf32>
    %10 = vector.shape_cast %9 : vector<16xf32> to vector<16x1xf32>
    %cst_8 = arith.constant 3.200000e+01 : f32
    %11 = vector.broadcast %cst_8 : f32 to vector<16x1xf32>
    %12 = arith.divf %10, %11 : vector<16x1xf32>
    %13 = vector.broadcast %12 : vector<16x1xf32> to vector<16x32xf32>
    %14 = arith.subf %8, %13 : vector<16x32xf32>
    %15 = vector.broadcast %12 : vector<16x1xf32> to vector<16x32xf32>
    %16 = arith.subf %8, %15 : vector<16x32xf32>
    %17 = arith.mulf %14, %16 : vector<16x32xf32>
    %cst_9 = arith.constant dense<0.000000e+00> : vector<16xf32>
    %18 = vector.multi_reduction <add>, %17, %cst_9 [1] : vector<16x32xf32> to vector<16xf32>
    %19 = vector.shape_cast %18 : vector<16xf32> to vector<16x1xf32>
    %cst_10 = arith.constant 3.200000e+01 : f32
    %20 = vector.broadcast %cst_10 : f32 to vector<16x1xf32>
    %21 = arith.divf %19, %20 : vector<16x1xf32>
    %22 = vector.broadcast %12 : vector<16x1xf32> to vector<16x32xf32>
    %23 = arith.subf %8, %22 : vector<16x32xf32>
    %cst_11 = arith.constant 9.99999974E-6 : f32
    %24 = vector.broadcast %cst_11 : f32 to vector<16x1xf32>
    %25 = arith.addf %21, %24 : vector<16x1xf32>
    %26 = math.rsqrt %25 : vector<16x1xf32>
    %27 = vector.broadcast %26 : vector<16x1xf32> to vector<16x32xf32>
    %28 = arith.mulf %23, %27 : vector<16x32xf32>
    %c0_12 = arith.constant 0 : index
    %c0_13 = arith.constant 0 : index
    %29 = vector.load %arg5[%c0_12, %c0_13] : memref<1x32xf32, #tpu.memory_space<vmem>>, vector<1x32xf32>
    %30 = vector.broadcast %29 : vector<1x32xf32> to vector<16x32xf32>
    %31 = arith.mulf %28, %30 : vector<16x32xf32>
    %c0_14 = arith.constant 0 : index
    %c0_15 = arith.constant 0 : index
    %32 = vector.load %arg6[%c0_14, %c0_15] : memref<1x32xf32, #tpu.memory_space<vmem>>, vector<1x32xf32>
    %33 = vector.broadcast %32 : vector<1x32xf32> to vector<16x32xf32>
    %34 = arith.addf %31, %33 : vector<16x32xf32>
    %c0_16 = arith.constant 0 : index
    %c0_17 = arith.constant 0 : index
    %35 = vector.load %arg7[%c0_16, %c0_17] : memref<16x32xf32, #tpu.memory_space<vmem>>, vector<16x32xf32>
    tpu.vector_store %arg7[%c0_16, %c0_17], %34 {strides = array<i32>} : memref<16x32xf32, #tpu.memory_space<vmem>>, vector<16x32xf32>,
    return
  }
  func.func @transform_0(%arg0: i32) -> (i32, i32) {
    %c0_i32 = arith.constant 0 : i32
    %c0_i32_0 = arith.constant 0 : i32
    return %arg0, %c0_i32 : i32, i32
  }
  func.func @transform_1(%arg0: i32) -> (i32, i32) {
    %c0_i32 = arith.constant 0 : i32
    %c0_i32_0 = arith.constant 0 : i32
    return %arg0, %c0_i32 : i32, i32
  }
  func.func @transform_2(%arg0: i32) -> (i32, i32) {
    %c0_i32 = arith.constant 0 : i32
    %c0_i32_0 = arith.constant 0 : i32
    %c0_i32_1 = arith.constant 0 : i32
    return %c0_i32, %c0_i32_0 : i32, i32
  }
  func.func @transform_3(%arg0: i32) -> (i32, i32) {
    %c0_i32 = arith.constant 0 : i32
    %c0_i32_0 = arith.constant 0 : i32
    %c0_i32_1 = arith.constant 0 : i32
    return %c0_i32, %c0_i32_0 : i32, i32
  }
  func.func @transform_4(%arg0: i32) -> (i32, i32) {
    %c0_i32 = arith.constant 0 : i32
    %c0_i32_0 = arith.constant 0 : i32
    %c0_i32_1 = arith.constant 0 : i32
    return %c0_i32, %c0_i32_0 : i32, i32
  }
  func.func @transform_5(%arg0: i32) -> (i32, i32) {
    %c0_i32 = arith.constant 0 : i32
    %c0_i32_0 = arith.constant 0 : i32
    %c0_i32_1 = arith.constant 0 : i32
    return %c0_i32, %c0_i32_0 : i32, i32
  }
  func.func @transform_6(%arg0: i32) -> (i32, i32) {
    %c0_i32 = arith.constant 0 : i32
    %c0_i32_0 = arith.constant 0 : i32
    return %arg0, %c0_i32 : i32, i32
  }
}

module attributes {stable_mosaic.version = 11 : i64} {
  func.func @_proj_split_kernel(%arg0: i32, %arg1: memref<16x32xf32, #tpu.memory_space<vmem>>, %arg2: memref<32x32xbf16, #tpu.memory_space<vmem>>, %arg3: memref<1x32xf32, #tpu.memory_space<vmem>>, %arg4: memref<16x32xf32, #tpu.memory_space<vmem>>) attributes {dimension_semantics = [#tpu.dimension_semantics<parallel>], iteration_bounds = array<i64: 1>, scalar_prefetch = 0 : i64, scratch_operands = 0 : i64, tpu.core_type = #tpu.core_type<tc>, window_params = [{transform_indices = @transform_0, window_bounds = array<i64: 16, 32>}, {pipeline_mode = #tpu.pipeline_mode<synchronous>, transform_indices = @transform_1, window_bounds = array<i64: 32, 32>}, {pipeline_mode = #tpu.pipeline_mode<synchronous>, transform_indices = @transform_2, window_bounds = array<i64: 1, 32>}, {transform_indices = @transform_3, window_bounds = array<i64: 16, 32>}]} {
    %c0 = arith.constant 0 : index
    %c0_0 = arith.constant 0 : index
    %0 = vector.load %arg1[%c0, %c0_0] : memref<16x32xf32, #tpu.memory_space<vmem>>, vector<16x32xf32>
    %1 = arith.truncf %0 : vector<16x32xf32> to vector<16x32xbf16>
    %c0_1 = arith.constant 0 : index
    %c0_2 = arith.constant 0 : index
    %2 = vector.load %arg2[%c0_1, %c0_2] : memref<32x32xbf16, #tpu.memory_space<vmem>>, vector<32x32xbf16>
    %cst = arith.constant dense<0.000000e+00> : vector<16x32xf32>
    %3 = tpu.matmul %1, %2, %cst {dimension_numbers = #tpu.dot_dimension_numbers<[1], [0], [0], [1], [0, 0, 1, 1], [], []>} : vector<16x32xbf16>, vector<32x32xbf16>, vector<16x32xf32> -> vector<16x32xf32>
    %c0_3 = arith.constant 0 : index
    %c0_4 = arith.constant 0 : index
    %4 = vector.load %arg3[%c0_3, %c0_4] : memref<1x32xf32, #tpu.memory_space<vmem>>, vector<1x32xf32>
    %5 = vector.broadcast %4 : vector<1x32xf32> to vector<16x32xf32>
    %6 = arith.addf %3, %5 : vector<16x32xf32>
    %cst_5 = arith.constant 0.353553385 : f32
    %7 = vector.broadcast %cst_5 : f32 to vector<16x32xf32>
    %8 = arith.mulf %6, %7 : vector<16x32xf32>
    %c0_6 = arith.constant 0 : index
    %c0_7 = arith.constant 0 : index
    %9 = vector.load %arg4[%c0_6, %c0_7] : memref<16x32xf32, #tpu.memory_space<vmem>>, vector<16x32xf32>
    tpu.vector_store %arg4[%c0_6, %c0_7], %8 {strides = array<i32>} : memref<16x32xf32, #tpu.memory_space<vmem>>, vector<16x32xf32>,
    return
  }
  func.func @transform_0(%arg0: i32) -> (i32, i32) {
    %c0_i32 = arith.constant 0 : i32
    %c0_i32_0 = arith.constant 0 : i32
    return %arg0, %c0_i32 : i32, i32
  }
  func.func @transform_1(%arg0: i32) -> (i32, i32) {
    %c0_i32 = arith.constant 0 : i32
    %c0_i32_0 = arith.constant 0 : i32
    %c0_i32_1 = arith.constant 0 : i32
    return %c0_i32, %c0_i32_0 : i32, i32
  }
  func.func @transform_2(%arg0: i32) -> (i32, i32) {
    %c0_i32 = arith.constant 0 : i32
    %c0_i32_0 = arith.constant 0 : i32
    %c0_i32_1 = arith.constant 0 : i32
    return %c0_i32, %c0_i32_0 : i32, i32
  }
  func.func @transform_3(%arg0: i32) -> (i32, i32) {
    %c0_i32 = arith.constant 0 : i32
    %c0_i32_0 = arith.constant 0 : i32
    return %arg0, %c0_i32 : i32, i32
  }
}

module attributes {stable_mosaic.version = 11 : i64} {
  func.func @_proj_split_kernel(%arg0: i32, %arg1: memref<16x32xf32, #tpu.memory_space<vmem>>, %arg2: memref<32x64xbf16, #tpu.memory_space<vmem>>, %arg3: memref<1x64xf32, #tpu.memory_space<vmem>>, %arg4: memref<16x32xf32, #tpu.memory_space<vmem>>, %arg5: memref<16x32xf32, #tpu.memory_space<vmem>>) attributes {dimension_semantics = [#tpu.dimension_semantics<parallel>], iteration_bounds = array<i64: 1>, scalar_prefetch = 0 : i64, scratch_operands = 0 : i64, tpu.core_type = #tpu.core_type<tc>, window_params = [{transform_indices = @transform_0, window_bounds = array<i64: 16, 32>}, {pipeline_mode = #tpu.pipeline_mode<synchronous>, transform_indices = @transform_1, window_bounds = array<i64: 32, 64>}, {pipeline_mode = #tpu.pipeline_mode<synchronous>, transform_indices = @transform_2, window_bounds = array<i64: 1, 64>}, {transform_indices = @transform_3, window_bounds = array<i64: 16, 32>}, {transform_indices = @transform_4, window_bounds = array<i64: 16, 32>}]} {
    %c0 = arith.constant 0 : index
    %c0_0 = arith.constant 0 : index
    %0 = vector.load %arg1[%c0, %c0_0] : memref<16x32xf32, #tpu.memory_space<vmem>>, vector<16x32xf32>
    %1 = arith.truncf %0 : vector<16x32xf32> to vector<16x32xbf16>
    %c0_1 = arith.constant 0 : index
    %c0_2 = arith.constant 0 : index
    %2 = vector.load %arg2[%c0_1, %c0_2] : memref<32x64xbf16, #tpu.memory_space<vmem>>, vector<32x64xbf16>
    %cst = arith.constant dense<0.000000e+00> : vector<16x64xf32>
    %3 = tpu.matmul %1, %2, %cst {dimension_numbers = #tpu.dot_dimension_numbers<[1], [0], [0], [1], [0, 0, 1, 1], [], []>} : vector<16x32xbf16>, vector<32x64xbf16>, vector<16x64xf32> -> vector<16x64xf32>
    %c0_3 = arith.constant 0 : index
    %c0_4 = arith.constant 0 : index
    %4 = vector.load %arg3[%c0_3, %c0_4] : memref<1x64xf32, #tpu.memory_space<vmem>>, vector<1x64xf32>
    %5 = vector.broadcast %4 : vector<1x64xf32> to vector<16x64xf32>
    %6 = arith.addf %3, %5 : vector<16x64xf32>
    %7 = vector.extract_strided_slice %6 {offsets = [0, 0], sizes = [16, 32], strides = [1, 1]} : vector<16x64xf32> to vector<16x32xf32>
    %c0_5 = arith.constant 0 : index
    %c0_6 = arith.constant 0 : index
    %8 = vector.load %arg4[%c0_5, %c0_6] : memref<16x32xf32, #tpu.memory_space<vmem>>, vector<16x32xf32>
    tpu.vector_store %arg4[%c0_5, %c0_6], %7 {strides = array<i32>} : memref<16x32xf32, #tpu.memory_space<vmem>>, vector<16x32xf32>,
    %9 = vector.extract_strided_slice %6 {offsets = [0, 32], sizes = [16, 32], strides = [1, 1]} : vector<16x64xf32> to vector<16x32xf32>
    %c0_7 = arith.constant 0 : index
    %c0_8 = arith.constant 0 : index
    %10 = vector.load %arg5[%c0_7, %c0_8] : memref<16x32xf32, #tpu.memory_space<vmem>>, vector<16x32xf32>
    tpu.vector_store %arg5[%c0_7, %c0_8], %9 {strides = array<i32>} : memref<16x32xf32, #tpu.memory_space<vmem>>, vector<16x32xf32>,
    return
  }
  func.func @transform_0(%arg0: i32) -> (i32, i32) {
    %c0_i32 = arith.constant 0 : i32
    %c0_i32_0 = arith.constant 0 : i32
    return %arg0, %c0_i32 : i32, i32
  }
  func.func @transform_1(%arg0: i32) -> (i32, i32) {
    %c0_i32 = arith.constant 0 : i32
    %c0_i32_0 = arith.constant 0 : i32
    %c0_i32_1 = arith.constant 0 : i32
    return %c0_i32, %c0_i32_0 : i32, i32
  }
  func.func @transform_2(%arg0: i32) -> (i32, i32) {
    %c0_i32 = arith.constant 0 : i32
    %c0_i32_0 = arith.constant 0 : i32
    %c0_i32_1 = arith.constant 0 : i32
    return %c0_i32, %c0_i32_0 : i32, i32
  }
  func.func @transform_3(%arg0: i32) -> (i32, i32) {
    %c0_i32 = arith.constant 0 : i32
    %c0_i32_0 = arith.constant 0 : i32
    return %arg0, %c0_i32 : i32, i32
  }
  func.func @transform_4(%arg0: i32) -> (i32, i32) {
    %c0_i32 = arith.constant 0 : i32
    %c0_i32_0 = arith.constant 0 : i32
    return %arg0, %c0_i32 : i32, i32
  }
}

module attributes {stable_mosaic.version = 11 : i64} {
  func.func @_proj_split_kernel(%arg0: i32, %arg1: memref<16x32xf32, #tpu.memory_space<vmem>>, %arg2: memref<32x128xbf16, #tpu.memory_space<vmem>>, %arg3: memref<1x128xf32, #tpu.memory_space<vmem>>, %arg4: memref<16x128xf32, #tpu.memory_space<vmem>>) attributes {dimension_semantics = [#tpu.dimension_semantics<parallel>], iteration_bounds = array<i64: 1>, scalar_prefetch = 0 : i64, scratch_operands = 0 : i64, tpu.core_type = #tpu.core_type<tc>, window_params = [{transform_indices = @transform_0, window_bounds = array<i64: 16, 32>}, {pipeline_mode = #tpu.pipeline_mode<synchronous>, transform_indices = @transform_1, window_bounds = array<i64: 32, 128>}, {pipeline_mode = #tpu.pipeline_mode<synchronous>, transform_indices = @transform_2, window_bounds = array<i64: 1, 128>}, {transform_indices = @transform_3, window_bounds = array<i64: 16, 128>}]} {
    %c0 = arith.constant 0 : index
    %c0_0 = arith.constant 0 : index
    %0 = vector.load %arg1[%c0, %c0_0] : memref<16x32xf32, #tpu.memory_space<vmem>>, vector<16x32xf32>
    %1 = arith.truncf %0 : vector<16x32xf32> to vector<16x32xbf16>
    %c0_1 = arith.constant 0 : index
    %c0_2 = arith.constant 0 : index
    %2 = vector.load %arg2[%c0_1, %c0_2] : memref<32x128xbf16, #tpu.memory_space<vmem>>, vector<32x128xbf16>
    %cst = arith.constant dense<0.000000e+00> : vector<16x128xf32>
    %3 = tpu.matmul %1, %2, %cst {dimension_numbers = #tpu.dot_dimension_numbers<[1], [0], [0], [1], [0, 0, 1, 1], [], []>} : vector<16x32xbf16>, vector<32x128xbf16>, vector<16x128xf32> -> vector<16x128xf32>
    %c0_3 = arith.constant 0 : index
    %c0_4 = arith.constant 0 : index
    %4 = vector.load %arg3[%c0_3, %c0_4] : memref<1x128xf32, #tpu.memory_space<vmem>>, vector<1x128xf32>
    %5 = vector.broadcast %4 : vector<1x128xf32> to vector<16x128xf32>
    %6 = arith.addf %3, %5 : vector<16x128xf32>
    %c0_5 = arith.constant 0 : index
    %c0_6 = arith.constant 0 : index
    %7 = vector.load %arg4[%c0_5, %c0_6] : memref<16x128xf32, #tpu.memory_space<vmem>>, vector<16x128xf32>
    tpu.vector_store %arg4[%c0_5, %c0_6], %6 {strides = array<i32>} : memref<16x128xf32, #tpu.memory_space<vmem>>, vector<16x128xf32>,
    return
  }
  func.func @transform_0(%arg0: i32) -> (i32, i32) {
    %c0_i32 = arith.constant 0 : i32
    %c0_i32_0 = arith.constant 0 : i32
    return %arg0, %c0_i32 : i32, i32
  }
  func.func @transform_1(%arg0: i32) -> (i32, i32) {
    %c0_i32 = arith.constant 0 : i32
    %c0_i32_0 = arith.constant 0 : i32
    %c0_i32_1 = arith.constant 0 : i32
    return %c0_i32, %c0_i32_0 : i32, i32
  }
  func.func @transform_2(%arg0: i32) -> (i32, i32) {
    %c0_i32 = arith.constant 0 : i32
    %c0_i32_0 = arith.constant 0 : i32
    %c0_i32_1 = arith.constant 0 : i32
    return %c0_i32, %c0_i32_0 : i32, i32
  }
  func.func @transform_3(%arg0: i32) -> (i32, i32) {
    %c0_i32 = arith.constant 0 : i32
    %c0_i32_0 = arith.constant 0 : i32
    return %arg0, %c0_i32 : i32, i32
  }
}

</mosaic_0001>

<bundles_post_ra>
// kernel: transformer_forward.33
= control target key start
LH: loop header
LB: loop body
LE: loop exit
PB: predicated region body
PF: predicated region fallthrough
CT: control target
= control target key end

     0   :  { %vm41_vm0 = vcmask 261120   ;;  %s108_s28 = smov 96   ;;  %s179_s1 = inlined_call_operand.vmem [shape: bf16[32,96], index: 1, kind: input, shape index: {}]   ;;  %s180_s0 = inlined_call_operand.vmem [shape: f32[16,32], index: 0, kind: input, shape index: {}]   ;;  %s181_s2 = inlined_call_operand.vmem [shape: f32[1,96], index: 2, kind: input, shape index: {}]   ;;  %s182_s3 = inlined_call_operand.vmem [shape: f32[16,32], index: 3, kind: output, shape index: {0}]   ;;  %s183_s5 = inlined_call_operand.vmem [shape: f32[16,32], index: 5, kind: output, shape index: {2}]   ;;  %s184_s4 = inlined_call_operand.vmem [shape: f32[16,32], index: 4, kind: output, shape index: {1}]  }
   0x1   :  { %v103_v0 = vld [vmem:[%s179_s1 + $0x8] sm:$0xff]  ;;  %v102_v1 = vld [vmem:[%s179_s1] sm:$0xff]  ;;  %s107_s1 = smov 64  }
   0x2   :  { %51 = vmatpush.bf16.msra.mxu0 %v103_v0  ;;  %v18_v2 = vld [vmem:[%s180_s0] sm:$0xff]  ;;  %v19_v3 = vld [vmem:[%s180_s0 + $0x8] sm:$0xff] }
   0x3   :  { %v20_v4 = vpack.c.bf16 %v19_v3, %v18_v2  ;;  %v106_v5 = vld [vmem:[%s181_s2] ss:$0 sm:$0xff] }
   0x6   :  { %52 = vmatpush.bf16.msra.mxu0 %v102_v1 }
   0x9   :  { %101 = vmatmul.msk.bf16.vlgmr.msra.gmra.mxu0 %vm41_vm0, %v20_v4 }
  0x86   :  { %v54_v6 = vpop.f32.mrf.mxu0 }
  0x87   :  { %v55_v7 = vadd.f32 %v106_v5, %v54_v6 }
  0x89   :  { %v59_v8 = vmul.f32 0.35355338, %v55_v7  ;;  %73 = vrot.lane.b32.xlu1 %v55_v7, %s107_s1  ;;  %65 = vrot.lane.b32.xlu0 %v55_v7, %s108_s28 }
  0x8b   :  { %61 = vst.msk [vmem:[%s182_s3] sm:$0xff] %vm41_vm0, %v59_v8 }
  0x8e   :  { %v56_v9 = vpop.f32.mrf.mxu0 }
  0x8f   :  { %v57_v10 = vadd.f32 %v106_v5, %v56_v9 }
  0x91   :  { %v60_v11 = vmul.f32 0.35355338, %v57_v10  ;;  %75 = vrot.lane.b32.xlu1 %v57_v10, %s107_s1  ;;  %67 = vrot.lane.b32.xlu0 %v57_v10, %s108_s28 }
  0x93   :  { %62 = vst.msk [vmem:[%s182_s3 + $0x8] sm:$0xff] %vm41_vm0, %v60_v11 }
  0xfb   :  { %v74_v12 = vpop.permute.xlu1 %73  ;;  %v66_v13 = vpop.permute.xlu0 %65 }
  0xfc   :  { %79 = vst.msk [vmem:[%s183_s5] sm:$0xff] %vm41_vm0, %v74_v12 }
  0xfd   :  { %71 = vst.msk [vmem:[%s184_s4] sm:$0xff] %vm41_vm0, %v66_v13 }
 0x103   :  { %v76_v14 = vpop.permute.xlu1 %75  ;;  %v68_v15 = vpop.permute.xlu0 %67 }
 0x104   :  { %80 = vst.msk [vmem:[%s183_s5 + $0x8] sm:$0xff] %vm41_vm0, %v76_v14 }
 0x105   :  { %72 = vst.msk [vmem:[%s184_s4 + $0x8] sm:$0xff] %vm41_vm0, %v68_v15 }

// kernel: transformer_forward.35
= control target key start
LH: loop header
LB: loop body
LE: loop exit
PB: predicated region body
PF: predicated region fallthrough
CT: control target
= control target key end

     0   :  { %vm47_vm0 = vcmask 261120   ;;  %v159_v16 = vmov 32.0   ;;  %s235_s2 = inlined_call_operand.vmem [shape: bf16[32,32], index: 2, kind: input, shape index: {}]   ;;  %s236_s0 = inlined_call_operand.vmem [shape: f32[16,32], index: 0, kind: input, shape index: {}]   ;;  %s237_s3 = inlined_call_operand.vmem [shape: f32[1,32], index: 3, kind: input, shape index: {}]   ;;  %s238_s1 = inlined_call_operand.vmem [shape: f32[16,32], index: 1, kind: input, shape index: {}]   ;;  %s239_s4 = inlined_call_operand.vmem [shape: f32[1,32], index: 4, kind: input, shape index: {}]   ;;  %s240_s5 = inlined_call_operand.vmem [shape: f32[1,32], index: 5, kind: input, shape index: {}]   ;;  %s241_s6 = inlined_call_operand.vmem [shape: f32[16,32], index: 6, kind: output, shape index: {}]  }
   0x1   :  { %v148_v0 = vld [vmem:[%s235_s2 + $0x8] sm:$0xff]  ;;  %v147_v1 = vld [vmem:[%s235_s2] sm:$0xff]  ;;  %153 = vrcp.f32 %v159_v16 }
   0x2   :  { %57 = vmatpush.bf16.msra.mxu0 %v148_v0  ;;  %v24_v2 = vld [vmem:[%s236_s0] sm:$0xff]  ;;  %v25_v3 = vld [vmem:[%s236_s0 + $0x8] sm:$0xff] }
   0x3   :  { %v26_v4 = vpack.c.bf16 %v25_v3, %v24_v2  ;;  %v150_v5 = vld [vmem:[%s237_s3] ss:$0 sm:$0xff]  ;;  %v66_v12 = vld [vmem:[%s238_s1 + $0x8] sm:$0xff] }
   0x4   :  { %v65_v7 = vld [vmem:[%s238_s1] sm:$0xff] }
   0x5   :  { %v151_v47 = vld [vmem:[%s239_s4] ss:$0 sm:$0xff] }
   0x6   :  { %58 = vmatpush.bf16.msra.mxu0 %v147_v1  ;;  %v152_v50 = vld [vmem:[%s240_s5] ss:$0 sm:$0xff] }
   0x7   :  { %v154_v17 = vpop.eup %153 }
   0x8   :  { %v76_v18 = vmul.f32 32.0, %v154_v17  ;;  %vm80_vm1 = vweird.f32 %v154_v17 }
   0x9   :  { %146 = vmatmul.msk.bf16.vlgmr.msra.gmra.mxu0 %vm47_vm0, %v26_v4 }
   0xa   :  { %v77_v19 = vsub.f32 1.0, %v76_v18 }
   0xc   :  { %v78_v20 = vmul.f32 %v154_v17, %v77_v19 }
   0xe   :  { %v79_v21 = vadd.f32 %v154_v17, %v78_v20 }
  0x10   :  { %v81_v22 = vsel %vm80_vm1, %v154_v17, %v79_v21 }
  0x86   :  { %v60_v6 = vpop.f32.mrf.mxu0 }
  0x87   :  { %v61_v8 = vadd.f32 %v150_v5, %v60_v6 }
  0x89   :  { %v67_v9 = vadd.f32 %v65_v7, %v61_v8 }
  0x8b   :  { %v69_v10 = vsel %vm47_vm0, %v67_v9, 0.0 }
  0x8c   :  { %70 = vadd.xlane.f32.xlu0 %v69_v10 }
  0x8e   :  { %v62_v11 = vpop.f32.mrf.mxu0 }
  0x8f   :  { %v63_v13 = vadd.f32 %v150_v5, %v62_v11 }
  0x91   :  { %v68_v14 = vadd.f32 %v66_v12, %v63_v13 }
  0x93   :  { %v72_v15 = vsel %vm47_vm0, %v68_v14, 0.0 }
  0x94   :  { %73 = vadd.xlane.f32.xlu0 %v72_v15 }
  0xff   :  { %v71_v23 = vpop.xlane.xlu0 %70 }
 0x100   :  { %v82_v24 = vmul.f32 %v81_v22, %v71_v23 }
 0x102   :  { %v84_v25 = vsub.f32 %v67_v9, %v82_v24 }
 0x104   :  { %v86_v26 = vmul.f32 %v84_v25, %v84_v25 }
 0x106   :  { %v88_v27 = vsel %vm47_vm0, %v86_v26, 0.0 }
 0x107   :  { %89 = vadd.xlane.f32.xlu1 %v88_v27  ;;  %v74_v28 = vpop.xlane.xlu0 %73 }
 0x108   :  { %v83_v29 = vmul.f32 %v81_v22, %v74_v28 }
 0x10a   :  { %v85_v30 = vsub.f32 %v68_v14, %v83_v29 }
 0x10c   :  { %v87_v31 = vmul.f32 %v85_v30, %v85_v30 }
 0x10e   :  { %v91_v32 = vsel %vm47_vm0, %v87_v31, 0.0 }
 0x10f   :  { %92 = vadd.xlane.f32.xlu1 %v91_v32 }
 0x17a   :  { %v90_v33 = vpop.xlane.xlu1 %89 }
 0x17b   :  { %v94_v34 = vmul.f32 %v90_v33, %v81_v22 }
 0x17d   :  { %v96_v35 = vadd.f32 1e-05, %v94_v34 }
 0x17f   :  { %155 = vrsqrt.f32 %v96_v35  ;;  %vm104_vm3 = vweird.f32 %v96_v35 }
 0x182   :  { %v93_v36 = vpop.xlane.xlu1 %92 }
 0x183   :  { %v95_v37 = vmul.f32 %v93_v36, %v81_v22 }
 0x185   :  { %v156_v38 = vpop.eup %155  ;;  %v97_v39 = vadd.f32 1e-05, %v95_v37 }
 0x186   :  { %v99_v40 = vmul.f32 %v156_v38, %v96_v35  ;;  %vm105_vm2 = vweird.f32 %v156_v38 }
 0x187   :  { %157 = vrsqrt.f32 %v97_v39  ;;  %vm106_vm4 = vmor %vm104_vm3, %vm105_vm2  ;;  %vm114_vm6 = vweird.f32 %v97_v39 }
 0x188   :  { %v100_v41 = vmul.f32 %v156_v38, %v99_v40 }
 0x18a   :  { %v101_v42 = vmul.f32 0.5, %v100_v41 }
 0x18c   :  { %v102_v43 = vsub.f32 1.5, %v101_v42 }
 0x18d   :  { %v158_v44 = vpop.eup %157 }
 0x18e   :  { %v103_v45 = vmul.f32 %v156_v38, %v102_v43  ;;  %v109_v46 = vmul.f32 %v158_v44, %v97_v39  ;;  %vm115_vm5 = vweird.f32 %v158_v44 }
 0x18f   :  { %vm116_vm7 = vmor %vm114_vm6, %vm115_vm5 }
 0x190   :  { %v107_v48 = vsel %vm106_vm4, %v156_v38, %v103_v45  ;;  %v110_v49 = vmul.f32 %v158_v44, %v109_v46 }
 0x191   :  { %v118_v51 = vmul.f32 %v107_v48, %v84_v25 }
 0x192   :  { %v111_v52 = vmul.f32 0.5, %v110_v49 }
 0x193   :  { %v124_v53 = vmul.f32 %v151_v47, %v118_v51 }
 0x194   :  { %v112_v54 = vsub.f32 1.5, %v111_v52 }
 0x195   :  { %v130_v55 = vadd.f32 %v152_v50, %v124_v53 }
 0x196   :  { %v113_v56 = vmul.f32 %v158_v44, %v112_v54 }
 0x197   :  { %132 = vst.msk [vmem:[%s241_s6] sm:$0xff] %vm47_vm0, %v130_v55 }
 0x198   :  { %v117_v57 = vsel %vm116_vm7, %v158_v44, %v113_v56 }
 0x199   :  { %v119_v58 = vmul.f32 %v117_v57, %v85_v30 }
 0x19b   :  { %v125_v59 = vmul.f32 %v151_v47, %v119_v58 }
 0x19d   :  { %v131_v60 = vadd.f32 %v152_v50, %v125_v59 }
 0x19f   :  { %133 = vst.msk [vmem:[%s241_s6 + $0x8] sm:$0xff] %vm47_vm0, %v131_v60 }

// kernel: transformer_forward.36
= control target key start
LH: loop header
LB: loop body
LE: loop exit
PB: predicated region body
PF: predicated region fallthrough
CT: control target
= control target key end

     0   :  { %vm38_vm0 = vcmask 261120   ;;  %s117_s1 = inlined_call_operand.vmem [shape: bf16[32,32], index: 1, kind: input, shape index: {}]   ;;  %s118_s0 = inlined_call_operand.vmem [shape: f32[16,32], index: 0, kind: input, shape index: {}]   ;;  %s119_s2 = inlined_call_operand.vmem [shape: f32[1,32], index: 2, kind: input, shape index: {}]   ;;  %s120_s3 = inlined_call_operand.vmem [shape: f32[16,32], index: 3, kind: output, shape index: {}]  }
   0x1   :  { %v74_v0 = vld [vmem:[%s117_s1 + $0x8] sm:$0xff]  ;;  %v73_v1 = vld [vmem:[%s117_s1] sm:$0xff] }
   0x2   :  { %48 = vmatpush.bf16.msra.mxu0 %v74_v0  ;;  %v15_v2 = vld [vmem:[%s118_s0] sm:$0xff]  ;;  %v16_v3 = vld [vmem:[%s118_s0 + $0x8] sm:$0xff] }
   0x3   :  { %v17_v4 = vpack.c.bf16 %v16_v3, %v15_v2  ;;  %v75_v5 = vld [vmem:[%s119_s2] ss:$0 sm:$0xff] }
   0x6   :  { %49 = vmatpush.bf16.msra.mxu0 %v73_v1 }
   0x9   :  { %72 = vmatmul.msk.bf16.vlgmr.msra.gmra.mxu0 %vm38_vm0, %v17_v4 }
  0x86   :  { %v51_v6 = vpop.f32.mrf.mxu0 }
  0x87   :  { %v52_v7 = vadd.f32 %v75_v5, %v51_v6 }
  0x89   :  { %v56_v8 = vmul.f32 0.35355338, %v52_v7 }
  0x8b   :  { %58 = vst.msk [vmem:[%s120_s3] sm:$0xff] %vm38_vm0, %v56_v8 }
  0x8e   :  { %v53_v9 = vpop.f32.mrf.mxu0 }
  0x8f   :  { %v54_v10 = vadd.f32 %v75_v5, %v53_v9 }
  0x91   :  { %v57_v11 = vmul.f32 0.35355338, %v54_v10 }
  0x93   :  { %59 = vst.msk [vmem:[%s120_s3 + $0x8] sm:$0xff] %vm38_vm0, %v57_v11 }

// kernel: transformer_forward.34
= control target key start
LH: loop header
LB: loop body
LE: loop exit
PB: predicated region body
PF: predicated region fallthrough
CT: control target
= control target key end

     0   :  { %s758_s18 = smov 0   ;;  %s847_s0 = inlined_call_operand.vmem [shape: f32[2,8,32], index: 0, kind: input, shape index: {}]   ;;  %s848_s1 = inlined_call_operand.vmem [shape: f32[2,8,32], index: 1, kind: input, shape index: {}]   ;;  %s849_s2 = inlined_call_operand.vmem [shape: f32[2,8,32], index: 2, kind: input, shape index: {}]   ;;  %s850_s3 = inlined_call_operand.vmem [shape: f32[2,8,1], index: 3, kind: input, shape index: {}]   ;;  %s851_s4 = inlined_call_operand.vmem [shape: f32[2,1,8], index: 4, kind: input, shape index: {}]   ;;  %s852_s5 = inlined_call_operand.vmem [shape: f32[2,8,32], index: 5, kind: output, shape index: {}]  }
   0x1 LB: > { %s661_s19 = sadd.s32 4294967295, %s719_s18   ;;  %p665_p0 = scmp.ge.s32.totalorder %s719_s18, 1  ;;  %s719_s18 = sphi %s758_s18, %s15_s18  }
   0x2   : > { %p221_p1 = scmp.lt.s32.totalorder %s719_s18, 3 }
   0x4   : > { %p222_p2 = pnand %p665_p0, %p221_p1 }
   0x5   : > { %p262_p3 = scmp.lt.s32.totalorder (!%p222_p2), %s661_s19, 1  ;;  %s722_s30 = smov (!%p222_p2), 120  }
   0x6   : > { %225 = sbr.rel (%p222_p2) target bundleno = 1068 (0x42c), region = 40  ;;  %s723_s6 = smov (!%p222_p2), 112  }
   0x7   : > { %s724_s7 = smov (!%p222_p2), 104   ;;  %s725_s14 = smov (!%p222_p2), 8  }
   0x8   : > { %s726_s15 = smov (!%p222_p2), 16   ;;  %s727_s16 = smov (!%p222_p2), 24  }
   0xb   : > { %v721_v0 = vmov 0   ;;  %s856_s19 = smov (!%p262_p3, %s661_s19), 1  ;;  %vm311_vm0 = vcmask 64512   ;;  %v305_v21 = vlaneseq  ;;  %vm347_vm8 = vcmask 1043456  }
   0xc   : > { %696 = vset.pattern.permute.xlu0 %v721_v0  ;;  %s769_s20 = sshll.u32 %s856_s19, 3  ;;  %s280_s10 = scalar_lea.vmem %s851_s4, %s856_s19  ;;  %vm557_vm9 = vcmask 130048   ;;  %vm559_vm10 = vcmask 195584   ;;  %vm561_vm11 = vcmask 261120  }
   0xd   : > { %s269_s23 = scalar_lea.vmem %s848_s1, %s769_s20  ;;  %s265_s26 = scalar_lea.vmem %s847_s0, %s769_s20  ;;  %v294_v16 = vld [vmem:[%s280_s10] sm:$0x1]  ;;  %v306_v24 = vshrl.u32 %v305_v21, 7  ;;  %v308_v25 = vand.u32 127, %v305_v21 }
   0xe   : > { %v288_v1 = vld [vmem:[%s269_s23] sm:$0xff]  ;;  %s277_s29 = scalar_lea.vmem %s850_s3, %s769_s20  ;;  %vm295_vm2 = vcmp.gt.f32.partialorder %v294_v16, 0.5  ;;  %s273_s13 = scalar_lea.vmem %s849_s2, %s769_s20 }
   0xf   : > { %v286_v2 = vld [vmem:[%s265_s26] sm:$0xff]  ;;  %v289_v3 = vpack.c.bf16 %v288_v1, %v288_v1  ;;  %v301_v19 = vsel %vm295_vm2, 1, %v721_v0  ;;  %vm309_vm5 = vcmp.le.s32.totalorder %v308_v25, %v306_v24  ;;  %s284_s21 = scalar_lea.vmem %s852_s5, %s769_s20 }
  0x10   : > { %v287_v4 = vpack.c.bf16 %v286_v2, %v286_v2  ;;  %v292_v5 = vld [vmem:[%s277_s29] sm:$0xff]  ;;  %v302_v22 = vperm.slane %v301_v19, 0 }
  0x11   : > { %vm293_vm1 = vcmp.gt.f32.partialorder %v292_v5, 0.5  ;;  %v316_v6 = vsel %vm311_vm0, %v289_v3, 0  ;;  %v370_v7 = vunpack.c.l.b16 %v289_v3  ;;  %v290_v32 = vld [vmem:[%s273_s13] sm:$0xff] }
  0x12   : > { %v365_v8 = vunpack.c.l.b16 %v287_v4  ;;  %v296_v9 = vsel %vm293_vm1, 1, %v721_v0  ;;  %325 = vmatpush.bf16.xpose.msra.mxu0 %v316_v6  ;;  %vm303_vm3 = vcmp.eq.s32.totalorder %v302_v22, 1  ;;  %v291_v33 = vpack.c.bf16 %v290_v32, %v290_v32 }
  0x13   : > { %298 = vperm.xlu0 %696, %v296_v9   ;;  %v371_v10 = vpack.c.b16 %v370_v7, %v370_v7 }
  0x14   : > { %v366_v11 = vpack.c.b16 %v365_v8, %v365_v8  ;;  %v349_v35 = vsel %vm347_vm8, %v291_v33, 0  ;;  %v407_v53 = vunpack.c.l.b16 %v291_v33 }
  0x15   : > { %372 = vrot.lane.b32.xlu1 %v371_v10, %s722_s30  ;;  %358 = vmatpush.bf16.msra.mxu1 %v349_v35 }
  0x16   : > { %367 = vrot.lane.b32.xlu2 %v366_v11, %s722_s30  ;;  %v408_v54 = vpack.c.b16 %v407_v53, %v407_v53 }
  0x19   : > { %671 = vmatmul.msk.bf16.vlgmr.msra.gmra.mxu0 %vm311_vm0, %v287_v4 }
  0x1e   : > { %432 = vrot.lane.b32.xlu2 %v371_v10, %s723_s6 }
  0x26   : > { %489 = vrot.lane.b32.xlu2 %v371_v10, %s724_s7 }
  0x2e   : > { %430 = vrot.lane.b32.xlu2 %v366_v11, %s723_s6 }
  0x36   : > { %487 = vrot.lane.b32.xlu2 %v366_v11, %s724_s7 }
  0x70   : > { %v368_v12 = vpop.permute.xlu2 %367 }
  0x78   : > { %v433_v13 = vpop.permute.xlu2 %432 }
  0x79   : > { %v438_v34 = vsel %vm311_vm0, %v433_v13, 0 }
  0x7a   : > { %447 = vmatpush.bf16.xpose.msrb.mxu1 %v438_v34 }
  0x80   : > { %v490_v14 = vpop.permute.xlu2 %489 }
  0x81   : > { %v495_v15 = vsel %vm311_vm0, %v490_v14, 0 }
  0x82   : > { %504 = vmatpush.bf16.xpose.msrb.mxu0 %v495_v15 }
  0x85   : > { %v299_v23 = vpop.permute.xlu0 %298 }
  0x86   : > { %vm300_vm4 = vcmp.eq.s32.totalorder %v299_v23, 1 }
  0x87   : > { %v373_v17 = vpop.permute.xlu1 %372  ;;  %vm304_vm6 = vmand %vm300_vm4, %vm303_vm3 }
  0x88   : > { %v431_v18 = vpop.permute.xlu2 %430  ;;  %v378_v20 = vsel %vm311_vm0, %v373_v17, 0  ;;  %vm799_vm7 = vmand %vm304_vm6, %vm309_vm5 }
  0x89   : > { %387 = vmatpush.bf16.xpose.msra.mxu2 %v378_v20 }
  0x90   : > { %v488_v26 = vpop.permute.xlu2 %487  ;;  %673 = vmatmul.msk.bf16.vlgmr.msra.gmra.mxu2 %vm311_vm0, %v368_v12 }
  0x91   : > { %677 = vmatmul.msk.bf16.vlgmr.msrb.gmra.mxu0 %vm311_vm0, %v488_v26 }
  0x96   : > { %v327_v28 = vpop.f32.mrf.mxu0 }
  0x97   : > { %v331_v29 = vsel %vm799_vm7, %v327_v28, -1e+09 }
  0x98   : > { %v332_v30 = vsel %vm311_vm0, %v331_v29, -inf }
  0x99   : > { %333 = vmax.xlane.f32.xlu0 %v332_v30 }
  0x9e   : > { %v329_v31 = vpop.f32.mrf.mxu0 }
 0x10c   : > { %v334_v36 = vpop.xlane.xlu0 %333 }
 0x10d   : > { %v335_v37 = vsub.f32 %v331_v29, %v334_v36 }
 0x10e   : > { %v506_v38 = vpop.f32.mrf.mxu0 }
 0x10f   : > { %v336_v39 = vmul.f32 1.442695, %v335_v37  ;;  %v510_v47 = vsel %vm799_vm7, %v506_v38, -1e+09 }
 0x110   : > { %v511_v48 = vsel %vm311_vm0, %v510_v47, -inf }
 0x111   : > { %697 = vpow2.f32 %v336_v39 }
 0x113   : > { %v389_v40 = vpop.f32.mrf.mxu2 }
 0x114   : > { %v393_v41 = vsel %vm799_vm7, %v389_v40, -1e+09 }
 0x115   : > { %v394_v42 = vsel %vm311_vm0, %v393_v41, -inf }
 0x116   : > { %v508_v43 = vpop.f32.mrf.mxu0  ;;  %395 = vmax.xlane.f32.xlu2 %v394_v42 }
 0x117   : > { %v698_v44 = vpop.eup %697 }
 0x118   : > { %v338_v45 = vsel %vm311_vm0, %v698_v44, 0.0 }
 0x119   : > { %339 = vadd.xlane.f32.xlu1 %v338_v45 }
 0x11b   : > { %v391_v46 = vpop.f32.mrf.mxu2 }
 0x121   : > { %512 = vmax.xlane.f32.xlu1 %v511_v48 }
 0x12e   : > { %466 = vrot.lane.b32.xlu2 %v408_v54, %s723_s6 }
 0x13a   : > { %409 = vrot.lane.b32.xlu1 %v408_v54, %s722_s30 }
 0x189   : > { %v396_v56 = vpop.xlane.xlu2 %395 }
 0x18a   : > { %v397_v58 = vsub.f32 %v393_v41, %v396_v56 }
 0x18c   : > { %v340_v49 = vpop.xlane.xlu1 %339  ;;  %v398_v59 = vmul.f32 1.442695, %v397_v58 }
 0x18d   : > { %699 = vrcp.f32 %v340_v49 }
 0x18e   : > { %701 = vpow2.f32 %v398_v59 }
 0x193   : > { %v700_v50 = vpop.eup %699 }
 0x194   : > { %v342_v51 = vmul.f32 %v700_v50, %v698_v44  ;;  %v513_v60 = vpop.xlane.xlu1 %512  ;;  %v702_v2 = vpop.eup %701 }
 0x195   : > { %v514_v62 = vsub.f32 %v510_v47, %v513_v60  ;;  %v400_v4 = vsel %vm311_vm0, %v702_v2, 0.0 }
 0x196   : > { %v343_v52 = vpack.c.bf16 %v342_v51, %v342_v51 }
 0x197   : > { %v515_v1 = vmul.f32 1.442695, %v514_v62 }
 0x198   : > { %672 = vmatmul.msk.bf16.vlgmr.msra.gmra.mxu1 %vm311_vm0, %v343_v52 }
 0x199   : > { %703 = vpow2.f32 %v515_v1 }
 0x19f   : > { %v704_v5 = vpop.eup %703 }
 0x1a0   : > { %v517_v6 = vsel %vm311_vm0, %v704_v5, 0.0 }
 0x1a8   : > { %675 = vmatmul.msk.bf16.vlgmr.msrb.gmra.mxu1 %vm311_vm0, %v431_v18  ;;  %v467_v18 = vpop.permute.xlu2 %466 }
 0x1a9   : > { %v472_v19 = vsel %vm347_vm8, %v467_v18, 0 }
 0x1ac   : > { %v410_v7 = vpop.permute.xlu1 %409 }
 0x1ad   : > { %v415_v8 = vsel %vm347_vm8, %v410_v7, 0 }
 0x1ae   : > { %424 = vmatpush.bf16.msra.mxu3 %v415_v8 }
 0x1b2   : > { %481 = vmatpush.bf16.msrb.mxu3 %v472_v19 }
 0x215   : > { %v823_v55 = vpop.f32.mrf.mxu1 }
 0x21d   : > { %v362_v57 = vpop.f32.mrf.mxu1 }
 0x225   : > { %v449_v61 = vpop.f32.mrf.mxu1 }
 0x226   : > { %v453_v63 = vsel %vm799_vm7, %v449_v61, -1e+09 }
 0x227   : > { %v454_v0 = vsel %vm311_vm0, %v453_v63, -inf }
 0x228   : > { %455 = vmax.xlane.f32.xlu0 %v454_v0 }
 0x22d   : > { %v451_v3 = vpop.f32.mrf.mxu1 }
 0x230   : > { %401 = vadd.xlane.f32.xlu0 %v400_v4 }
 0x238   : > { %518 = vadd.xlane.f32.xlu0 %v517_v6 }
 0x29b   : > { %v456_v9 = vpop.xlane.xlu0 %455 }
 0x29c   : > { %v457_v10 = vsub.f32 %v453_v63, %v456_v9 }
 0x29e   : > { %v458_v11 = vmul.f32 1.442695, %v457_v10 }
 0x2a0   : > { %705 = vpow2.f32 %v458_v11 }
 0x2a3   : > { %v402_v12 = vpop.xlane.xlu0 %401 }
 0x2a4   : > { %707 = vrcp.f32 %v402_v12 }
 0x2a6   : > { %v706_v13 = vpop.eup %705 }
 0x2a7   : > { %v460_v14 = vsel %vm311_vm0, %v706_v13, 0.0 }
 0x2a8   : > { %461 = vadd.xlane.f32.xlu0 %v460_v14 }
 0x2aa   : > { %v708_v15 = vpop.eup %707 }
 0x2ab   : > { %v404_v16 = vmul.f32 %v708_v15, %v702_v2  ;;  %v519_v20 = vpop.xlane.xlu0 %518 }
 0x2ad   : > { %v405_v17 = vpack.c.bf16 %v404_v16, %v404_v16 }
 0x2af   : > { %674 = vmatmul.msk.bf16.vlgmr.msra.gmra.mxu3 %vm311_vm0, %v405_v17 }
 0x2bc   : > { %523 = vrot.lane.b32.xlu0 %v408_v54, %s724_s7 }
 0x31b   : > { %v462_v21 = vpop.xlane.xlu0 %461 }
 0x31c   : > { %709 = vrcp.f32 %v462_v21 }
 0x31d   : > { %711 = vrcp.f32 %v519_v20 }
 0x322   : > { %v710_v22 = vpop.eup %709 }
 0x323   : > { %v464_v23 = vmul.f32 %v710_v22, %v706_v13  ;;  %v712_v25 = vpop.eup %711 }
 0x324   : > { %v521_v26 = vmul.f32 %v712_v25, %v704_v5 }
 0x325   : > { %v465_v24 = vpack.c.bf16 %v464_v23, %v464_v23 }
 0x326   : > { %v522_v29 = vpack.c.bf16 %v521_v26, %v521_v26 }
 0x327   : > { %676 = vmatmul.msk.bf16.vlgmr.msrb.gmra.mxu3 %vm311_vm0, %v465_v24 }
 0x32e   : > { %v524_v27 = vpop.permute.xlu0 %523 }
 0x32f   : > { %v529_v28 = vsel %vm347_vm8, %v524_v27, 0 }
 0x330   : > { %538 = vmatpush.bf16.msrb.mxu2 %v529_v28 }
 0x332   : > { %v426_v30 = vpop.f32.mrf.mxu3 }
 0x333   : > { %678 = vmatmul.msk.bf16.vlgmr.msrb.gmra.mxu2 %vm311_vm0, %v522_v29  ;;  %545 = vrot.lane.b32.xlu1 %v426_v30, %s725_s14 }
 0x33a   : > { %v428_v31 = vpop.f32.mrf.mxu3 }
 0x3a5   : > { %v546_v36 = vpop.permute.xlu1 %545 }
 0x3a6   : > { %v556_v38 = vsel %vm311_vm0, %v823_v55, %v546_v36 }
 0x3aa   : > { %v483_v32 = vpop.f32.mrf.mxu3 }
 0x3ab   : > { %549 = vrot.lane.b32.xlu1 %v483_v32, %s726_s15 }
 0x3b2   : > { %v485_v33 = vpop.f32.mrf.mxu3 }
 0x3b6   : > { %v540_v34 = vpop.f32.mrf.mxu2 }
 0x3b7   : > { %553 = vrot.lane.b32.xlu1 %v540_v34, %s727_s16 }
 0x3be   : > { %v542_v35 = vpop.f32.mrf.mxu2 }
 0x41d   : > { %v550_v37 = vpop.permute.xlu1 %549 }
 0x41e   : > { %v558_v39 = vsel %vm557_vm9, %v556_v38, %v550_v37 }
 0x429   : > { %v554_v40 = vpop.permute.xlu1 %553 }
 0x42a   : > { %v560_v41 = vsel %vm559_vm10, %v558_v39, %v554_v40 }
 0x42b   : > { %562 = vst.msk [vmem:[%s284_s21] sm:$0xff] %vm561_vm11, %v560_v41 }
 0x42c PF: > { %s15_s18 = sadd.s32 1, %s719_s18  }
 0x42d   : > { %p12_p4 = scmp.ge.s32.totalorder %s15_s18, 4  }
 0x42f   :  { %14 = sbr.rel (!%p12_p4) target bundleno = 1 (0x1), region = 82 }

// kernel: transformer_forward.37
= control target key start
LH: loop header
LB: loop body
LE: loop exit
PB: predicated region body
PF: predicated region fallthrough
CT: control target
= control target key end

     0   :  { %vm40_vm0 = vcmask 261120   ;;  %s91_s26 = smov 96   ;;  %s149_s1 = inlined_call_operand.vmem [shape: bf16[32,64], index: 1, kind: input, shape index: {}]   ;;  %s150_s0 = inlined_call_operand.vmem [shape: f32[16,32], index: 0, kind: input, shape index: {}]   ;;  %s151_s2 = inlined_call_operand.vmem [shape: f32[1,64], index: 2, kind: input, shape index: {}]   ;;  %s152_s3 = inlined_call_operand.vmem [shape: f32[16,32], index: 3, kind: output, shape index: {0}]   ;;  %s153_s4 = inlined_call_operand.vmem [shape: f32[16,32], index: 4, kind: output, shape index: {1}]  }
   0x1   :  { %v88_v0 = vld [vmem:[%s149_s1 + $0x8] sm:$0xff]  ;;  %v87_v1 = vld [vmem:[%s149_s1] sm:$0xff] }
   0x2   :  { %50 = vmatpush.bf16.msra.mxu0 %v88_v0  ;;  %v17_v2 = vld [vmem:[%s150_s0] sm:$0xff]  ;;  %v18_v3 = vld [vmem:[%s150_s0 + $0x8] sm:$0xff] }
   0x3   :  { %v19_v4 = vpack.c.bf16 %v18_v3, %v17_v2  ;;  %v90_v5 = vld [vmem:[%s151_s2] ss:$0 sm:$0xff] }
   0x6   :  { %51 = vmatpush.bf16.msra.mxu0 %v87_v1 }
   0x9   :  { %86 = vmatmul.msk.bf16.vlgmr.msra.gmra.mxu0 %vm40_vm0, %v19_v4 }
  0x86   :  { %v53_v6 = vpop.f32.mrf.mxu0 }
  0x87   :  { %v54_v7 = vadd.f32 %v90_v5, %v53_v6 }
  0x89   :  { %58 = vst.msk [vmem:[%s152_s3] sm:$0xff] %vm40_vm0, %v54_v7  ;;  %62 = vrot.lane.b32.xlu0 %v54_v7, %s91_s26 }
  0x8e   :  { %v55_v8 = vpop.f32.mrf.mxu0 }
  0x8f   :  { %v56_v9 = vadd.f32 %v90_v5, %v55_v8 }
  0x91   :  { %59 = vst.msk [vmem:[%s152_s3 + $0x8] sm:$0xff] %vm40_vm0, %v56_v9  ;;  %64 = vrot.lane.b32.xlu0 %v56_v9, %s91_s26 }
  0xfb   :  { %v63_v10 = vpop.permute.xlu0 %62 }
  0xfc   :  { %68 = vst.msk [vmem:[%s153_s4] sm:$0xff] %vm40_vm0, %v63_v10 }
 0x103   :  { %v65_v11 = vpop.permute.xlu0 %64 }
 0x104   :  { %69 = vst.msk [vmem:[%s153_s4 + $0x8] sm:$0xff] %vm40_vm0, %v65_v11 }

// kernel: transformer_forward.28
= control target key start
LH: loop header
LB: loop body
LE: loop exit
PB: predicated region body
PF: predicated region fallthrough
CT: control target
= control target key end

     0   :  { %vm50_vm0 = vcmask 261120   ;;  %vm107_vm1 = vcmask 523264   ;;  %v239_v26 = vmov 32.0   ;;  %s329_s1 = inlined_call_operand.vmem [shape: bf16[32,64], index: 1, kind: input, shape index: {}]   ;;  %s330_s0 = inlined_call_operand.vmem [shape: f32[16,32], index: 0, kind: input, shape index: {}]   ;;  %s331_s2 = inlined_call_operand.vmem [shape: f32[1,64], index: 2, kind: input, shape index: {}]   ;;  %s332_s4 = inlined_call_operand.vmem [shape: f32[1,32], index: 4, kind: input, shape index: {}]   ;;  %s333_s3 = inlined_call_operand.vmem [shape: bf16[64,32], index: 3, kind: input, shape index: {}]   ;;  %s334_s5 = inlined_call_operand.vmem [shape: f32[1,32], index: 5, kind: input, shape index: {}]   ;;  %s335_s6 = inlined_call_operand.vmem [shape: f32[1,32], index: 6, kind: input, shape index: {}]   ;;  %s336_s7 = inlined_call_operand.vmem [shape: f32[16,32], index: 7, kind: output, shape index: {}]  }
   0x1   :  { %v223_v0 = vld [vmem:[%s329_s1 + $0x8] sm:$0xff]  ;;  %v222_v1 = vld [vmem:[%s329_s1] sm:$0xff]  ;;  %v227_v5 = vld [vmem:[%s333_s3 + $0x18] sm:$0xff]  ;;  %233 = vrcp.f32 %v239_v26 }
   0x2   :  { %60 = vmatpush.bf16.msra.mxu0 %v223_v0  ;;  %v27_v2 = vld [vmem:[%s330_s0] sm:$0xff]  ;;  %v28_v3 = vld [vmem:[%s330_s0 + $0x8] sm:$0xff]  ;;  %115 = vmatpush.bf16.msra.mxu1 %v227_v5  ;;  %v226_v6 = vld [vmem:[%s333_s3 + $0x10] sm:$0xff] }
   0x3   :  { %v29_v4 = vpack.c.bf16 %v28_v3, %v27_v2  ;;  %v225_v7 = vld [vmem:[%s333_s3 + $0x8] sm:$0xff]  ;;  %v224_v8 = vld [vmem:[%s333_s3] sm:$0xff] }
   0x4   :  { %v229_v10 = vld [vmem:[%s331_s2] ss:$0 sm:$0xff] }
   0x5   :  { %v230_v17 = vld [vmem:[%s332_s4] ss:$0 sm:$0xff] }
   0x6   :  { %61 = vmatpush.bf16.msra.mxu0 %v222_v1  ;;  %116 = vmatpush.bf16.msra.mxu1 %v226_v6  ;;  %v231_v57 = vld [vmem:[%s334_s5] ss:$0 sm:$0xff] }
   0x7   :  { %v234_v27 = vpop.eup %233  ;;  %v232_v60 = vld [vmem:[%s335_s6] ss:$0 sm:$0xff] }
   0x8   :  { %v134_v28 = vmul.f32 32.0, %v234_v27  ;;  %vm138_vm2 = vweird.f32 %v234_v27 }
   0x9   :  { %204 = vmatmul.msk.bf16.vlgmr.msra.gmra.mxu0 %vm50_vm0, %v29_v4 }
   0xa   :  { %117 = vmatpush.bf16.msra.mxu1 %v225_v7  ;;  %v135_v29 = vsub.f32 1.0, %v134_v28 }
   0xc   :  { %v136_v30 = vmul.f32 %v234_v27, %v135_v29 }
   0xe   :  { %118 = vmatpush.bf16.msra.mxu1 %v224_v8  ;;  %v137_v31 = vadd.f32 %v234_v27, %v136_v30 }
  0x10   :  { %v139_v32 = vsel %vm138_vm2, %v234_v27, %v137_v31 }
  0x86   :  { %v63_v9 = vpop.f32.mrf.mxu0 }
  0x87   :  { %v64_v11 = vadd.f32 %v229_v10, %v63_v9 }
  0x89   :  { %v68_v14 = vmax.f32 %v64_v11, 0.0 }
  0x8e   :  { %v65_v12 = vpop.f32.mrf.mxu0 }
  0x8f   :  { %v66_v13 = vadd.f32 %v229_v10, %v65_v12 }
  0x91   :  { %v69_v15 = vmax.f32 %v66_v13, 0.0 }
  0x93   :  { %v70_v16 = vpack.c.bf16 %v69_v15, %v68_v14 }
  0x95   :  { %221 = vmatmul.msk.bf16.vlgmr.msra.gmra.mxu1 %vm107_vm1, %v70_v16 }
 0x112   :  { %v120_v18 = vpop.f32.mrf.mxu1 }
 0x113   :  { %v121_v19 = vadd.f32 %v230_v17, %v120_v18 }
 0x115   :  { %v125_v20 = vadd.f32 %v121_v19, %v27_v2 }
 0x117   :  { %v127_v21 = vsel %vm50_vm0, %v125_v20, 0.0 }
 0x118   :  { %128 = vadd.xlane.f32.xlu0 %v127_v21 }
 0x11a   :  { %v122_v22 = vpop.f32.mrf.mxu1 }
 0x11b   :  { %v123_v23 = vadd.f32 %v230_v17, %v122_v22 }
 0x11d   :  { %v126_v24 = vadd.f32 %v123_v23, %v28_v3 }
 0x11f   :  { %v130_v25 = vsel %vm50_vm0, %v126_v24, 0.0 }
 0x120   :  { %131 = vadd.xlane.f32.xlu0 %v130_v25 }
 0x18b   :  { %v129_v33 = vpop.xlane.xlu0 %128 }
 0x18c   :  { %v140_v34 = vmul.f32 %v139_v32, %v129_v33 }
 0x18e   :  { %v142_v35 = vsub.f32 %v125_v20, %v140_v34 }
 0x190   :  { %v144_v36 = vmul.f32 %v142_v35, %v142_v35 }
 0x192   :  { %v146_v37 = vsel %vm50_vm0, %v144_v36, 0.0 }
 0x193   :  { %147 = vadd.xlane.f32.xlu1 %v146_v37  ;;  %v132_v38 = vpop.xlane.xlu0 %131 }
 0x194   :  { %v141_v39 = vmul.f32 %v139_v32, %v132_v38 }
 0x196   :  { %v143_v40 = vsub.f32 %v126_v24, %v141_v39 }
 0x198   :  { %v145_v41 = vmul.f32 %v143_v40, %v143_v40 }
 0x19a   :  { %v149_v42 = vsel %vm50_vm0, %v145_v41, 0.0 }
 0x19b   :  { %150 = vadd.xlane.f32.xlu1 %v149_v42 }
 0x206   :  { %v148_v43 = vpop.xlane.xlu1 %147 }
 0x207   :  { %v152_v44 = vmul.f32 %v148_v43, %v139_v32 }
 0x209   :  { %v154_v45 = vadd.f32 1e-05, %v152_v44 }
 0x20b   :  { %235 = vrsqrt.f32 %v154_v45  ;;  %vm162_vm4 = vweird.f32 %v154_v45 }
 0x20e   :  { %v151_v46 = vpop.xlane.xlu1 %150 }
 0x20f   :  { %v153_v47 = vmul.f32 %v151_v46, %v139_v32 }
 0x211   :  { %v236_v48 = vpop.eup %235  ;;  %v155_v49 = vadd.f32 1e-05, %v153_v47 }
 0x212   :  { %v157_v50 = vmul.f32 %v236_v48, %v154_v45  ;;  %vm163_vm3 = vweird.f32 %v236_v48 }
 0x213   :  { %237 = vrsqrt.f32 %v155_v49  ;;  %vm164_vm5 = vmor %vm162_vm4, %vm163_vm3  ;;  %vm172_vm7 = vweird.f32 %v155_v49 }
 0x214   :  { %v158_v51 = vmul.f32 %v236_v48, %v157_v50 }
 0x216   :  { %v159_v52 = vmul.f32 0.5, %v158_v51 }
 0x218   :  { %v160_v53 = vsub.f32 1.5, %v159_v52 }
 0x219   :  { %v238_v54 = vpop.eup %237 }
 0x21a   :  { %v161_v55 = vmul.f32 %v236_v48, %v160_v53  ;;  %v167_v56 = vmul.f32 %v238_v54, %v155_v49  ;;  %vm173_vm6 = vweird.f32 %v238_v54 }
 0x21b   :  { %vm174_vm8 = vmor %vm172_vm7, %vm173_vm6 }
 0x21c   :  { %v165_v58 = vsel %vm164_vm5, %v236_v48, %v161_v55  ;;  %v168_v59 = vmul.f32 %v238_v54, %v167_v56 }
 0x21d   :  { %v176_v61 = vmul.f32 %v165_v58, %v142_v35 }
 0x21e   :  { %v169_v62 = vmul.f32 0.5, %v168_v59 }
 0x21f   :  { %v182_v63 = vmul.f32 %v231_v57, %v176_v61 }
 0x220   :  { %v170_v0 = vsub.f32 1.5, %v169_v62 }
 0x221   :  { %v188_v1 = vadd.f32 %v232_v60, %v182_v63 }
 0x222   :  { %v171_v2 = vmul.f32 %v238_v54, %v170_v0 }
 0x223   :  { %190 = vst.msk [vmem:[%s336_s7] sm:$0xff] %vm50_vm0, %v188_v1 }
 0x224   :  { %v175_v3 = vsel %vm174_vm8, %v238_v54, %v171_v2 }
 0x225   :  { %v177_v4 = vmul.f32 %v175_v3, %v143_v40 }
 0x227   :  { %v183_v5 = vmul.f32 %v231_v57, %v177_v4 }
 0x229   :  { %v189_v6 = vadd.f32 %v232_v60, %v183_v5 }
 0x22b   :  { %191 = vst.msk [vmem:[%s336_s7 + $0x8] sm:$0xff] %vm50_vm0, %v189_v6 }

// kernel: transformer_forward.26
= control target key start
LH: loop header
LB: loop body
LE: loop exit
PB: predicated region body
PF: predicated region fallthrough
CT: control target
= control target key end

     0   :  { %s752_s18 = smov 0   ;;  %s841_s0 = inlined_call_operand.vmem [shape: f32[2,8,32], index: 0, kind: input, shape index: {}]   ;;  %s842_s1 = inlined_call_operand.vmem [shape: f32[2,8,32], index: 1, kind: input, shape index: {}]   ;;  %s843_s2 = inlined_call_operand.vmem [shape: f32[2,8,32], index: 2, kind: input, shape index: {}]   ;;  %s844_s3 = inlined_call_operand.vmem [shape: f32[2,8,1], index: 3, kind: input, shape index: {}]   ;;  %s845_s4 = inlined_call_operand.vmem [shape: f32[2,1,8], index: 4, kind: input, shape index: {}]   ;;  %s846_s5 = inlined_call_operand.vmem [shape: f32[2,8,32], index: 5, kind: output, shape index: {}]  }
   0x1 LB: > { %s655_s19 = sadd.s32 4294967295, %s713_s18   ;;  %p659_p0 = scmp.ge.s32.totalorder %s713_s18, 1  ;;  %s713_s18 = sphi %s752_s18, %s15_s18  }
   0x2   : > { %p221_p1 = scmp.lt.s32.totalorder %s713_s18, 3 }
   0x4   : > { %p222_p2 = pnand %p659_p0, %p221_p1 }
   0x5   : > { %p262_p3 = scmp.lt.s32.totalorder (!%p222_p2), %s655_s19, 1  ;;  %s716_s30 = smov (!%p222_p2), 120  }
   0x6   : > { %225 = sbr.rel (%p222_p2) target bundleno = 1068 (0x42c), region = 40  ;;  %s717_s6 = smov (!%p222_p2), 112  }
   0x7   : > { %s718_s7 = smov (!%p222_p2), 104   ;;  %s719_s14 = smov (!%p222_p2), 8  }
   0x8   : > { %s720_s15 = smov (!%p222_p2), 16   ;;  %s721_s16 = smov (!%p222_p2), 24  }
   0xb   : > { %v715_v0 = vmov 0   ;;  %s850_s19 = smov (!%p262_p3, %s655_s19), 1  ;;  %vm305_vm0 = vcmask 64512   ;;  %vm341_vm6 = vcmask 1043456   ;;  %vm551_vm7 = vcmask 130048  }
   0xc   : > { %690 = vset.pattern.permute.xlu0 %v715_v0  ;;  %s763_s20 = sshll.u32 %s850_s19, 3  ;;  %s280_s10 = scalar_lea.vmem %s845_s4, %s850_s19  ;;  %vm553_vm8 = vcmask 195584   ;;  %vm555_vm9 = vcmask 261120  }
   0xd   : > { %s269_s23 = scalar_lea.vmem %s842_s1, %s763_s20  ;;  %s265_s26 = scalar_lea.vmem %s841_s0, %s763_s20  ;;  %v294_v16 = vld [vmem:[%s280_s10] sm:$0x1] }
   0xe   : > { %v288_v1 = vld [vmem:[%s269_s23] sm:$0xff]  ;;  %s277_s29 = scalar_lea.vmem %s844_s3, %s763_s20  ;;  %vm295_vm2 = vcmp.gt.f32.partialorder %v294_v16, 0.5  ;;  %s273_s13 = scalar_lea.vmem %s843_s2, %s763_s20 }
   0xf   : > { %v286_v2 = vld [vmem:[%s265_s26] sm:$0xff]  ;;  %v289_v3 = vpack.c.bf16 %v288_v1, %v288_v1  ;;  %v301_v20 = vsel %vm295_vm2, 1, %v715_v0  ;;  %s284_s21 = scalar_lea.vmem %s846_s5, %s763_s20 }
  0x10   : > { %v287_v4 = vpack.c.bf16 %v286_v2, %v286_v2  ;;  %v292_v5 = vld [vmem:[%s277_s29] sm:$0xff]  ;;  %v302_v21 = vperm.slane %v301_v20, 0 }
  0x11   : > { %vm293_vm1 = vcmp.gt.f32.partialorder %v292_v5, 0.5  ;;  %v310_v6 = vsel %vm305_vm0, %v289_v3, 0  ;;  %v364_v7 = vunpack.c.l.b16 %v289_v3  ;;  %v290_v29 = vld [vmem:[%s273_s13] sm:$0xff] }
  0x12   : > { %v359_v8 = vunpack.c.l.b16 %v287_v4  ;;  %v296_v9 = vsel %vm293_vm1, 1, %v715_v0  ;;  %319 = vmatpush.bf16.xpose.msra.mxu0 %v310_v6  ;;  %vm303_vm3 = vcmp.eq.s32.totalorder %v302_v21, 1  ;;  %v291_v30 = vpack.c.bf16 %v290_v29, %v290_v29 }
  0x13   : > { %298 = vperm.xlu0 %690, %v296_v9   ;;  %v365_v10 = vpack.c.b16 %v364_v7, %v364_v7 }
  0x14   : > { %v360_v11 = vpack.c.b16 %v359_v8, %v359_v8  ;;  %v343_v32 = vsel %vm341_vm6, %v291_v30, 0  ;;  %v401_v50 = vunpack.c.l.b16 %v291_v30 }
  0x15   : > { %366 = vrot.lane.b32.xlu1 %v365_v10, %s716_s30  ;;  %352 = vmatpush.bf16.msra.mxu1 %v343_v32 }
  0x16   : > { %361 = vrot.lane.b32.xlu2 %v360_v11, %s716_s30  ;;  %v402_v51 = vpack.c.b16 %v401_v50, %v401_v50 }
  0x19   : > { %665 = vmatmul.msk.bf16.vlgmr.msra.gmra.mxu0 %vm305_vm0, %v287_v4 }
  0x1e   : > { %426 = vrot.lane.b32.xlu2 %v365_v10, %s717_s6 }
  0x26   : > { %483 = vrot.lane.b32.xlu2 %v365_v10, %s718_s7 }
  0x2e   : > { %424 = vrot.lane.b32.xlu2 %v360_v11, %s717_s6 }
  0x36   : > { %481 = vrot.lane.b32.xlu2 %v360_v11, %s718_s7 }
  0x70   : > { %v362_v12 = vpop.permute.xlu2 %361 }
  0x78   : > { %v427_v13 = vpop.permute.xlu2 %426 }
  0x79   : > { %v432_v31 = vsel %vm305_vm0, %v427_v13, 0 }
  0x7a   : > { %441 = vmatpush.bf16.xpose.msrb.mxu1 %v432_v31 }
  0x80   : > { %v484_v14 = vpop.permute.xlu2 %483 }
  0x81   : > { %v489_v15 = vsel %vm305_vm0, %v484_v14, 0 }
  0x82   : > { %498 = vmatpush.bf16.xpose.msrb.mxu0 %v489_v15 }
  0x85   : > { %v299_v22 = vpop.permute.xlu0 %298 }
  0x86   : > { %vm300_vm4 = vcmp.eq.s32.totalorder %v299_v22, 1 }
  0x87   : > { %v367_v17 = vpop.permute.xlu1 %366  ;;  %vm793_vm5 = vmand %vm300_vm4, %vm303_vm3 }
  0x88   : > { %v425_v18 = vpop.permute.xlu2 %424  ;;  %v372_v19 = vsel %vm305_vm0, %v367_v17, 0 }
  0x89   : > { %381 = vmatpush.bf16.xpose.msra.mxu2 %v372_v19 }
  0x90   : > { %v482_v23 = vpop.permute.xlu2 %481  ;;  %667 = vmatmul.msk.bf16.vlgmr.msra.gmra.mxu2 %vm305_vm0, %v362_v12 }
  0x91   : > { %671 = vmatmul.msk.bf16.vlgmr.msrb.gmra.mxu0 %vm305_vm0, %v482_v23 }
  0x96   : > { %v321_v25 = vpop.f32.mrf.mxu0 }
  0x97   : > { %v325_v26 = vsel %vm793_vm5, %v321_v25, -1e+09 }
  0x98   : > { %v326_v27 = vsel %vm305_vm0, %v325_v26, -inf }
  0x99   : > { %327 = vmax.xlane.f32.xlu0 %v326_v27 }
  0x9e   : > { %v323_v28 = vpop.f32.mrf.mxu0 }
 0x10c   : > { %v328_v33 = vpop.xlane.xlu0 %327 }
 0x10d   : > { %v329_v34 = vsub.f32 %v325_v26, %v328_v33 }
 0x10e   : > { %v500_v35 = vpop.f32.mrf.mxu0 }
 0x10f   : > { %v330_v36 = vmul.f32 1.442695, %v329_v34  ;;  %v504_v44 = vsel %vm793_vm5, %v500_v35, -1e+09 }
 0x110   : > { %v505_v45 = vsel %vm305_vm0, %v504_v44, -inf }
 0x111   : > { %691 = vpow2.f32 %v330_v36 }
 0x113   : > { %v383_v37 = vpop.f32.mrf.mxu2 }
 0x114   : > { %v387_v38 = vsel %vm793_vm5, %v383_v37, -1e+09 }
 0x115   : > { %v388_v39 = vsel %vm305_vm0, %v387_v38, -inf }
 0x116   : > { %v502_v40 = vpop.f32.mrf.mxu0  ;;  %389 = vmax.xlane.f32.xlu2 %v388_v39 }
 0x117   : > { %v692_v41 = vpop.eup %691 }
 0x118   : > { %v332_v42 = vsel %vm305_vm0, %v692_v41, 0.0 }
 0x119   : > { %333 = vadd.xlane.f32.xlu1 %v332_v42 }
 0x11b   : > { %v385_v43 = vpop.f32.mrf.mxu2 }
 0x121   : > { %506 = vmax.xlane.f32.xlu1 %v505_v45 }
 0x12e   : > { %460 = vrot.lane.b32.xlu2 %v402_v51, %s717_s6 }
 0x13a   : > { %403 = vrot.lane.b32.xlu1 %v402_v51, %s716_s30 }
 0x189   : > { %v390_v53 = vpop.xlane.xlu2 %389 }
 0x18a   : > { %v391_v55 = vsub.f32 %v387_v38, %v390_v53 }
 0x18c   : > { %v334_v46 = vpop.xlane.xlu1 %333  ;;  %v392_v56 = vmul.f32 1.442695, %v391_v55 }
 0x18d   : > { %693 = vrcp.f32 %v334_v46 }
 0x18e   : > { %695 = vpow2.f32 %v392_v56 }
 0x191   : > { %v461_v15 = vpop.permute.xlu2 %460 }
 0x192   : > { %v466_v16 = vsel %vm341_vm6, %v461_v15, 0 }
 0x193   : > { %v694_v47 = vpop.eup %693 }
 0x194   : > { %v336_v48 = vmul.f32 %v694_v47, %v692_v41  ;;  %v507_v57 = vpop.xlane.xlu1 %506  ;;  %v696_v63 = vpop.eup %695 }
 0x195   : > { %v508_v59 = vsub.f32 %v504_v44, %v507_v57  ;;  %v394_v1 = vsel %vm305_vm0, %v696_v63, 0.0 }
 0x196   : > { %v337_v49 = vpack.c.bf16 %v336_v48, %v336_v48 }
 0x197   : > { %v509_v62 = vmul.f32 1.442695, %v508_v59 }
 0x198   : > { %666 = vmatmul.msk.bf16.vlgmr.msra.gmra.mxu1 %vm305_vm0, %v337_v49 }
 0x199   : > { %697 = vpow2.f32 %v509_v62 }
 0x19f   : > { %v698_v2 = vpop.eup %697 }
 0x1a0   : > { %v511_v3 = vsel %vm305_vm0, %v698_v2, 0.0 }
 0x1a8   : > { %669 = vmatmul.msk.bf16.vlgmr.msrb.gmra.mxu1 %vm305_vm0, %v425_v18 }
 0x1ac   : > { %v404_v4 = vpop.permute.xlu1 %403 }
 0x1ad   : > { %v409_v5 = vsel %vm341_vm6, %v404_v4, 0 }
 0x1ae   : > { %418 = vmatpush.bf16.msra.mxu3 %v409_v5 }
 0x1b2   : > { %475 = vmatpush.bf16.msrb.mxu3 %v466_v16 }
 0x215   : > { %v817_v52 = vpop.f32.mrf.mxu1 }
 0x21d   : > { %v356_v54 = vpop.f32.mrf.mxu1 }
 0x225   : > { %v443_v58 = vpop.f32.mrf.mxu1 }
 0x226   : > { %v447_v60 = vsel %vm793_vm5, %v443_v58, -1e+09 }
 0x227   : > { %v448_v61 = vsel %vm305_vm0, %v447_v60, -inf }
 0x228   : > { %449 = vmax.xlane.f32.xlu0 %v448_v61 }
 0x22d   : > { %v445_v0 = vpop.f32.mrf.mxu1 }
 0x230   : > { %395 = vadd.xlane.f32.xlu0 %v394_v1 }
 0x238   : > { %512 = vadd.xlane.f32.xlu0 %v511_v3 }
 0x29b   : > { %v450_v6 = vpop.xlane.xlu0 %449 }
 0x29c   : > { %v451_v7 = vsub.f32 %v447_v60, %v450_v6 }
 0x29e   : > { %v452_v8 = vmul.f32 1.442695, %v451_v7 }
 0x2a0   : > { %699 = vpow2.f32 %v452_v8 }
 0x2a3   : > { %v396_v9 = vpop.xlane.xlu0 %395 }
 0x2a4   : > { %701 = vrcp.f32 %v396_v9 }
 0x2a6   : > { %v700_v10 = vpop.eup %699 }
 0x2a7   : > { %v454_v11 = vsel %vm305_vm0, %v700_v10, 0.0 }
 0x2a8   : > { %455 = vadd.xlane.f32.xlu0 %v454_v11 }
 0x2aa   : > { %v702_v12 = vpop.eup %701 }
 0x2ab   : > { %v398_v13 = vmul.f32 %v702_v12, %v696_v63  ;;  %v513_v17 = vpop.xlane.xlu0 %512 }
 0x2ad   : > { %v399_v14 = vpack.c.bf16 %v398_v13, %v398_v13 }
 0x2af   : > { %668 = vmatmul.msk.bf16.vlgmr.msra.gmra.mxu3 %vm305_vm0, %v399_v14 }
 0x2bc   : > { %517 = vrot.lane.b32.xlu0 %v402_v51, %s718_s7 }
 0x31b   : > { %v456_v18 = vpop.xlane.xlu0 %455 }
 0x31c   : > { %703 = vrcp.f32 %v456_v18 }
 0x31d   : > { %705 = vrcp.f32 %v513_v17 }
 0x322   : > { %v704_v19 = vpop.eup %703 }
 0x323   : > { %v458_v20 = vmul.f32 %v704_v19, %v700_v10  ;;  %v706_v22 = vpop.eup %705 }
 0x324   : > { %v515_v23 = vmul.f32 %v706_v22, %v698_v2 }
 0x325   : > { %v459_v21 = vpack.c.bf16 %v458_v20, %v458_v20 }
 0x326   : > { %v516_v26 = vpack.c.bf16 %v515_v23, %v515_v23 }
 0x327   : > { %670 = vmatmul.msk.bf16.vlgmr.msrb.gmra.mxu3 %vm305_vm0, %v459_v21 }
 0x32e   : > { %v518_v24 = vpop.permute.xlu0 %517 }
 0x32f   : > { %v523_v25 = vsel %vm341_vm6, %v518_v24, 0 }
 0x330   : > { %532 = vmatpush.bf16.msrb.mxu2 %v523_v25 }
 0x332   : > { %v420_v27 = vpop.f32.mrf.mxu3 }
 0x333   : > { %672 = vmatmul.msk.bf16.vlgmr.msrb.gmra.mxu2 %vm305_vm0, %v516_v26  ;;  %539 = vrot.lane.b32.xlu1 %v420_v27, %s719_s14 }
 0x33a   : > { %v422_v28 = vpop.f32.mrf.mxu3 }
 0x3a5   : > { %v540_v33 = vpop.permute.xlu1 %539 }
 0x3a6   : > { %v550_v35 = vsel %vm305_vm0, %v817_v52, %v540_v33 }
 0x3aa   : > { %v477_v29 = vpop.f32.mrf.mxu3 }
 0x3ab   : > { %543 = vrot.lane.b32.xlu1 %v477_v29, %s720_s15 }
 0x3b2   : > { %v479_v30 = vpop.f32.mrf.mxu3 }
 0x3b6   : > { %v534_v31 = vpop.f32.mrf.mxu2 }
 0x3b7   : > { %547 = vrot.lane.b32.xlu1 %v534_v31, %s721_s16 }
 0x3be   : > { %v536_v32 = vpop.f32.mrf.mxu2 }
 0x41d   : > { %v544_v34 = vpop.permute.xlu1 %543 }
 0x41e   : > { %v552_v36 = vsel %vm551_vm7, %v550_v35, %v544_v34 }
 0x429   : > { %v548_v37 = vpop.permute.xlu1 %547 }
 0x42a   : > { %v554_v38 = vsel %vm553_vm8, %v552_v36, %v548_v37 }
 0x42b   : > { %556 = vst.msk [vmem:[%s284_s21] sm:$0xff] %vm555_vm9, %v554_v38 }
 0x42c PF: > { %s15_s18 = sadd.s32 1, %s713_s18  }
 0x42d   : > { %p12_p4 = scmp.ge.s32.totalorder %s15_s18, 4  }
 0x42f   :  { %14 = sbr.rel (!%p12_p4) target bundleno = 1 (0x1), region = 82 }

// kernel: transformer_forward.39
= control target key start
LH: loop header
LB: loop body
LE: loop exit
PB: predicated region body
PF: predicated region fallthrough
CT: control target
= control target key end

     0   :  { %11 = vsyncpa [#allocation3], 0  ;;  %s321_s0 = inlined_call_operand.vmem [shape: f32[16,32], index: 0, kind: input, shape index: {}]   ;;  %s322_s1 = inlined_call_operand.vmem [shape: f32[16,32], index: 1, kind: input, shape index: {}]   ;;  %s323_s2 = inlined_call_operand.vmem [shape: bf16[32,32], index: 2, kind: input, shape index: {}]   ;;  %s324_s3 = inlined_call_operand.vmem [shape: f32[1,32], index: 3, kind: input, shape index: {}]   ;;  %s325_s4 = inlined_call_operand.hbm [shape: f32[1,32], index: 4, kind: input, shape index: {}]   ;;  %s326_s5 = inlined_call_operand.hbm [shape: f32[1,32], index: 5, kind: input, shape index: {}]   ;;  %s327_s6 = inlined_call_operand.vmem [shape: f32[16,32], index: 6, kind: output, shape index: {}]  }
   0x1   :  { %s26_s23 = sshll.u32 %s325_s4, 4  ;;  %s27_s23 = int_to_ptr.hbm [resolvable:$true] %s26_s23 }
   0x2   :  { %12 = vsyncpa [#allocation5], 0  ;;  %s243_s24 = smov [#allocation2]   ;;  %s37_s28 = sshll.u32 %s326_s5, 4  ;;  %s38_s28 = int_to_ptr.hbm [resolvable:$true] %s37_s28 }
   0x3   :  { %s28_s25 = sshll.u32 %s243_s24, 4  ;;  %s244_s29 = smov [#allocation4]   ;;  %s29_s25 = int_to_ptr.vmem [resolvable:$true] %s28_s25 }
   0x4   :  { %31 = dma.hbm_to_vmem [thread:$0]  %s27_s23, 16, %s29_s25, [#allocation3]  }
   0x5   :  { %s39_s30 = sshll.u32 %s244_s29, 4  ;;  %s40_s30 = int_to_ptr.vmem [resolvable:$true] %s39_s30 }
   0x6   :  { %42 = dma.hbm_to_vmem [thread:$0]  %s38_s28, 16, %s40_s30, [#allocation5]  }
   0x7   :  { %239 = dma.done.wait [#allocation3], 16  }
   0x8   :  { %240 = vsyncadd [#allocation3], 4294967280 }
   0x9   :  { %241 = dma.done.wait [#allocation5], 16  }
   0xa   :  { %242 = vsyncadd [#allocation5], 4294967280  ;;  %v178_v0 = vld [vmem:[%s323_s2 + $0x8] sm:$0xff]  ;;  %v177_v1 = vld [vmem:[%s323_s2] sm:$0xff]  ;;  %vm75_vm0 = vcmask 261120   ;;  %v245_v16 = vmov 32.0  }
   0xb   :  { %v52_v2 = vld [vmem:[%s321_s0] sm:$0xff]  ;;  %85 = vmatpush.bf16.msra.mxu0 %v178_v0  ;;  %v53_v3 = vld [vmem:[%s321_s0 + $0x8] sm:$0xff]  ;;  %185 = vrcp.f32 %v245_v16 }
   0xc   :  { %v54_v4 = vpack.c.bf16 %v53_v3, %v52_v2  ;;  %v182_v5 = vld [vmem:[%s324_s3] ss:$0 sm:$0xff]  ;;  %v94_v12 = vld [vmem:[%s322_s1 + $0x8] sm:$0xff]  ;;  %v184_v50 = vld [vmem:[#allocation4] ss:$0 sm:$0xff] }
   0xd   :  { %v93_v7 = vld [vmem:[%s322_s1] sm:$0xff] }
   0xe   :  { %v183_v47 = vld [vmem:[#allocation2] ss:$0 sm:$0xff] }
   0xf   :  { %86 = vmatpush.bf16.msra.mxu0 %v177_v1 }
  0x11   :  { %v186_v17 = vpop.eup %185 }
  0x12   :  { %176 = vmatmul.msk.bf16.vlgmr.msra.gmra.mxu0 %vm75_vm0, %v54_v4  ;;  %v104_v18 = vmul.f32 32.0, %v186_v17  ;;  %vm108_vm1 = vweird.f32 %v186_v17 }
  0x14   :  { %v105_v19 = vsub.f32 1.0, %v104_v18 }
  0x16   :  { %v106_v20 = vmul.f32 %v186_v17, %v105_v19 }
  0x18   :  { %v107_v21 = vadd.f32 %v186_v17, %v106_v20 }
  0x1a   :  { %v109_v22 = vsel %vm108_vm1, %v186_v17, %v107_v21 }
  0x8f   :  { %v88_v6 = vpop.f32.mrf.mxu0 }
  0x90   :  { %v89_v8 = vadd.f32 %v182_v5, %v88_v6 }
  0x92   :  { %v95_v9 = vadd.f32 %v93_v7, %v89_v8 }
  0x94   :  { %v97_v10 = vsel %vm75_vm0, %v95_v9, 0.0 }
  0x95   :  { %98 = vadd.xlane.f32.xlu0 %v97_v10 }
  0x97   :  { %v90_v11 = vpop.f32.mrf.mxu0 }
  0x98   :  { %v91_v13 = vadd.f32 %v182_v5, %v90_v11 }
  0x9a   :  { %v96_v14 = vadd.f32 %v94_v12, %v91_v13 }
  0x9c   :  { %v100_v15 = vsel %vm75_vm0, %v96_v14, 0.0 }
  0x9d   :  { %101 = vadd.xlane.f32.xlu0 %v100_v15 }
 0x108   :  { %v99_v23 = vpop.xlane.xlu0 %98 }
 0x109   :  { %v110_v24 = vmul.f32 %v109_v22, %v99_v23 }
 0x10b   :  { %v112_v25 = vsub.f32 %v95_v9, %v110_v24 }
 0x10d   :  { %v114_v26 = vmul.f32 %v112_v25, %v112_v25 }
 0x10f   :  { %v116_v27 = vsel %vm75_vm0, %v114_v26, 0.0 }
 0x110   :  { %117 = vadd.xlane.f32.xlu1 %v116_v27  ;;  %v102_v28 = vpop.xlane.xlu0 %101 }
 0x111   :  { %v111_v29 = vmul.f32 %v109_v22, %v102_v28 }
 0x113   :  { %v113_v30 = vsub.f32 %v96_v14, %v111_v29 }
 0x115   :  { %v115_v31 = vmul.f32 %v113_v30, %v113_v30 }
 0x117   :  { %v119_v32 = vsel %vm75_vm0, %v115_v31, 0.0 }
 0x118   :  { %120 = vadd.xlane.f32.xlu1 %v119_v32 }
 0x183   :  { %v118_v33 = vpop.xlane.xlu1 %117 }
 0x184   :  { %v122_v34 = vmul.f32 %v118_v33, %v109_v22 }
 0x186   :  { %v124_v35 = vadd.f32 1e-05, %v122_v34 }
 0x188   :  { %187 = vrsqrt.f32 %v124_v35  ;;  %vm132_vm3 = vweird.f32 %v124_v35 }
 0x18b   :  { %v121_v36 = vpop.xlane.xlu1 %120 }
 0x18c   :  { %v123_v37 = vmul.f32 %v121_v36, %v109_v22 }
 0x18e   :  { %v188_v38 = vpop.eup %187  ;;  %v125_v39 = vadd.f32 1e-05, %v123_v37 }
 0x18f   :  { %v127_v40 = vmul.f32 %v188_v38, %v124_v35  ;;  %vm133_vm2 = vweird.f32 %v188_v38 }
 0x190   :  { %189 = vrsqrt.f32 %v125_v39  ;;  %vm134_vm4 = vmor %vm132_vm3, %vm133_vm2  ;;  %vm142_vm6 = vweird.f32 %v125_v39 }
 0x191   :  { %v128_v41 = vmul.f32 %v188_v38, %v127_v40 }
 0x193   :  { %v129_v42 = vmul.f32 0.5, %v128_v41 }
 0x195   :  { %v130_v43 = vsub.f32 1.5, %v129_v42 }
 0x196   :  { %v190_v44 = vpop.eup %189 }
 0x197   :  { %v131_v45 = vmul.f32 %v188_v38, %v130_v43  ;;  %v137_v46 = vmul.f32 %v190_v44, %v125_v39  ;;  %vm143_vm5 = vweird.f32 %v190_v44 }
 0x198   :  { %vm144_vm7 = vmor %vm142_vm6, %vm143_vm5 }
 0x199   :  { %v135_v48 = vsel %vm134_vm4, %v188_v38, %v131_v45  ;;  %v138_v49 = vmul.f32 %v190_v44, %v137_v46 }
 0x19a   :  { %v146_v51 = vmul.f32 %v135_v48, %v112_v25 }
 0x19b   :  { %v139_v52 = vmul.f32 0.5, %v138_v49 }
 0x19c   :  { %v152_v53 = vmul.f32 %v183_v47, %v146_v51 }
 0x19d   :  { %v140_v54 = vsub.f32 1.5, %v139_v52 }
 0x19e   :  { %v158_v55 = vadd.f32 %v184_v50, %v152_v53 }
 0x19f   :  { %v141_v56 = vmul.f32 %v190_v44, %v140_v54 }
 0x1a0   :  { %160 = vst.msk [vmem:[%s327_s6] sm:$0xff] %vm75_vm0, %v158_v55 }
 0x1a1   :  { %v145_v57 = vsel %vm144_vm7, %v190_v44, %v141_v56 }
 0x1a2   :  { %v147_v58 = vmul.f32 %v145_v57, %v113_v30 }
 0x1a4   :  { %v153_v59 = vmul.f32 %v183_v47, %v147_v58 }
 0x1a6   :  { %v159_v60 = vadd.f32 %v184_v50, %v153_v59 }
 0x1a8   :  { %161 = vst.msk [vmem:[%s327_s6 + $0x8] sm:$0xff] %vm75_vm0, %v159_v60 }
 0x1a9   :  { %166 = vsyncpa [#allocation3], 1 }
 0x1aa   :  { %167 = vsyncpa [#allocation5], 1 }

// kernel: transformer_forward.40
= control target key start
LH: loop header
LB: loop body
LE: loop exit
PB: predicated region body
PF: predicated region fallthrough
CT: control target
= control target key end

     0   :  { %12 = vsyncpa [#allocation3], 0  ;;  %s497_s0 = inlined_call_operand.vmem [shape: f32[16,32], index: 0, kind: input, shape index: {}]   ;;  %s498_s1 = inlined_call_operand.vmem [shape: bf16[32,64], index: 1, kind: input, shape index: {}]   ;;  %s499_s2 = inlined_call_operand.hbm [shape: f32[1,64], index: 2, kind: input, shape index: {}]   ;;  %s500_s3 = inlined_call_operand.vmem [shape: bf16[64,32], index: 3, kind: input, shape index: {}]   ;;  %s501_s4 = inlined_call_operand.hbm [shape: f32[1,32], index: 4, kind: input, shape index: {}]   ;;  %s502_s5 = inlined_call_operand.hbm [shape: f32[1,32], index: 5, kind: input, shape index: {}]   ;;  %s503_s6 = inlined_call_operand.hbm [shape: f32[1,32], index: 6, kind: input, shape index: {}]   ;;  %s504_s7 = inlined_call_operand.vmem [shape: f32[16,32], index: 7, kind: output, shape index: {}]  }
   0x1   :  { %13 = vsyncpa [#allocation5], 0  ;;  %s37_s26 = sshll.u32 %s501_s4, 4  ;;  %s38_s26 = int_to_ptr.hbm [resolvable:$true] %s37_s26 }
   0x2   :  { %14 = vsyncpa [#allocation8], 0  ;;  %s403_s27 = smov [#allocation4]   ;;  %s24_s8 = sshll.u32 %s499_s2, 4  ;;  %s25_s8 = int_to_ptr.hbm [resolvable:$true] %s24_s8 }
   0x3   :  { %s39_s28 = sshll.u32 %s403_s27, 4  ;;  %s404_s9 = smov [#allocation2]   ;;  %s40_s28 = int_to_ptr.vmem [resolvable:$true] %s39_s28 }
   0x4   :  { %42 = dma.hbm_to_vmem [thread:$0]  %s38_s26, 16, %s40_s28, [#allocation5]  }
   0x5   :  { %s26_s10 = sshll.u32 %s404_s9, 4  ;;  %s48_s13 = sshll.u32 %s502_s5, 4  ;;  %s27_s10 = int_to_ptr.vmem [resolvable:$true] %s26_s10  ;;  %s49_s13 = int_to_ptr.hbm [resolvable:$true] %s48_s13 }
   0x6   :  { %29 = dma.hbm_to_vmem [thread:$0]  %s25_s8, 16, %s27_s10, [#allocation3]  }
   0x7   :  { %s59_s15 = sshll.u32 %s503_s6, 4  ;;  %s405_s16 = smov [#allocation6]   ;;  %s60_s15 = int_to_ptr.hbm [resolvable:$true] %s59_s15 }
   0x8   :  { %s50_s17 = sshll.u32 %s405_s16, 4  ;;  %s406_s2 = smov [#allocation7]   ;;  %s51_s17 = int_to_ptr.vmem [resolvable:$true] %s50_s17 }
   0x9   :  { %53 = dma.hbm_to_vmem [thread:$0]  %s49_s13, 16, %s51_s17, [#allocation5]  }
   0xa   :  { %s61_s18 = sshll.u32 %s406_s2, 4  ;;  %s62_s18 = int_to_ptr.vmem [resolvable:$true] %s61_s18 }
   0xb   :  { %64 = dma.hbm_to_vmem [thread:$0]  %s60_s15, 16, %s62_s18, [#allocation8]  }
   0xc   :  { %397 = dma.done.wait [#allocation3], 16  }
   0xd   :  { %398 = vsyncadd [#allocation3], 4294967280 }
   0xe   :  { %399 = dma.done.wait [#allocation5], 32  }
   0xf   :  { %400 = vsyncadd [#allocation5], 4294967264 }
  0x10   :  { %401 = dma.done.wait [#allocation8], 16  }
  0x11   :  { %402 = vsyncadd [#allocation8], 4294967280  ;;  %v281_v0 = vld [vmem:[%s498_s1 + $0x8] sm:$0xff]  ;;  %v280_v1 = vld [vmem:[%s498_s1] sm:$0xff]  ;;  %vm105_vm0 = vcmask 261120   ;;  %vm162_vm1 = vcmask 523264  }
  0x12   :  { %v82_v2 = vld [vmem:[%s497_s0] sm:$0xff]  ;;  %v83_v3 = vld [vmem:[%s497_s0 + $0x8] sm:$0xff]  ;;  %115 = vmatpush.bf16.msra.mxu0 %v281_v0  ;;  %v285_v5 = vld [vmem:[%s500_s3 + $0x18] sm:$0xff]  ;;  %v407_v26 = vmov 32.0  }
  0x13   :  { %v84_v4 = vpack.c.bf16 %v83_v3, %v82_v2  ;;  %170 = vmatpush.bf16.msra.mxu1 %v285_v5  ;;  %v284_v6 = vld [vmem:[%s500_s3 + $0x10] sm:$0xff]  ;;  %v283_v7 = vld [vmem:[%s500_s3 + $0x8] sm:$0xff]  ;;  %v282_v8 = vld [vmem:[%s500_s3] sm:$0xff]  ;;  %295 = vrcp.f32 %v407_v26 }
  0x14   :  { %v291_v10 = vld [vmem:[#allocation2] ss:$0 sm:$0xff]  ;;  %v292_v17 = vld [vmem:[#allocation4] ss:$0 sm:$0xff]  ;;  %v293_v57 = vld [vmem:[#allocation6] ss:$0 sm:$0xff] }
  0x15   :  { %v294_v60 = vld [vmem:[#allocation7] ss:$0 sm:$0xff] }
  0x16   :  { %116 = vmatpush.bf16.msra.mxu0 %v280_v1 }
  0x17   :  { %171 = vmatpush.bf16.msra.mxu1 %v284_v6 }
  0x19   :  { %262 = vmatmul.msk.bf16.vlgmr.msra.gmra.mxu0 %vm105_vm0, %v84_v4  ;;  %v296_v27 = vpop.eup %295 }
  0x1a   :  { %v189_v28 = vmul.f32 32.0, %v296_v27  ;;  %vm193_vm2 = vweird.f32 %v296_v27 }
  0x1b   :  { %172 = vmatpush.bf16.msra.mxu1 %v283_v7 }
  0x1c   :  { %v190_v29 = vsub.f32 1.0, %v189_v28 }
  0x1e   :  { %v191_v30 = vmul.f32 %v296_v27, %v190_v29 }
  0x1f   :  { %173 = vmatpush.bf16.msra.mxu1 %v282_v8 }
  0x20   :  { %v192_v31 = vadd.f32 %v296_v27, %v191_v30 }
  0x22   :  { %v194_v32 = vsel %vm193_vm2, %v296_v27, %v192_v31 }
  0x96   :  { %v118_v9 = vpop.f32.mrf.mxu0 }
  0x97   :  { %v119_v11 = vadd.f32 %v291_v10, %v118_v9 }
  0x99   :  { %v123_v14 = vmax.f32 %v119_v11, 0.0 }
  0x9e   :  { %v120_v12 = vpop.f32.mrf.mxu0 }
  0x9f   :  { %v121_v13 = vadd.f32 %v291_v10, %v120_v12 }
  0xa1   :  { %v124_v15 = vmax.f32 %v121_v13, 0.0 }
  0xa3   :  { %v125_v16 = vpack.c.bf16 %v124_v15, %v123_v14 }
  0xa5   :  { %279 = vmatmul.msk.bf16.vlgmr.msra.gmra.mxu1 %vm162_vm1, %v125_v16 }
 0x122   :  { %v175_v18 = vpop.f32.mrf.mxu1 }
 0x123   :  { %v176_v19 = vadd.f32 %v292_v17, %v175_v18 }
 0x125   :  { %v180_v20 = vadd.f32 %v176_v19, %v82_v2 }
 0x127   :  { %v182_v21 = vsel %vm105_vm0, %v180_v20, 0.0 }
 0x128   :  { %183 = vadd.xlane.f32.xlu0 %v182_v21 }
 0x12a   :  { %v177_v22 = vpop.f32.mrf.mxu1 }
 0x12b   :  { %v178_v23 = vadd.f32 %v292_v17, %v177_v22 }
 0x12d   :  { %v181_v24 = vadd.f32 %v178_v23, %v83_v3 }
 0x12f   :  { %v185_v25 = vsel %vm105_vm0, %v181_v24, 0.0 }
 0x130   :  { %186 = vadd.xlane.f32.xlu0 %v185_v25 }
 0x19b   :  { %v184_v33 = vpop.xlane.xlu0 %183 }
 0x19c   :  { %v195_v34 = vmul.f32 %v194_v32, %v184_v33 }
 0x19e   :  { %v197_v35 = vsub.f32 %v180_v20, %v195_v34 }
 0x1a0   :  { %v199_v36 = vmul.f32 %v197_v35, %v197_v35 }
 0x1a2   :  { %v201_v37 = vsel %vm105_vm0, %v199_v36, 0.0 }
 0x1a3   :  { %202 = vadd.xlane.f32.xlu1 %v201_v37  ;;  %v187_v38 = vpop.xlane.xlu0 %186 }
 0x1a4   :  { %v196_v39 = vmul.f32 %v194_v32, %v187_v38 }
 0x1a6   :  { %v198_v40 = vsub.f32 %v181_v24, %v196_v39 }
 0x1a8   :  { %v200_v41 = vmul.f32 %v198_v40, %v198_v40 }
 0x1aa   :  { %v204_v42 = vsel %vm105_vm0, %v200_v41, 0.0 }
 0x1ab   :  { %205 = vadd.xlane.f32.xlu1 %v204_v42 }
 0x216   :  { %v203_v43 = vpop.xlane.xlu1 %202 }
 0x217   :  { %v207_v44 = vmul.f32 %v203_v43, %v194_v32 }
 0x219   :  { %v209_v45 = vadd.f32 1e-05, %v207_v44 }
 0x21b   :  { %297 = vrsqrt.f32 %v209_v45  ;;  %vm217_vm4 = vweird.f32 %v209_v45 }
 0x21e   :  { %v206_v46 = vpop.xlane.xlu1 %205 }
 0x21f   :  { %v208_v47 = vmul.f32 %v206_v46, %v194_v32 }
 0x221   :  { %v298_v48 = vpop.eup %297  ;;  %v210_v49 = vadd.f32 1e-05, %v208_v47 }
 0x222   :  { %v212_v50 = vmul.f32 %v298_v48, %v209_v45  ;;  %vm218_vm3 = vweird.f32 %v298_v48 }
 0x223   :  { %299 = vrsqrt.f32 %v210_v49  ;;  %vm219_vm5 = vmor %vm217_vm4, %vm218_vm3  ;;  %vm227_vm7 = vweird.f32 %v210_v49 }
 0x224   :  { %v213_v51 = vmul.f32 %v298_v48, %v212_v50 }
 0x226   :  { %v214_v52 = vmul.f32 0.5, %v213_v51 }
 0x228   :  { %v215_v53 = vsub.f32 1.5, %v214_v52 }
 0x229   :  { %v300_v54 = vpop.eup %299 }
 0x22a   :  { %v216_v55 = vmul.f32 %v298_v48, %v215_v53  ;;  %v222_v56 = vmul.f32 %v300_v54, %v210_v49  ;;  %vm228_vm6 = vweird.f32 %v300_v54 }
 0x22b   :  { %vm229_vm8 = vmor %vm227_vm7, %vm228_vm6 }
 0x22c   :  { %v220_v58 = vsel %vm219_vm5, %v298_v48, %v216_v55  ;;  %v223_v59 = vmul.f32 %v300_v54, %v222_v56 }
 0x22d   :  { %v231_v61 = vmul.f32 %v220_v58, %v197_v35 }
 0x22e   :  { %v224_v62 = vmul.f32 0.5, %v223_v59 }
 0x22f   :  { %v237_v63 = vmul.f32 %v293_v57, %v231_v61 }
 0x230   :  { %v225_v0 = vsub.f32 1.5, %v224_v62 }
 0x231   :  { %v243_v1 = vadd.f32 %v294_v60, %v237_v63 }
 0x232   :  { %v226_v2 = vmul.f32 %v300_v54, %v225_v0 }
 0x233   :  { %245 = vst.msk [vmem:[%s504_s7] sm:$0xff] %vm105_vm0, %v243_v1 }
 0x234   :  { %v230_v3 = vsel %vm229_vm8, %v300_v54, %v226_v2 }
 0x235   :  { %v232_v4 = vmul.f32 %v230_v3, %v198_v40 }
 0x237   :  { %v238_v5 = vmul.f32 %v293_v57, %v232_v4 }
 0x239   :  { %v244_v6 = vadd.f32 %v294_v60, %v238_v5 }
 0x23b   :  { %246 = vst.msk [vmem:[%s504_s7 + $0x8] sm:$0xff] %vm105_vm0, %v244_v6 }
 0x23c   :  { %251 = vsyncpa [#allocation3], 1 }
 0x23d   :  { %252 = vsyncpa [#allocation5], 1 }
 0x23e   :  { %253 = vsyncpa [#allocation8], 1 }

// kernel: transformer_forward.41
= control target key start
LH: loop header
LB: loop body
LE: loop exit
PB: predicated region body
PF: predicated region fallthrough
CT: control target
= control target key end

     0   :  { %11 = vsyncpa [#allocation3], 0  ;;  %s149_s21 = smov [#allocation2]   ;;  %s222_s0 = inlined_call_operand.vmem [shape: f32[16,32], index: 0, kind: input, shape index: {}]   ;;  %s223_s1 = inlined_call_operand.vmem [shape: bf16[32,96], index: 1, kind: input, shape index: {}]   ;;  %s224_s2 = inlined_call_operand.hbm [shape: f32[1,96], index: 2, kind: input, shape index: {}]   ;;  %s225_s3 = inlined_call_operand.vmem [shape: f32[16,32], index: 3, kind: output, shape index: {0}]   ;;  %s226_s4 = inlined_call_operand.vmem [shape: f32[16,32], index: 4, kind: output, shape index: {1}]   ;;  %s227_s5 = inlined_call_operand.vmem [shape: f32[16,32], index: 5, kind: output, shape index: {2}]  }
   0x1   :  { %s21_s20 = sshll.u32 %s224_s2, 4  ;;  %s23_s22 = sshll.u32 %s149_s21, 4  ;;  %s22_s20 = int_to_ptr.hbm [resolvable:$true] %s21_s20  ;;  %s24_s22 = int_to_ptr.vmem [resolvable:$true] %s23_s22 }
   0x2   :  { %26 = dma.hbm_to_vmem [thread:$0]  %s22_s20, 16, %s24_s22, [#allocation3]  }
   0x3   :  { %147 = dma.done.wait [#allocation3], 16  }
   0x4   :  { %148 = vsyncadd [#allocation3], 4294967280  ;;  %v118_v0 = vld [vmem:[%s223_s1 + $0x8] sm:$0xff]  ;;  %v117_v1 = vld [vmem:[%s223_s1] sm:$0xff]  ;;  %vm55_vm0 = vcmask 261120   ;;  %s150_s30 = smov 64  }
   0x5   :  { %65 = vmatpush.bf16.msra.mxu0 %v118_v0  ;;  %v32_v2 = vld [vmem:[%s222_s0] sm:$0xff]  ;;  %v33_v3 = vld [vmem:[%s222_s0 + $0x8] sm:$0xff]  ;;  %s151_s1 = smov 96  }
   0x6   :  { %v34_v4 = vpack.c.bf16 %v33_v3, %v32_v2  ;;  %v122_v5 = vld [vmem:[#allocation2] ss:$0 sm:$0xff] }
   0x9   :  { %66 = vmatpush.bf16.msra.mxu0 %v117_v1 }
   0xc   :  { %116 = vmatmul.msk.bf16.vlgmr.msra.gmra.mxu0 %vm55_vm0, %v34_v4 }
  0x89   :  { %v68_v6 = vpop.f32.mrf.mxu0 }
  0x8a   :  { %v69_v7 = vadd.f32 %v122_v5, %v68_v6 }
  0x8c   :  { %v73_v8 = vmul.f32 0.35355338, %v69_v7  ;;  %87 = vrot.lane.b32.xlu1 %v69_v7, %s150_s30  ;;  %79 = vrot.lane.b32.xlu0 %v69_v7, %s151_s1 }
  0x8e   :  { %75 = vst.msk [vmem:[%s225_s3] sm:$0xff] %vm55_vm0, %v73_v8 }
  0x91   :  { %v70_v9 = vpop.f32.mrf.mxu0 }
  0x92   :  { %v71_v10 = vadd.f32 %v122_v5, %v70_v9 }
  0x94   :  { %v74_v11 = vmul.f32 0.35355338, %v71_v10  ;;  %89 = vrot.lane.b32.xlu1 %v71_v10, %s150_s30  ;;  %81 = vrot.lane.b32.xlu0 %v71_v10, %s151_s1 }
  0x96   :  { %76 = vst.msk [vmem:[%s225_s3 + $0x8] sm:$0xff] %vm55_vm0, %v74_v11 }
  0xfe   :  { %v88_v12 = vpop.permute.xlu1 %87  ;;  %v80_v13 = vpop.permute.xlu0 %79 }
  0xff   :  { %93 = vst.msk [vmem:[%s227_s5] sm:$0xff] %vm55_vm0, %v88_v12 }
 0x100   :  { %85 = vst.msk [vmem:[%s226_s4] sm:$0xff] %vm55_vm0, %v80_v13 }
 0x106   :  { %v90_v14 = vpop.permute.xlu1 %89  ;;  %v82_v15 = vpop.permute.xlu0 %81 }
 0x107   :  { %94 = vst.msk [vmem:[%s227_s5 + $0x8] sm:$0xff] %vm55_vm0, %v90_v14 }
 0x108   :  { %86 = vst.msk [vmem:[%s226_s4 + $0x8] sm:$0xff] %vm55_vm0, %v82_v15 }
 0x109   :  { %107 = vsyncpa [#allocation3], 1 }

// kernel: transformer_forward.44
= control target key start
LH: loop header
LB: loop body
LE: loop exit
PB: predicated region body
PF: predicated region fallthrough
CT: control target
= control target key end

     0   :  { %8 = vsyncpa [#allocation3], 0  ;;  %s118_s15 = smov [#allocation2]   ;;  %s160_s0 = inlined_call_operand.vmem [shape: f32[16,32], index: 0, kind: input, shape index: {}]   ;;  %s161_s1 = inlined_call_operand.vmem [shape: bf16[32,32], index: 1, kind: input, shape index: {}]   ;;  %s162_s2 = inlined_call_operand.hbm [shape: f32[1,32], index: 2, kind: input, shape index: {}]   ;;  %s163_s3 = inlined_call_operand.vmem [shape: f32[16,32], index: 3, kind: output, shape index: {}]  }
   0x1   :  { %s18_s14 = sshll.u32 %s162_s2, 4  ;;  %s20_s16 = sshll.u32 %s118_s15, 4  ;;  %s19_s14 = int_to_ptr.hbm [resolvable:$true] %s18_s14  ;;  %s21_s16 = int_to_ptr.vmem [resolvable:$true] %s20_s16 }
   0x2   :  { %23 = dma.hbm_to_vmem [thread:$0]  %s19_s14, 16, %s21_s16, [#allocation3]  }
   0x3   :  { %116 = dma.done.wait [#allocation3], 16  }
   0x4   :  { %117 = vsyncadd [#allocation3], 4294967280  ;;  %v89_v0 = vld [vmem:[%s161_s1 + $0x8] sm:$0xff]  ;;  %v88_v1 = vld [vmem:[%s161_s1] sm:$0xff]  ;;  %vm52_vm0 = vcmask 261120  }
   0x5   :  { %62 = vmatpush.bf16.msra.mxu0 %v89_v0  ;;  %v29_v2 = vld [vmem:[%s160_s0] sm:$0xff]  ;;  %v30_v3 = vld [vmem:[%s160_s0 + $0x8] sm:$0xff] }
   0x6   :  { %v31_v4 = vpack.c.bf16 %v30_v3, %v29_v2  ;;  %v91_v5 = vld [vmem:[#allocation2] ss:$0 sm:$0xff] }
   0x9   :  { %63 = vmatpush.bf16.msra.mxu0 %v88_v1 }
   0xc   :  { %87 = vmatmul.msk.bf16.vlgmr.msra.gmra.mxu0 %vm52_vm0, %v31_v4 }
  0x89   :  { %v65_v6 = vpop.f32.mrf.mxu0 }
  0x8a   :  { %v66_v7 = vadd.f32 %v91_v5, %v65_v6 }
  0x8c   :  { %v70_v8 = vmul.f32 0.35355338, %v66_v7 }
  0x8e   :  { %72 = vst.msk [vmem:[%s163_s3] sm:$0xff] %vm52_vm0, %v70_v8 }
  0x91   :  { %v67_v9 = vpop.f32.mrf.mxu0 }
  0x92   :  { %v68_v10 = vadd.f32 %v91_v5, %v67_v9 }
  0x94   :  { %v71_v11 = vmul.f32 0.35355338, %v68_v10 }
  0x96   :  { %73 = vst.msk [vmem:[%s163_s3 + $0x8] sm:$0xff] %vm52_vm0, %v71_v11 }
  0x97   :  { %78 = vsyncpa [#allocation3], 1 }

// kernel: transformer_forward.43
= control target key start
LH: loop header
LB: loop body
LE: loop exit
PB: predicated region body
PF: predicated region fallthrough
CT: control target
= control target key end

     0   :  { %11 = vsyncpa [#allocation3], 0  ;;  %s360_s0 = inlined_call_operand.vmem [shape: f32[16,32], index: 0, kind: input, shape index: {}]   ;;  %s361_s1 = inlined_call_operand.vmem [shape: f32[16,32], index: 1, kind: input, shape index: {}]   ;;  %s362_s2 = inlined_call_operand.vmem [shape: bf16[32,32], index: 2, kind: input, shape index: {}]   ;;  %s363_s3 = inlined_call_operand.hbm [shape: f32[1,32], index: 3, kind: input, shape index: {}]   ;;  %s364_s4 = inlined_call_operand.hbm [shape: f32[1,32], index: 4, kind: input, shape index: {}]   ;;  %s365_s5 = inlined_call_operand.hbm [shape: f32[1,32], index: 5, kind: input, shape index: {}]   ;;  %s366_s6 = inlined_call_operand.vmem [shape: f32[16,32], index: 6, kind: output, shape index: {}]  }
   0x1   :  { %12 = vsyncpa [#allocation5], 0  ;;  %s35_s23 = sshll.u32 %s364_s4, 4  ;;  %s281_s24 = smov [#allocation4]   ;;  %s36_s23 = int_to_ptr.hbm [resolvable:$true] %s35_s23 }
   0x2   :  { %s37_s25 = sshll.u32 %s281_s24, 4  ;;  %s24_s28 = sshll.u32 %s363_s3, 4  ;;  %s38_s25 = int_to_ptr.vmem [resolvable:$true] %s37_s25  ;;  %s25_s28 = int_to_ptr.hbm [resolvable:$true] %s24_s28 }
   0x3   :  { %40 = dma.hbm_to_vmem [thread:$0]  %s36_s23, 16, %s38_s25, [#allocation5]  }
   0x4   :  { %s282_s29 = smov [#allocation2]   ;;  %s46_s9 = sshll.u32 %s365_s5, 4  ;;  %s47_s9 = int_to_ptr.hbm [resolvable:$true] %s46_s9 }
   0x5   :  { %s26_s30 = sshll.u32 %s282_s29, 4  ;;  %s283_s4 = smov [#allocation6]   ;;  %s27_s30 = int_to_ptr.vmem [resolvable:$true] %s26_s30 }
   0x6   :  { %29 = dma.hbm_to_vmem [thread:$0]  %s25_s28, 16, %s27_s30, [#allocation3]  }
   0x7   :  { %s48_s10 = sshll.u32 %s283_s4, 4  ;;  %s49_s10 = int_to_ptr.vmem [resolvable:$true] %s48_s10 }
   0x8   :  { %51 = dma.hbm_to_vmem [thread:$0]  %s47_s9, 16, %s49_s10, [#allocation5]  }
   0x9   :  { %277 = dma.done.wait [#allocation3], 16  }
   0xa   :  { %278 = vsyncadd [#allocation3], 4294967280 }
   0xb   :  { %279 = dma.done.wait [#allocation5], 32  }
   0xc   :  { %280 = vsyncadd [#allocation5], 4294967264  ;;  %v191_v0 = vld [vmem:[%s362_s2 + $0x8] sm:$0xff]  ;;  %v190_v1 = vld [vmem:[%s362_s2] sm:$0xff]  ;;  %vm88_vm0 = vcmask 261120   ;;  %v284_v16 = vmov 32.0  }
   0xd   :  { %v65_v2 = vld [vmem:[%s360_s0] sm:$0xff]  ;;  %98 = vmatpush.bf16.msra.mxu0 %v191_v0  ;;  %v66_v3 = vld [vmem:[%s360_s0 + $0x8] sm:$0xff]  ;;  %199 = vrcp.f32 %v284_v16 }
   0xe   :  { %v67_v4 = vpack.c.bf16 %v66_v3, %v65_v2  ;;  %v196_v5 = vld [vmem:[#allocation2] ss:$0 sm:$0xff]  ;;  %v107_v12 = vld [vmem:[%s361_s1 + $0x8] sm:$0xff]  ;;  %v197_v47 = vld [vmem:[#allocation4] ss:$0 sm:$0xff] }
   0xf   :  { %v106_v7 = vld [vmem:[%s361_s1] sm:$0xff] }
  0x10   :  { %v198_v50 = vld [vmem:[#allocation6] ss:$0 sm:$0xff] }
  0x11   :  { %99 = vmatpush.bf16.msra.mxu0 %v190_v1 }
  0x13   :  { %v200_v17 = vpop.eup %199 }
  0x14   :  { %189 = vmatmul.msk.bf16.vlgmr.msra.gmra.mxu0 %vm88_vm0, %v67_v4  ;;  %v117_v18 = vmul.f32 32.0, %v200_v17  ;;  %vm121_vm1 = vweird.f32 %v200_v17 }
  0x16   :  { %v118_v19 = vsub.f32 1.0, %v117_v18 }
  0x18   :  { %v119_v20 = vmul.f32 %v200_v17, %v118_v19 }
  0x1a   :  { %v120_v21 = vadd.f32 %v200_v17, %v119_v20 }
  0x1c   :  { %v122_v22 = vsel %vm121_vm1, %v200_v17, %v120_v21 }
  0x91   :  { %v101_v6 = vpop.f32.mrf.mxu0 }
  0x92   :  { %v102_v8 = vadd.f32 %v196_v5, %v101_v6 }
  0x94   :  { %v108_v9 = vadd.f32 %v106_v7, %v102_v8 }
  0x96   :  { %v110_v10 = vsel %vm88_vm0, %v108_v9, 0.0 }
  0x97   :  { %111 = vadd.xlane.f32.xlu0 %v110_v10 }
  0x99   :  { %v103_v11 = vpop.f32.mrf.mxu0 }
  0x9a   :  { %v104_v13 = vadd.f32 %v196_v5, %v103_v11 }
  0x9c   :  { %v109_v14 = vadd.f32 %v107_v12, %v104_v13 }
  0x9e   :  { %v113_v15 = vsel %vm88_vm0, %v109_v14, 0.0 }
  0x9f   :  { %114 = vadd.xlane.f32.xlu0 %v113_v15 }
 0x10a   :  { %v112_v23 = vpop.xlane.xlu0 %111 }
 0x10b   :  { %v123_v24 = vmul.f32 %v122_v22, %v112_v23 }
 0x10d   :  { %v125_v25 = vsub.f32 %v108_v9, %v123_v24 }
 0x10f   :  { %v127_v26 = vmul.f32 %v125_v25, %v125_v25 }
 0x111   :  { %v129_v27 = vsel %vm88_vm0, %v127_v26, 0.0 }
 0x112   :  { %130 = vadd.xlane.f32.xlu1 %v129_v27  ;;  %v115_v28 = vpop.xlane.xlu0 %114 }
 0x113   :  { %v124_v29 = vmul.f32 %v122_v22, %v115_v28 }
 0x115   :  { %v126_v30 = vsub.f32 %v109_v14, %v124_v29 }
 0x117   :  { %v128_v31 = vmul.f32 %v126_v30, %v126_v30 }
 0x119   :  { %v132_v32 = vsel %vm88_vm0, %v128_v31, 0.0 }
 0x11a   :  { %133 = vadd.xlane.f32.xlu1 %v132_v32 }
 0x185   :  { %v131_v33 = vpop.xlane.xlu1 %130 }
 0x186   :  { %v135_v34 = vmul.f32 %v131_v33, %v122_v22 }
 0x188   :  { %v137_v35 = vadd.f32 1e-05, %v135_v34 }
 0x18a   :  { %201 = vrsqrt.f32 %v137_v35  ;;  %vm145_vm3 = vweird.f32 %v137_v35 }
 0x18d   :  { %v134_v36 = vpop.xlane.xlu1 %133 }
 0x18e   :  { %v136_v37 = vmul.f32 %v134_v36, %v122_v22 }
 0x190   :  { %v202_v38 = vpop.eup %201  ;;  %v138_v39 = vadd.f32 1e-05, %v136_v37 }
 0x191   :  { %v140_v40 = vmul.f32 %v202_v38, %v137_v35  ;;  %vm146_vm2 = vweird.f32 %v202_v38 }
 0x192   :  { %203 = vrsqrt.f32 %v138_v39  ;;  %vm147_vm4 = vmor %vm145_vm3, %vm146_vm2  ;;  %vm155_vm6 = vweird.f32 %v138_v39 }
 0x193   :  { %v141_v41 = vmul.f32 %v202_v38, %v140_v40 }
 0x195   :  { %v142_v42 = vmul.f32 0.5, %v141_v41 }
 0x197   :  { %v143_v43 = vsub.f32 1.5, %v142_v42 }
 0x198   :  { %v204_v44 = vpop.eup %203 }
 0x199   :  { %v144_v45 = vmul.f32 %v202_v38, %v143_v43  ;;  %v150_v46 = vmul.f32 %v204_v44, %v138_v39  ;;  %vm156_vm5 = vweird.f32 %v204_v44 }
 0x19a   :  { %vm157_vm7 = vmor %vm155_vm6, %vm156_vm5 }
 0x19b   :  { %v148_v48 = vsel %vm147_vm4, %v202_v38, %v144_v45  ;;  %v151_v49 = vmul.f32 %v204_v44, %v150_v46 }
 0x19c   :  { %v159_v51 = vmul.f32 %v148_v48, %v125_v25 }
 0x19d   :  { %v152_v52 = vmul.f32 0.5, %v151_v49 }
 0x19e   :  { %v165_v53 = vmul.f32 %v197_v47, %v159_v51 }
 0x19f   :  { %v153_v54 = vsub.f32 1.5, %v152_v52 }
 0x1a0   :  { %v171_v55 = vadd.f32 %v198_v50, %v165_v53 }
 0x1a1   :  { %v154_v56 = vmul.f32 %v204_v44, %v153_v54 }
 0x1a2   :  { %173 = vst.msk [vmem:[%s366_s6] sm:$0xff] %vm88_vm0, %v171_v55 }
 0x1a3   :  { %v158_v57 = vsel %vm157_vm7, %v204_v44, %v154_v56 }
 0x1a4   :  { %v160_v58 = vmul.f32 %v158_v57, %v126_v30 }
 0x1a6   :  { %v166_v59 = vmul.f32 %v197_v47, %v160_v58 }
 0x1a8   :  { %v172_v60 = vadd.f32 %v198_v50, %v166_v59 }
 0x1aa   :  { %174 = vst.msk [vmem:[%s366_s6 + $0x8] sm:$0xff] %vm88_vm0, %v172_v60 }
 0x1ab   :  { %179 = vsyncpa [#allocation3], 1 }
 0x1ac   :  { %180 = vsyncpa [#allocation5], 1 }

// kernel: transformer_forward.49
= control target key start
LH: loop header
LB: loop body
LE: loop exit
PB: predicated region body
PF: predicated region fallthrough
CT: control target
= control target key end

     0   :  { %vm38_vm0 = vcmask 261120   ;;  %s115_s1 = inlined_call_operand.vmem [shape: bf16[32,128], index: 1, kind: input, shape index: {}]   ;;  %s116_s0 = inlined_call_operand.vmem [shape: f32[16,32], index: 0, kind: input, shape index: {}]   ;;  %s117_s2 = inlined_call_operand.vmem [shape: f32[1,128], index: 2, kind: input, shape index: {}]   ;;  %s118_s3 = inlined_call_operand.vmem [shape: f32[16,128], index: 3, kind: output, shape index: {}]  }
   0x1   :  { %v72_v0 = vld [vmem:[%s115_s1 + $0x8] sm:$0xff]  ;;  %v71_v1 = vld [vmem:[%s115_s1] sm:$0xff] }
   0x2   :  { %48 = vmatpush.bf16.msra.mxu0 %v72_v0  ;;  %v15_v2 = vld [vmem:[%s116_s0] sm:$0xff]  ;;  %v16_v3 = vld [vmem:[%s116_s0 + $0x8] sm:$0xff] }
   0x3   :  { %v17_v4 = vpack.c.bf16 %v16_v3, %v15_v2  ;;  %v73_v5 = vld [vmem:[%s117_s2] ss:$0 sm:$0xff] }
   0x6   :  { %49 = vmatpush.bf16.msra.mxu0 %v71_v1 }
   0x9   :  { %70 = vmatmul.msk.bf16.vlgmr.msra.gmra.mxu0 %vm38_vm0, %v17_v4 }
  0x86   :  { %v51_v6 = vpop.f32.mrf.mxu0 }
  0x87   :  { %v52_v7 = vadd.f32 %v73_v5, %v51_v6 }
  0x89   :  { %56 = vst [vmem:[%s118_s3] sm:$0xff] %v52_v7 }
  0x8e   :  { %v53_v8 = vpop.f32.mrf.mxu0 }
  0x8f   :  { %v54_v9 = vadd.f32 %v73_v5, %v53_v8 }
  0x91   :  { %57 = vst [vmem:[%s118_s3 + $0x8] sm:$0xff] %v54_v9 }

// kernel: transformer_forward.45
= control target key start
LH: loop header
LB: loop body
LE: loop exit
PB: predicated region body
PF: predicated region fallthrough
CT: control target
= control target key end

     0   :  { %10 = vsyncpa [#allocation3], 0  ;;  %s133_s18 = smov [#allocation2]   ;;  %s187_s0 = inlined_call_operand.vmem [shape: f32[16,32], index: 0, kind: input, shape index: {}]   ;;  %s188_s1 = inlined_call_operand.vmem [shape: bf16[32,64], index: 1, kind: input, shape index: {}]   ;;  %s189_s2 = inlined_call_operand.hbm [shape: f32[1,64], index: 2, kind: input, shape index: {}]   ;;  %s190_s3 = inlined_call_operand.vmem [shape: f32[16,32], index: 3, kind: output, shape index: {0}]   ;;  %s191_s4 = inlined_call_operand.vmem [shape: f32[16,32], index: 4, kind: output, shape index: {1}]  }
   0x1   :  { %s20_s17 = sshll.u32 %s189_s2, 4  ;;  %s22_s19 = sshll.u32 %s133_s18, 4  ;;  %s21_s17 = int_to_ptr.hbm [resolvable:$true] %s20_s17  ;;  %s23_s19 = int_to_ptr.vmem [resolvable:$true] %s22_s19 }
   0x2   :  { %25 = dma.hbm_to_vmem [thread:$0]  %s21_s17, 16, %s23_s19, [#allocation3]  }
   0x3   :  { %131 = dma.done.wait [#allocation3], 16  }
   0x4   :  { %132 = vsyncadd [#allocation3], 4294967280  ;;  %v103_v0 = vld [vmem:[%s188_s1 + $0x8] sm:$0xff]  ;;  %v102_v1 = vld [vmem:[%s188_s1] sm:$0xff]  ;;  %vm54_vm0 = vcmask 261120   ;;  %s134_s1 = smov 96  }
   0x5   :  { %64 = vmatpush.bf16.msra.mxu0 %v103_v0  ;;  %v31_v2 = vld [vmem:[%s187_s0] sm:$0xff]  ;;  %v32_v3 = vld [vmem:[%s187_s0 + $0x8] sm:$0xff] }
   0x6   :  { %v33_v4 = vpack.c.bf16 %v32_v3, %v31_v2  ;;  %v106_v5 = vld [vmem:[#allocation2] ss:$0 sm:$0xff] }
   0x9   :  { %65 = vmatpush.bf16.msra.mxu0 %v102_v1 }
   0xc   :  { %101 = vmatmul.msk.bf16.vlgmr.msra.gmra.mxu0 %vm54_vm0, %v33_v4 }
  0x89   :  { %v67_v6 = vpop.f32.mrf.mxu0 }
  0x8a   :  { %v68_v7 = vadd.f32 %v106_v5, %v67_v6 }
  0x8c   :  { %72 = vst.msk [vmem:[%s190_s3] sm:$0xff] %vm54_vm0, %v68_v7  ;;  %76 = vrot.lane.b32.xlu0 %v68_v7, %s134_s1 }
  0x91   :  { %v69_v8 = vpop.f32.mrf.mxu0 }
  0x92   :  { %v70_v9 = vadd.f32 %v106_v5, %v69_v8 }
  0x94   :  { %73 = vst.msk [vmem:[%s190_s3 + $0x8] sm:$0xff] %vm54_vm0, %v70_v9  ;;  %78 = vrot.lane.b32.xlu0 %v70_v9, %s134_s1 }
  0xfe   :  { %v77_v10 = vpop.permute.xlu0 %76 }
  0xff   :  { %82 = vst.msk [vmem:[%s191_s4] sm:$0xff] %vm54_vm0, %v77_v10 }
 0x106   :  { %v79_v11 = vpop.permute.xlu0 %78 }
 0x107   :  { %83 = vst.msk [vmem:[%s191_s4 + $0x8] sm:$0xff] %vm54_vm0, %v79_v11 }
 0x108   :  { %92 = vsyncpa [#allocation3], 1 }

</bundles_post_ra>
